<compile_context>
chip_gen: v7x
topology: tpu7x:2x2x1
jax: 0.10.0
libtpu: 0.0.40
codegen_flags: <defaults>
</compile_context>

<pallas_src>
import math

import jax
import jax.numpy as jnp
from jax.experimental import pallas as pl
from jax.experimental.pallas import tpu as pltpu

# ---------------- scaled-down config (structure matches the module) ---------
D_MODEL = 384           # 768 in the module; 3*128 (lane dense), divisible by 12
N_HEAD = 12
HEAD_DIM = D_MODEL // N_HEAD        # 32 (64 in the module)
D_FF = 512              # 4096 in the module
N_LAYERS = 2            # 16 in the module
VOCAB = 128             # 4096 in the module (embedding has VOCAB+1 rows, pad=0)
MAX_LEN = 256
LN_EPS = 1e-5


# ------------------------------ kernel helpers ------------------------------
def _layernorm(x, gamma, beta):
    mu = jnp.mean(x, axis=-1, keepdims=True)
    var = jnp.mean((x - mu) ** 2, axis=-1, keepdims=True)
    return (x - mu) * jax.lax.rsqrt(var + LN_EPS) * gamma + beta


def _gelu(x):
    # TODO(synk): PyTorch 'gelu' is the exact erf form; tanh approximation is
    # used here because erf lowering is not guaranteed in Mosaic.
    return 0.5 * x * (1.0 + jnp.tanh(0.7978845608028654 * (x + 0.044715 * x * x * x)))


# ------------------------------ Pallas kernels ------------------------------
def encoder_stack_kernel(x_ref, maskb_ref,
                         wqkv_ref, bqkv_ref, wo_ref, bo_ref,
                         g1_ref, be1_ref, w1_ref, b1_ref, w2_ref, b2_ref,
                         g2_ref, be2_ref,
                         o_ref,
                         x_scr, ctx_scr):
    """grid = (B, N_LAYERS); activation resident in x_scr across the layer axis."""
    l = pl.program_id(1)

    @pl.when(l == 0)
    def _():
        x_scr[...] = x_ref[0]                       # load activations once per b

    x = x_scr[...]                                  # (S, D) f32, resident in VMEM
    mb = maskb_ref[0]                               # (1, S) additive key-pad bias

    # ---------------- self-attention (nn.MultiheadAttention, eval) ----------
    xb = x.astype(jnp.bfloat16)
    qkv = (jnp.dot(xb, wqkv_ref[0], preferred_element_type=jnp.float32)
           + bqkv_ref[0])                           # (S, 3D) single fused GEMM
    scale = jnp.float32(1.0 / math.sqrt(HEAD_DIM))
    q = (qkv[:, :D_MODEL] * scale).astype(jnp.bfloat16)
    k = qkv[:, D_MODEL:2 * D_MODEL].astype(jnp.bfloat16)
    v = qkv[:, 2 * D_MODEL:].astype(jnp.bfloat16)

    for h in range(N_HEAD):                         # static loop over heads
        sl = slice(h * HEAD_DIM, (h + 1) * HEAD_DIM)
        s = jax.lax.dot_general(q[:, sl], k[:, sl], (((1,), (1,)), ((), ())),
                                preferred_element_type=jnp.float32)   # (S, S)
        s = s + mb                                  # mask padded keys
        s = s - jnp.max(s, axis=-1, keepdims=True)
        p = jnp.exp(s)
        denom = jnp.sum(p, axis=-1, keepdims=True)
        ctx = jnp.dot(p.astype(jnp.bfloat16), v[:, sl],
                      preferred_element_type=jnp.float32)             # (S, hd)
        # normalize the (S,hd) context, not the (S,S) probs; EUP reciprocal
        ctx_scr[:, sl] = ctx * pl.reciprocal(denom, approx=True)

    # single output-projection GEMM over the concatenated heads
    attn = (jnp.dot(ctx_scr[...].astype(jnp.bfloat16), wo_ref[0],
                    preferred_element_type=jnp.float32) + bo_ref[0])

    # post-norm encoder layer (PyTorch default norm_first=False); dropout=eval
    y = _layernorm(x + attn, g1_ref[0], be1_ref[0])
    h1 = _gelu(jnp.dot(y.astype(jnp.bfloat16), w1_ref[0],
                       preferred_element_type=jnp.float32) + b1_ref[0])
    ff = jnp.dot(h1.astype(jnp.bfloat16), w2_ref[0],
                 preferred_element_type=jnp.float32) + b2_ref[0]
    z = _layernorm(y + ff, g2_ref[0], be2_ref[0])

    x_scr[...] = z                                  # carry to next layer

    @pl.when(l == pl.num_programs(1) - 1)
    def _():
        o_ref[0] = z.astype(o_ref.dtype)            # single HBM write-back per b


def linear_kernel(x_ref, w_ref, b_ref, o_ref):
    o_ref[...] = (jnp.dot(x_ref[...].astype(jnp.bfloat16), w_ref[...],
                          preferred_element_type=jnp.float32)
                  + b_ref[...]).astype(o_ref.dtype)


# ------------------------------ pallas_call wrappers ------------------------
def encoder_stack(x, mask_bias, sp):
    """All N_LAYERS encoder layers in one pallas_call."""
    B, S, D = x.shape
    L = sp["wqkv"].shape[0]

    def wspec(a):
        # one layer's slice of the stacked weight, streamed along the layer axis
        return pl.BlockSpec((1,) + a.shape[1:], lambda b, l: (l, 0, 0))

    names = ("wqkv", "bqkv", "wo", "bo", "g1", "be1",
             "w1", "b1", "w2", "b2", "g2", "be2")
    weight_args = [sp[n] for n in names]

    in_specs = ([pl.BlockSpec((1, S, D), lambda b, l: (b, 0, 0)),
                 pl.BlockSpec((1, 1, S), lambda b, l: (b, 0, 0))]
                + [wspec(a) for a in weight_args])

    return pl.pallas_call(
        encoder_stack_kernel,
        out_shape=jax.ShapeDtypeStruct((B, S, D), jnp.float32),
        grid=(B, L),                                # layer axis last, "arbitrary"
        in_specs=in_specs,
        out_specs=pl.BlockSpec((1, S, D), lambda b, l: (b, 0, 0)),
        scratch_shapes=[pltpu.VMEM((S, D), jnp.float32),   # resident activation
                        pltpu.VMEM((S, D), jnp.float32)],  # per-head ctx staging
        compiler_params=pltpu.CompilerParams(
            dimension_semantics=("parallel", "arbitrary")),
    )(x, mask_bias, *weight_args)


def final_linear(x2d, w, b, *, tm=None, tn=None):
    # At real scale use tm=256 (128 on v5e), tn=512-1024 over the 4096 vocab.
    M, D = x2d.shape
    V = w.shape[1]
    tm = M if tm is None else tm
    tn = V if tn is None else tn
    return pl.pallas_call(
        linear_kernel,
        out_shape=jax.ShapeDtypeStruct((M, V), jnp.float32),
        grid=(pl.cdiv(M, tm), pl.cdiv(V, tn)),
        in_specs=[pl.BlockSpec((tm, D), lambda i, j: (i, 0)),
                  pl.BlockSpec((D, tn), lambda i, j: (0, j)),
                  pl.BlockSpec((1, tn), lambda i, j: (0, j))],
        out_specs=pl.BlockSpec((tm, tn), lambda i, j: (i, j)),
        compiler_params=pltpu.CompilerParams(
            dimension_semantics=("parallel", "parallel")),
    )(x2d, w, b)


# ------------------------------ parameters ----------------------------------
def init_params(key):
    keys = jax.random.split(key, 3)
    emb = 0.02 * jax.random.normal(keys[0], (VOCAB + 1, D_MODEL), jnp.float32)
    emb = emb.at[0].set(0.0)                      # padding_idx=0 -> zero row

    # standard sinusoidal positional-encoding table (max_len=256)
    pos = jnp.arange(MAX_LEN, dtype=jnp.float32)[:, None]
    div = jnp.exp(jnp.arange(0, D_MODEL, 2, dtype=jnp.float32)
                  * (-math.log(10000.0) / D_MODEL))
    pe = jnp.zeros((MAX_LEN, D_MODEL), jnp.float32)
    pe = pe.at[:, 0::2].set(jnp.sin(pos * div))
    pe = pe.at[:, 1::2].set(jnp.cos(pos * div))

    def w(k, shape):
        # NOTE: synthetic weights are generated directly in (in, out) layout;
        # real nn.Linear checkpoints are (out, in) and must be transposed on load.
        return (0.02 * jax.random.normal(k, shape, jnp.float32)).astype(jnp.bfloat16)

    lk = jax.random.split(keys[1], N_LAYERS * 4)
    stack = dict(
        wqkv=jnp.stack([w(lk[4 * l + 0], (D_MODEL, 3 * D_MODEL)) for l in range(N_LAYERS)]),
        bqkv=jnp.zeros((N_LAYERS, 1, 3 * D_MODEL), jnp.float32),
        wo=jnp.stack([w(lk[4 * l + 1], (D_MODEL, D_MODEL)) for l in range(N_LAYERS)]),
        bo=jnp.zeros((N_LAYERS, 1, D_MODEL), jnp.float32),
        g1=jnp.ones((N_LAYERS, 1, D_MODEL), jnp.float32),
        be1=jnp.zeros((N_LAYERS, 1, D_MODEL), jnp.float32),
        w1=jnp.stack([w(lk[4 * l + 2], (D_MODEL, D_FF)) for l in range(N_LAYERS)]),
        b1=jnp.zeros((N_LAYERS, 1, D_FF), jnp.float32),
        w2=jnp.stack([w(lk[4 * l + 3], (D_FF, D_MODEL)) for l in range(N_LAYERS)]),
        b2=jnp.zeros((N_LAYERS, 1, D_MODEL), jnp.float32),
        g2=jnp.ones((N_LAYERS, 1, D_MODEL), jnp.float32),
        be2=jnp.zeros((N_LAYERS, 1, D_MODEL), jnp.float32),
    )
    w_out = (0.02 * jax.random.normal(keys[2], (D_MODEL, VOCAB), jnp.float32)
             ).astype(jnp.bfloat16)
    b_out = jnp.zeros((1, VOCAB), jnp.float32)
    return dict(embedding=emb, pe=pe, stack=stack, w_out=w_out, b_out=b_out)


# ------------------------------ forward --------------------------------------
@jax.jit
def rnadlm_forward(params, seq_tokens, pad_mask):
    B, S = seq_tokens.shape
    # token-embedding gather * sqrt(D) + positional encoding: trivial mem-bound
    # glue, left to XLA (it fuses the gather/scale/add) per perf review.
    x = (jnp.take(params["embedding"], seq_tokens, axis=0)
         * jnp.float32(math.sqrt(D_MODEL))
         + params["pe"][:S][None, :, :])                            # (B, S, D)
    # src_key_padding_mask: True = padding -> large negative additive bias
    mask_bias = jnp.where(pad_mask, -1e9, 0.0).astype(jnp.float32)[:, None, :]
    x = encoder_stack(x, mask_bias, params["stack"])                # fused Pallas
    logits = final_linear(x.reshape(B * S, D_MODEL),
                          params["w_out"], params["b_out"])         # Pallas
    return logits.reshape(B, S, VOCAB)


if __name__ == "__main__":
    key = jax.random.PRNGKey(0)
    pkey, skey = jax.random.split(key)
    params = init_params(pkey)

    B, S = 2, 16
    seq = jax.random.randint(skey, (B, S), 1, VOCAB + 1, dtype=jnp.int32)
    pad_mask = jnp.zeros((B, S), dtype=bool).at[:, S - 4:].set(True)   # True = pad
    seq = jnp.where(pad_mask, 0, seq)                                  # pad token = 0

    logits = rnadlm_forward(params, seq, pad_mask)
    jax.block_until_ready(logits)
    assert logits.shape == (B, S, VOCAB), logits.shape
    assert bool(jnp.all(jnp.isfinite(logits)))
    print("KERNEL_OK")
</pallas_src>

<mosaic_0001>
module attributes {stable_mosaic.version = 11 : i64} {
  func.func @linear_kernel(%arg0: i32, %arg1: i32, %arg2: memref<32x384xf32, #tpu.memory_space<vmem>>, %arg3: memref<384x128xbf16, #tpu.memory_space<vmem>>, %arg4: memref<1x128xf32, #tpu.memory_space<vmem>>, %arg5: memref<32x128xf32, #tpu.memory_space<vmem>>) attributes {dimension_semantics = [#tpu.dimension_semantics<parallel>, #tpu.dimension_semantics<parallel>], iteration_bounds = array<i64: 1, 1>, scalar_prefetch = 0 : i64, scratch_operands = 0 : i64, tpu.core_type = #tpu.core_type<tc>, window_params = [{transform_indices = @transform_0, window_bounds = array<i64: 32, 384>}, {transform_indices = @transform_1, window_bounds = array<i64: 384, 128>}, {transform_indices = @transform_2, window_bounds = array<i64: 1, 128>}, {transform_indices = @transform_3, window_bounds = array<i64: 32, 128>}]} {
    %c0 = arith.constant 0 : index
    %c0_0 = arith.constant 0 : index
    %0 = vector.load %arg2[%c0, %c0_0] : memref<32x384xf32, #tpu.memory_space<vmem>>, vector<32x384xf32>
    %1 = arith.truncf %0 : vector<32x384xf32> to vector<32x384xbf16>
    %c0_1 = arith.constant 0 : index
    %c0_2 = arith.constant 0 : index
    %2 = vector.load %arg3[%c0_1, %c0_2] : memref<384x128xbf16, #tpu.memory_space<vmem>>, vector<384x128xbf16>
    %cst = arith.constant dense<0.000000e+00> : vector<32x128xf32>
    %3 = tpu.matmul %1, %2, %cst {dimension_numbers = #tpu.dot_dimension_numbers<[1], [0], [0], [1], [0, 0, 1, 1], [], []>} : vector<32x384xbf16>, vector<384x128xbf16>, vector<32x128xf32> -> vector<32x128xf32>
    %c0_3 = arith.constant 0 : index
    %c0_4 = arith.constant 0 : index
    %4 = vector.load %arg4[%c0_3, %c0_4] : memref<1x128xf32, #tpu.memory_space<vmem>>, vector<1x128xf32>
    %5 = vector.broadcast %4 : vector<1x128xf32> to vector<32x128xf32>
    %6 = arith.addf %3, %5 : vector<32x128xf32>
    %c0_5 = arith.constant 0 : index
    %c0_6 = arith.constant 0 : index
    %7 = vector.load %arg5[%c0_5, %c0_6] : memref<32x128xf32, #tpu.memory_space<vmem>>, vector<32x128xf32>
    tpu.vector_store %arg5[%c0_5, %c0_6], %6 {strides = array<i32>} : memref<32x128xf32, #tpu.memory_space<vmem>>, vector<32x128xf32>,
    return
  }
  func.func @transform_0(%arg0: i32, %arg1: i32) -> (i32, i32) {
    %c0_i32 = arith.constant 0 : i32
    %c0_i32_0 = arith.constant 0 : i32
    return %arg0, %c0_i32 : i32, i32
  }
  func.func @transform_1(%arg0: i32, %arg1: i32) -> (i32, i32) {
    %c0_i32 = arith.constant 0 : i32
    %c0_i32_0 = arith.constant 0 : i32
    return %c0_i32, %arg1 : i32, i32
  }
  func.func @transform_2(%arg0: i32, %arg1: i32) -> (i32, i32) {
    %c0_i32 = arith.constant 0 : i32
    %c0_i32_0 = arith.constant 0 : i32
    return %c0_i32, %arg1 : i32, i32
  }
  func.func @transform_3(%arg0: i32, %arg1: i32) -> (i32, i32) {
    %c0_i32 = arith.constant 0 : i32
    return %arg0, %arg1 : i32, i32
  }
}

module attributes {stable_mosaic.version = 11 : i64} {
  func.func @encoder_stack_kernel(%arg0: i32, %arg1: i32, %arg2: memref<1x16x384xf32, #tpu.memory_space<vmem>>, %arg3: memref<1x1x16xf32, #tpu.memory_space<vmem>>, %arg4: memref<1x384x1152xbf16, #tpu.memory_space<vmem>>, %arg5: memref<1x1x1152xf32, #tpu.memory_space<vmem>>, %arg6: memref<1x384x384xbf16, #tpu.memory_space<vmem>>, %arg7: memref<1x1x384xf32, #tpu.memory_space<vmem>>, %arg8: memref<1x1x384xf32, #tpu.memory_space<vmem>>, %arg9: memref<1x1x384xf32, #tpu.memory_space<vmem>>, %arg10: memref<1x384x512xbf16, #tpu.memory_space<vmem>>, %arg11: memref<1x1x512xf32, #tpu.memory_space<vmem>>, %arg12: memref<1x512x384xbf16, #tpu.memory_space<vmem>>, %arg13: memref<1x1x384xf32, #tpu.memory_space<vmem>>, %arg14: memref<1x1x384xf32, #tpu.memory_space<vmem>>, %arg15: memref<1x1x384xf32, #tpu.memory_space<vmem>>, %arg16: memref<1x16x384xf32, #tpu.memory_space<vmem>>, %arg17: memref<16x384xf32, #tpu.memory_space<vmem>>, %arg18: memref<16x384xf32, #tpu.memory_space<vmem>>) attributes {dimension_semantics = [#tpu.dimension_semantics<parallel>, #tpu.dimension_semantics<arbitrary>], iteration_bounds = array<i64: 2, 2>, scalar_prefetch = 0 : i64, scratch_operands = 2 : i64, tpu.core_type = #tpu.core_type<tc>, window_params = [{transform_indices = @transform_0, window_bounds = array<i64: 1, 16, 384>}, {transform_indices = @transform_1, window_bounds = array<i64: 1, 1, 16>}, {transform_indices = @transform_2, window_bounds = array<i64: 1, 384, 1152>}, {transform_indices = @transform_3, window_bounds = array<i64: 1, 1, 1152>}, {transform_indices = @transform_4, window_bounds = array<i64: 1, 384, 384>}, {transform_indices = @transform_5, window_bounds = array<i64: 1, 1, 384>}, {transform_indices = @transform_6, window_bounds = array<i64: 1, 1, 384>}, {transform_indices = @transform_7, window_bounds = array<i64: 1, 1, 384>}, {transform_indices = @transform_8, window_bounds = array<i64: 1, 384, 512>}, {transform_indices = @transform_9, window_bounds = array<i64: 1, 1, 512>}, {transform_indices = @transform_10, window_bounds = array<i64: 1, 512, 384>}, {transform_indices = @transform_11, window_bounds = array<i64: 1, 1, 384>}, {transform_indices = @transform_12, window_bounds = array<i64: 1, 1, 384>}, {transform_indices = @transform_13, window_bounds = array<i64: 1, 1, 384>}, {transform_indices = @transform_14, window_bounds = array<i64: 1, 16, 384>}]} {
    %c0_i32 = arith.constant 0 : i32
    %0 = arith.cmpi eq, %arg1, %c0_i32 : i32
    %1 = arith.extui %0 : i1 to i32
    %c0_i32_0 = arith.constant 0 : i32
    %2 = arith.cmpi ne, %1, %c0_i32_0 : i32
    scf.if %2 {
      %c0_125 = arith.constant 0 : index
      %c0_126 = arith.constant 0 : index
      %c0_127 = arith.constant 0 : index
      %346 = vector.load %arg2[%c0_125, %c0_126, %c0_127] : memref<1x16x384xf32, #tpu.memory_space<vmem>>, vector<1x16x384xf32>
      %347 = vector.shape_cast %346 : vector<1x16x384xf32> to vector<16x384xf32>
      %c0_128 = arith.constant 0 : index
      %c0_129 = arith.constant 0 : index
      %348 = vector.load %arg17[%c0_128, %c0_129] : memref<16x384xf32, #tpu.memory_space<vmem>>, vector<16x384xf32>
      tpu.vector_store %arg17[%c0_128, %c0_129], %347 {strides = array<i32>} : memref<16x384xf32, #tpu.memory_space<vmem>>, vector<16x384xf32>,
    } else {
    }
    %c0 = arith.constant 0 : index
    %c0_1 = arith.constant 0 : index
    %3 = vector.load %arg17[%c0, %c0_1] : memref<16x384xf32, #tpu.memory_space<vmem>>, vector<16x384xf32>
    %c0_2 = arith.constant 0 : index
    %c0_3 = arith.constant 0 : index
    %c0_4 = arith.constant 0 : index
    %4 = vector.load %arg3[%c0_2, %c0_3, %c0_4] : memref<1x1x16xf32, #tpu.memory_space<vmem>>, vector<1x1x16xf32>
    %5 = vector.shape_cast %4 : vector<1x1x16xf32> to vector<1x16xf32>
    %6 = arith.truncf %3 : vector<16x384xf32> to vector<16x384xbf16>
    %c0_5 = arith.constant 0 : index
    %c0_6 = arith.constant 0 : index
    %c0_7 = arith.constant 0 : index
    %7 = vector.load %arg4[%c0_5, %c0_6, %c0_7] : memref<1x384x1152xbf16, #tpu.memory_space<vmem>>, vector<1x384x1152xbf16>
    %8 = vector.shape_cast %7 : vector<1x384x1152xbf16> to vector<384x1152xbf16>
    %cst = arith.constant dense<0.000000e+00> : vector<16x1152xf32>
    %9 = tpu.matmul %6, %8, %cst {dimension_numbers = #tpu.dot_dimension_numbers<[1], [0], [0], [1], [0, 0, 1, 1], [], []>} : vector<16x384xbf16>, vector<384x1152xbf16>, vector<16x1152xf32> -> vector<16x1152xf32>
    %c0_8 = arith.constant 0 : index
    %c0_9 = arith.constant 0 : index
    %c0_10 = arith.constant 0 : index
    %10 = vector.load %arg5[%c0_8, %c0_9, %c0_10] : memref<1x1x1152xf32, #tpu.memory_space<vmem>>, vector<1x1x1152xf32>
    %11 = vector.shape_cast %10 : vector<1x1x1152xf32> to vector<1x1152xf32>
    %12 = vector.broadcast %11 : vector<1x1152xf32> to vector<16x1152xf32>
    %13 = arith.addf %9, %12 : vector<16x1152xf32>
    %14 = vector.extract_strided_slice %13 {offsets = [0, 0], sizes = [16, 384], strides = [1, 1]} : vector<16x1152xf32> to vector<16x384xf32>
    %cst_11 = arith.constant 0.176776692 : f32
    %15 = vector.broadcast %cst_11 : f32 to vector<16x384xf32>
    %16 = arith.mulf %14, %15 : vector<16x384xf32>
    %17 = arith.truncf %16 : vector<16x384xf32> to vector<16x384xbf16>
    %18 = vector.extract_strided_slice %13 {offsets = [0, 384], sizes = [16, 384], strides = [1, 1]} : vector<16x1152xf32> to vector<16x384xf32>
    %19 = arith.truncf %18 : vector<16x384xf32> to vector<16x384xbf16>
    %20 = vector.extract_strided_slice %13 {offsets = [0, 768], sizes = [16, 384], strides = [1, 1]} : vector<16x1152xf32> to vector<16x384xf32>
    %21 = arith.truncf %20 : vector<16x384xf32> to vector<16x384xbf16>
    %22 = vector.extract_strided_slice %17 {offsets = [0, 0], sizes = [16, 32], strides = [1, 1]} : vector<16x384xbf16> to vector<16x32xbf16>
    %23 = vector.extract_strided_slice %19 {offsets = [0, 0], sizes = [16, 32], strides = [1, 1]} : vector<16x384xbf16> to vector<16x32xbf16>
    %cst_12 = arith.constant dense<0.000000e+00> : vector<16x16xf32>
    %24 = tpu.matmul %22, %23, %cst_12 {dimension_numbers = #tpu.dot_dimension_numbers<[1], [1], [0], [0], [0, 0, 1, 0], [], []>} : vector<16x32xbf16>, vector<16x32xbf16>, vector<16x16xf32> -> vector<16x16xf32>
    %25 = vector.broadcast %5 : vector<1x16xf32> to vector<16x16xf32>
    %26 = arith.addf %24, %25 : vector<16x16xf32>
    %cst_13 = arith.constant dense<0xFF800000> : vector<16xf32>
    %27 = vector.multi_reduction <maximumf>, %26, %cst_13 [1] : vector<16x16xf32> to vector<16xf32>
    %28 = vector.shape_cast %27 : vector<16xf32> to vector<16x1xf32>
    %29 = vector.broadcast %28 : vector<16x1xf32> to vector<16x16xf32>
    %30 = arith.subf %26, %29 : vector<16x16xf32>
    %31 = math.exp %30 : vector<16x16xf32>
    %cst_14 = arith.constant dense<0.000000e+00> : vector<16xf32>
    %32 = vector.multi_reduction <add>, %31, %cst_14 [1] : vector<16x16xf32> to vector<16xf32>
    %33 = vector.shape_cast %32 : vector<16xf32> to vector<16x1xf32>
    %34 = arith.truncf %31 : vector<16x16xf32> to vector<16x16xbf16>
    %35 = vector.extract_strided_slice %21 {offsets = [0, 0], sizes = [16, 32], strides = [1, 1]} : vector<16x384xbf16> to vector<16x32xbf16>
    %cst_15 = arith.constant dense<0.000000e+00> : vector<16x32xf32>
    %36 = tpu.matmul %34, %35, %cst_15 {dimension_numbers = #tpu.dot_dimension_numbers<[1], [0], [0], [1], [0, 0, 1, 1], [], []>} : vector<16x16xbf16>, vector<16x32xbf16>, vector<16x32xf32> -> vector<16x32xf32>
    %37 = tpu.reciprocal %33 {approx = true} : vector<16x1xf32> -> vector<16x1xf32>
    %38 = vector.broadcast %37 : vector<16x1xf32> to vector<16x32xf32>
    %39 = arith.mulf %36, %38 : vector<16x32xf32>
    %c0_16 = arith.constant 0 : index
    %c0_17 = arith.constant 0 : index
    %40 = vector.load %arg18[%c0_16, %c0_17] : memref<16x384xf32, #tpu.memory_space<vmem>>, vector<16x32xf32>
    tpu.vector_store %arg18[%c0_16, %c0_17], %39 {strides = array<i32>} : memref<16x384xf32, #tpu.memory_space<vmem>>, vector<16x32xf32>,
    %41 = vector.extract_strided_slice %17 {offsets = [0, 32], sizes = [16, 32], strides = [1, 1]} : vector<16x384xbf16> to vector<16x32xbf16>
    %42 = vector.extract_strided_slice %19 {offsets = [0, 32], sizes = [16, 32], strides = [1, 1]} : vector<16x384xbf16> to vector<16x32xbf16>
    %cst_18 = arith.constant dense<0.000000e+00> : vector<16x16xf32>
    %43 = tpu.matmul %41, %42, %cst_18 {dimension_numbers = #tpu.dot_dimension_numbers<[1], [1], [0], [0], [0, 0, 1, 0], [], []>} : vector<16x32xbf16>, vector<16x32xbf16>, vector<16x16xf32> -> vector<16x16xf32>
    %44 = vector.broadcast %5 : vector<1x16xf32> to vector<16x16xf32>
    %45 = arith.addf %43, %44 : vector<16x16xf32>
    %cst_19 = arith.constant dense<0xFF800000> : vector<16xf32>
    %46 = vector.multi_reduction <maximumf>, %45, %cst_19 [1] : vector<16x16xf32> to vector<16xf32>
    %47 = vector.shape_cast %46 : vector<16xf32> to vector<16x1xf32>
    %48 = vector.broadcast %47 : vector<16x1xf32> to vector<16x16xf32>
    %49 = arith.subf %45, %48 : vector<16x16xf32>
    %50 = math.exp %49 : vector<16x16xf32>
    %cst_20 = arith.constant dense<0.000000e+00> : vector<16xf32>
    %51 = vector.multi_reduction <add>, %50, %cst_20 [1] : vector<16x16xf32> to vector<16xf32>
    %52 = vector.shape_cast %51 : vector<16xf32> to vector<16x1xf32>
    %53 = arith.truncf %50 : vector<16x16xf32> to vector<16x16xbf16>
    %54 = vector.extract_strided_slice %21 {offsets = [0, 32], sizes = [16, 32], strides = [1, 1]} : vector<16x384xbf16> to vector<16x32xbf16>
    %cst_21 = arith.constant dense<0.000000e+00> : vector<16x32xf32>
    %55 = tpu.matmul %53, %54, %cst_21 {dimension_numbers = #tpu.dot_dimension_numbers<[1], [0], [0], [1], [0, 0, 1, 1], [], []>} : vector<16x16xbf16>, vector<16x32xbf16>, vector<16x32xf32> -> vector<16x32xf32>
    %56 = tpu.reciprocal %52 {approx = true} : vector<16x1xf32> -> vector<16x1xf32>
    %57 = vector.broadcast %56 : vector<16x1xf32> to vector<16x32xf32>
    %58 = arith.mulf %55, %57 : vector<16x32xf32>
    %c0_22 = arith.constant 0 : index
    %c32 = arith.constant 32 : index
    %59 = vector.load %arg18[%c0_22, %c32] : memref<16x384xf32, #tpu.memory_space<vmem>>, vector<16x32xf32>
    tpu.vector_store %arg18[%c0_22, %c32], %58 {strides = array<i32>} : memref<16x384xf32, #tpu.memory_space<vmem>>, vector<16x32xf32>,
    %60 = vector.extract_strided_slice %17 {offsets = [0, 64], sizes = [16, 32], strides = [1, 1]} : vector<16x384xbf16> to vector<16x32xbf16>
    %61 = vector.extract_strided_slice %19 {offsets = [0, 64], sizes = [16, 32], strides = [1, 1]} : vector<16x384xbf16> to vector<16x32xbf16>
    %cst_23 = arith.constant dense<0.000000e+00> : vector<16x16xf32>
    %62 = tpu.matmul %60, %61, %cst_23 {dimension_numbers = #tpu.dot_dimension_numbers<[1], [1], [0], [0], [0, 0, 1, 0], [], []>} : vector<16x32xbf16>, vector<16x32xbf16>, vector<16x16xf32> -> vector<16x16xf32>
    %63 = vector.broadcast %5 : vector<1x16xf32> to vector<16x16xf32>
    %64 = arith.addf %62, %63 : vector<16x16xf32>
    %cst_24 = arith.constant dense<0xFF800000> : vector<16xf32>
    %65 = vector.multi_reduction <maximumf>, %64, %cst_24 [1] : vector<16x16xf32> to vector<16xf32>
    %66 = vector.shape_cast %65 : vector<16xf32> to vector<16x1xf32>
    %67 = vector.broadcast %66 : vector<16x1xf32> to vector<16x16xf32>
    %68 = arith.subf %64, %67 : vector<16x16xf32>
    %69 = math.exp %68 : vector<16x16xf32>
    %cst_25 = arith.constant dense<0.000000e+00> : vector<16xf32>
    %70 = vector.multi_reduction <add>, %69, %cst_25 [1] : vector<16x16xf32> to vector<16xf32>
    %71 = vector.shape_cast %70 : vector<16xf32> to vector<16x1xf32>
    %72 = arith.truncf %69 : vector<16x16xf32> to vector<16x16xbf16>
    %73 = vector.extract_strided_slice %21 {offsets = [0, 64], sizes = [16, 32], strides = [1, 1]} : vector<16x384xbf16> to vector<16x32xbf16>
    %cst_26 = arith.constant dense<0.000000e+00> : vector<16x32xf32>
    %74 = tpu.matmul %72, %73, %cst_26 {dimension_numbers = #tpu.dot_dimension_numbers<[1], [0], [0], [1], [0, 0, 1, 1], [], []>} : vector<16x16xbf16>, vector<16x32xbf16>, vector<16x32xf32> -> vector<16x32xf32>
    %75 = tpu.reciprocal %71 {approx = true} : vector<16x1xf32> -> vector<16x1xf32>
    %76 = vector.broadcast %75 : vector<16x1xf32> to vector<16x32xf32>
    %77 = arith.mulf %74, %76 : vector<16x32xf32>
    %c0_27 = arith.constant 0 : index
    %c64 = arith.constant 64 : index
    %78 = vector.load %arg18[%c0_27, %c64] : memref<16x384xf32, #tpu.memory_space<vmem>>, vector<16x32xf32>
    tpu.vector_store %arg18[%c0_27, %c64], %77 {strides = array<i32>} : memref<16x384xf32, #tpu.memory_space<vmem>>, vector<16x32xf32>,
    %79 = vector.extract_strided_slice %17 {offsets = [0, 96], sizes = [16, 32], strides = [1, 1]} : vector<16x384xbf16> to vector<16x32xbf16>
    %80 = vector.extract_strided_slice %19 {offsets = [0, 96], sizes = [16, 32], strides = [1, 1]} : vector<16x384xbf16> to vector<16x32xbf16>
    %cst_28 = arith.constant dense<0.000000e+00> : vector<16x16xf32>
    %81 = tpu.matmul %79, %80, %cst_28 {dimension_numbers = #tpu.dot_dimension_numbers<[1], [1], [0], [0], [0, 0, 1, 0], [], []>} : vector<16x32xbf16>, vector<16x32xbf16>, vector<16x16xf32> -> vector<16x16xf32>
    %82 = vector.broadcast %5 : vector<1x16xf32> to vector<16x16xf32>
    %83 = arith.addf %81, %82 : vector<16x16xf32>
    %cst_29 = arith.constant dense<0xFF800000> : vector<16xf32>
    %84 = vector.multi_reduction <maximumf>, %83, %cst_29 [1] : vector<16x16xf32> to vector<16xf32>
    %85 = vector.shape_cast %84 : vector<16xf32> to vector<16x1xf32>
    %86 = vector.broadcast %85 : vector<16x1xf32> to vector<16x16xf32>
    %87 = arith.subf %83, %86 : vector<16x16xf32>
    %88 = math.exp %87 : vector<16x16xf32>
    %cst_30 = arith.constant dense<0.000000e+00> : vector<16xf32>
    %89 = vector.multi_reduction <add>, %88, %cst_30 [1] : vector<16x16xf32> to vector<16xf32>
    %90 = vector.shape_cast %89 : vector<16xf32> to vector<16x1xf32>
    %91 = arith.truncf %88 : vector<16x16xf32> to vector<16x16xbf16>
    %92 = vector.extract_strided_slice %21 {offsets = [0, 96], sizes = [16, 32], strides = [1, 1]} : vector<16x384xbf16> to vector<16x32xbf16>
    %cst_31 = arith.constant dense<0.000000e+00> : vector<16x32xf32>
    %93 = tpu.matmul %91, %92, %cst_31 {dimension_numbers = #tpu.dot_dimension_numbers<[1], [0], [0], [1], [0, 0, 1, 1], [], []>} : vector<16x16xbf16>, vector<16x32xbf16>, vector<16x32xf32> -> vector<16x32xf32>
    %94 = tpu.reciprocal %90 {approx = true} : vector<16x1xf32> -> vector<16x1xf32>
    %95 = vector.broadcast %94 : vector<16x1xf32> to vector<16x32xf32>
    %96 = arith.mulf %93, %95 : vector<16x32xf32>
    %c0_32 = arith.constant 0 : index
    %c96 = arith.constant 96 : index
    %97 = vector.load %arg18[%c0_32, %c96] : memref<16x384xf32, #tpu.memory_space<vmem>>, vector<16x32xf32>
    tpu.vector_store %arg18[%c0_32, %c96], %96 {strides = array<i32>} : memref<16x384xf32, #tpu.memory_space<vmem>>, vector<16x32xf32>,
    %98 = vector.extract_strided_slice %17 {offsets = [0, 128], sizes = [16, 32], strides = [1, 1]} : vector<16x384xbf16> to vector<16x32xbf16>
    %99 = vector.extract_strided_slice %19 {offsets = [0, 128], sizes = [16, 32], strides = [1, 1]} : vector<16x384xbf16> to vector<16x32xbf16>
    %cst_33 = arith.constant dense<0.000000e+00> : vector<16x16xf32>
    %100 = tpu.matmul %98, %99, %cst_33 {dimension_numbers = #tpu.dot_dimension_numbers<[1], [1], [0], [0], [0, 0, 1, 0], [], []>} : vector<16x32xbf16>, vector<16x32xbf16>, vector<16x16xf32> -> vector<16x16xf32>
    %101 = vector.broadcast %5 : vector<1x16xf32> to vector<16x16xf32>
    %102 = arith.addf %100, %101 : vector<16x16xf32>
    %cst_34 = arith.constant dense<0xFF800000> : vector<16xf32>
    %103 = vector.multi_reduction <maximumf>, %102, %cst_34 [1] : vector<16x16xf32> to vector<16xf32>
    %104 = vector.shape_cast %103 : vector<16xf32> to vector<16x1xf32>
    %105 = vector.broadcast %104 : vector<16x1xf32> to vector<16x16xf32>
    %106 = arith.subf %102, %105 : vector<16x16xf32>
    %107 = math.exp %106 : vector<16x16xf32>
    %cst_35 = arith.constant dense<0.000000e+00> : vector<16xf32>
    %108 = vector.multi_reduction <add>, %107, %cst_35 [1] : vector<16x16xf32> to vector<16xf32>
    %109 = vector.shape_cast %108 : vector<16xf32> to vector<16x1xf32>
    %110 = arith.truncf %107 : vector<16x16xf32> to vector<16x16xbf16>
    %111 = vector.extract_strided_slice %21 {offsets = [0, 128], sizes = [16, 32], strides = [1, 1]} : vector<16x384xbf16> to vector<16x32xbf16>
    %cst_36 = arith.constant dense<0.000000e+00> : vector<16x32xf32>
    %112 = tpu.matmul %110, %111, %cst_36 {dimension_numbers = #tpu.dot_dimension_numbers<[1], [0], [0], [1], [0, 0, 1, 1], [], []>} : vector<16x16xbf16>, vector<16x32xbf16>, vector<16x32xf32> -> vector<16x32xf32>
    %113 = tpu.reciprocal %109 {approx = true} : vector<16x1xf32> -> vector<16x1xf32>
    %114 = vector.broadcast %113 : vector<16x1xf32> to vector<16x32xf32>
    %115 = arith.mulf %112, %114 : vector<16x32xf32>
    %c0_37 = arith.constant 0 : index
    %c128 = arith.constant 128 : index
    %116 = vector.load %arg18[%c0_37, %c128] : memref<16x384xf32, #tpu.memory_space<vmem>>, vector<16x32xf32>
    tpu.vector_store %arg18[%c0_37, %c128], %115 {strides = array<i32>} : memref<16x384xf32, #tpu.memory_space<vmem>>, vector<16x32xf32>,
    %117 = vector.extract_strided_slice %17 {offsets = [0, 160], sizes = [16, 32], strides = [1, 1]} : vector<16x384xbf16> to vector<16x32xbf16>
    %118 = vector.extract_strided_slice %19 {offsets = [0, 160], sizes = [16, 32], strides = [1, 1]} : vector<16x384xbf16> to vector<16x32xbf16>
    %cst_38 = arith.constant dense<0.000000e+00> : vector<16x16xf32>
    %119 = tpu.matmul %117, %118, %cst_38 {dimension_numbers = #tpu.dot_dimension_numbers<[1], [1], [0], [0], [0, 0, 1, 0], [], []>} : vector<16x32xbf16>, vector<16x32xbf16>, vector<16x16xf32> -> vector<16x16xf32>
    %120 = vector.broadcast %5 : vector<1x16xf32> to vector<16x16xf32>
    %121 = arith.addf %119, %120 : vector<16x16xf32>
    %cst_39 = arith.constant dense<0xFF800000> : vector<16xf32>
    %122 = vector.multi_reduction <maximumf>, %121, %cst_39 [1] : vector<16x16xf32> to vector<16xf32>
    %123 = vector.shape_cast %122 : vector<16xf32> to vector<16x1xf32>
    %124 = vector.broadcast %123 : vector<16x1xf32> to vector<16x16xf32>
    %125 = arith.subf %121, %124 : vector<16x16xf32>
    %126 = math.exp %125 : vector<16x16xf32>
    %cst_40 = arith.constant dense<0.000000e+00> : vector<16xf32>
    %127 = vector.multi_reduction <add>, %126, %cst_40 [1] : vector<16x16xf32> to vector<16xf32>
    %128 = vector.shape_cast %127 : vector<16xf32> to vector<16x1xf32>
    %129 = arith.truncf %126 : vector<16x16xf32> to vector<16x16xbf16>
    %130 = vector.extract_strided_slice %21 {offsets = [0, 160], sizes = [16, 32], strides = [1, 1]} : vector<16x384xbf16> to vector<16x32xbf16>
    %cst_41 = arith.constant dense<0.000000e+00> : vector<16x32xf32>
    %131 = tpu.matmul %129, %130, %cst_41 {dimension_numbers = #tpu.dot_dimension_numbers<[1], [0], [0], [1], [0, 0, 1, 1], [], []>} : vector<16x16xbf16>, vector<16x32xbf16>, vector<16x32xf32> -> vector<16x32xf32>
    %132 = tpu.reciprocal %128 {approx = true} : vector<16x1xf32> -> vector<16x1xf32>
    %133 = vector.broadcast %132 : vector<16x1xf32> to vector<16x32xf32>
    %134 = arith.mulf %131, %133 : vector<16x32xf32>
    %c0_42 = arith.constant 0 : index
    %c160 = arith.constant 160 : index
    %135 = vector.load %arg18[%c0_42, %c160] : memref<16x384xf32, #tpu.memory_space<vmem>>, vector<16x32xf32>
    tpu.vector_store %arg18[%c0_42, %c160], %134 {strides = array<i32>} : memref<16x384xf32, #tpu.memory_space<vmem>>, vector<16x32xf32>,
    %136 = vector.extract_strided_slice %17 {offsets = [0, 192], sizes = [16, 32], strides = [1, 1]} : vector<16x384xbf16> to vector<16x32xbf16>
    %137 = vector.extract_strided_slice %19 {offsets = [0, 192], sizes = [16, 32], strides = [1, 1]} : vector<16x384xbf16> to vector<16x32xbf16>
    %cst_43 = arith.constant dense<0.000000e+00> : vector<16x16xf32>
    %138 = tpu.matmul %136, %137, %cst_43 {dimension_numbers = #tpu.dot_dimension_numbers<[1], [1], [0], [0], [0, 0, 1, 0], [], []>} : vector<16x32xbf16>, vector<16x32xbf16>, vector<16x16xf32> -> vector<16x16xf32>
    %139 = vector.broadcast %5 : vector<1x16xf32> to vector<16x16xf32>
    %140 = arith.addf %138, %139 : vector<16x16xf32>
    %cst_44 = arith.constant dense<0xFF800000> : vector<16xf32>
    %141 = vector.multi_reduction <maximumf>, %140, %cst_44 [1] : vector<16x16xf32> to vector<16xf32>
    %142 = vector.shape_cast %141 : vector<16xf32> to vector<16x1xf32>
    %143 = vector.broadcast %142 : vector<16x1xf32> to vector<16x16xf32>
    %144 = arith.subf %140, %143 : vector<16x16xf32>
    %145 = math.exp %144 : vector<16x16xf32>
    %cst_45 = arith.constant dense<0.000000e+00> : vector<16xf32>
    %146 = vector.multi_reduction <add>, %145, %cst_45 [1] : vector<16x16xf32> to vector<16xf32>
    %147 = vector.shape_cast %146 : vector<16xf32> to vector<16x1xf32>
    %148 = arith.truncf %145 : vector<16x16xf32> to vector<16x16xbf16>
    %149 = vector.extract_strided_slice %21 {offsets = [0, 192], sizes = [16, 32], strides = [1, 1]} : vector<16x384xbf16> to vector<16x32xbf16>
    %cst_46 = arith.constant dense<0.000000e+00> : vector<16x32xf32>
    %150 = tpu.matmul %148, %149, %cst_46 {dimension_numbers = #tpu.dot_dimension_numbers<[1], [0], [0], [1], [0, 0, 1, 1], [], []>} : vector<16x16xbf16>, vector<16x32xbf16>, vector<16x32xf32> -> vector<16x32xf32>
    %151 = tpu.reciprocal %147 {approx = true} : vector<16x1xf32> -> vector<16x1xf32>
    %152 = vector.broadcast %151 : vector<16x1xf32> to vector<16x32xf32>
    %153 = arith.mulf %150, %152 : vector<16x32xf32>
    %c0_47 = arith.constant 0 : index
    %c192 = arith.constant 192 : index
    %154 = vector.load %arg18[%c0_47, %c192] : memref<16x384xf32, #tpu.memory_space<vmem>>, vector<16x32xf32>
    tpu.vector_store %arg18[%c0_47, %c192], %153 {strides = array<i32>} : memref<16x384xf32, #tpu.memory_space<vmem>>, vector<16x32xf32>,
    %155 = vector.extract_strided_slice %17 {offsets = [0, 224], sizes = [16, 32], strides = [1, 1]} : vector<16x384xbf16> to vector<16x32xbf16>
    %156 = vector.extract_strided_slice %19 {offsets = [0, 224], sizes = [16, 32], strides = [1, 1]} : vector<16x384xbf16> to vector<16x32xbf16>
    %cst_48 = arith.constant dense<0.000000e+00> : vector<16x16xf32>
    %157 = tpu.matmul %155, %156, %cst_48 {dimension_numbers = #tpu.dot_dimension_numbers<[1], [1], [0], [0], [0, 0, 1, 0], [], []>} : vector<16x32xbf16>, vector<16x32xbf16>, vector<16x16xf32> -> vector<16x16xf32>
    %158 = vector.broadcast %5 : vector<1x16xf32> to vector<16x16xf32>
    %159 = arith.addf %157, %158 : vector<16x16xf32>
    %cst_49 = arith.constant dense<0xFF800000> : vector<16xf32>
    %160 = vector.multi_reduction <maximumf>, %159, %cst_49 [1] : vector<16x16xf32> to vector<16xf32>
    %161 = vector.shape_cast %160 : vector<16xf32> to vector<16x1xf32>
    %162 = vector.broadcast %161 : vector<16x1xf32> to vector<16x16xf32>
    %163 = arith.subf %159, %162 : vector<16x16xf32>
    %164 = math.exp %163 : vector<16x16xf32>
    %cst_50 = arith.constant dense<0.000000e+00> : vector<16xf32>
    %165 = vector.multi_reduction <add>, %164, %cst_50 [1] : vector<16x16xf32> to vector<16xf32>
    %166 = vector.shape_cast %165 : vector<16xf32> to vector<16x1xf32>
    %167 = arith.truncf %164 : vector<16x16xf32> to vector<16x16xbf16>
    %168 = vector.extract_strided_slice %21 {offsets = [0, 224], sizes = [16, 32], strides = [1, 1]} : vector<16x384xbf16> to vector<16x32xbf16>
    %cst_51 = arith.constant dense<0.000000e+00> : vector<16x32xf32>
    %169 = tpu.matmul %167, %168, %cst_51 {dimension_numbers = #tpu.dot_dimension_numbers<[1], [0], [0], [1], [0, 0, 1, 1], [], []>} : vector<16x16xbf16>, vector<16x32xbf16>, vector<16x32xf32> -> vector<16x32xf32>
    %170 = tpu.reciprocal %166 {approx = true} : vector<16x1xf32> -> vector<16x1xf32>
    %171 = vector.broadcast %170 : vector<16x1xf32> to vector<16x32xf32>
    %172 = arith.mulf %169, %171 : vector<16x32xf32>
    %c0_52 = arith.constant 0 : index
    %c224 = arith.constant 224 : index
    %173 = vector.load %arg18[%c0_52, %c224] : memref<16x384xf32, #tpu.memory_space<vmem>>, vector<16x32xf32>
    tpu.vector_store %arg18[%c0_52, %c224], %172 {strides = array<i32>} : memref<16x384xf32, #tpu.memory_space<vmem>>, vector<16x32xf32>,
    %174 = vector.extract_strided_slice %17 {offsets = [0, 256], sizes = [16, 32], strides = [1, 1]} : vector<16x384xbf16> to vector<16x32xbf16>
    %175 = vector.extract_strided_slice %19 {offsets = [0, 256], sizes = [16, 32], strides = [1, 1]} : vector<16x384xbf16> to vector<16x32xbf16>
    %cst_53 = arith.constant dense<0.000000e+00> : vector<16x16xf32>
    %176 = tpu.matmul %174, %175, %cst_53 {dimension_numbers = #tpu.dot_dimension_numbers<[1], [1], [0], [0], [0, 0, 1, 0], [], []>} : vector<16x32xbf16>, vector<16x32xbf16>, vector<16x16xf32> -> vector<16x16xf32>
    %177 = vector.broadcast %5 : vector<1x16xf32> to vector<16x16xf32>
    %178 = arith.addf %176, %177 : vector<16x16xf32>
    %cst_54 = arith.constant dense<0xFF800000> : vector<16xf32>
    %179 = vector.multi_reduction <maximumf>, %178, %cst_54 [1] : vector<16x16xf32> to vector<16xf32>
    %180 = vector.shape_cast %179 : vector<16xf32> to vector<16x1xf32>
    %181 = vector.broadcast %180 : vector<16x1xf32> to vector<16x16xf32>
    %182 = arith.subf %178, %181 : vector<16x16xf32>
    %183 = math.exp %182 : vector<16x16xf32>
    %cst_55 = arith.constant dense<0.000000e+00> : vector<16xf32>
    %184 = vector.multi_reduction <add>, %183, %cst_55 [1] : vector<16x16xf32> to vector<16xf32>
    %185 = vector.shape_cast %184 : vector<16xf32> to vector<16x1xf32>
    %186 = arith.truncf %183 : vector<16x16xf32> to vector<16x16xbf16>
    %187 = vector.extract_strided_slice %21 {offsets = [0, 256], sizes = [16, 32], strides = [1, 1]} : vector<16x384xbf16> to vector<16x32xbf16>
    %cst_56 = arith.constant dense<0.000000e+00> : vector<16x32xf32>
    %188 = tpu.matmul %186, %187, %cst_56 {dimension_numbers = #tpu.dot_dimension_numbers<[1], [0], [0], [1], [0, 0, 1, 1], [], []>} : vector<16x16xbf16>, vector<16x32xbf16>, vector<16x32xf32> -> vector<16x32xf32>
    %189 = tpu.reciprocal %185 {approx = true} : vector<16x1xf32> -> vector<16x1xf32>
    %190 = vector.broadcast %189 : vector<16x1xf32> to vector<16x32xf32>
    %191 = arith.mulf %188, %190 : vector<16x32xf32>
    %c0_57 = arith.constant 0 : index
    %c256 = arith.constant 256 : index
    %192 = vector.load %arg18[%c0_57, %c256] : memref<16x384xf32, #tpu.memory_space<vmem>>, vector<16x32xf32>
    tpu.vector_store %arg18[%c0_57, %c256], %191 {strides = array<i32>} : memref<16x384xf32, #tpu.memory_space<vmem>>, vector<16x32xf32>,
    %193 = vector.extract_strided_slice %17 {offsets = [0, 288], sizes = [16, 32], strides = [1, 1]} : vector<16x384xbf16> to vector<16x32xbf16>
    %194 = vector.extract_strided_slice %19 {offsets = [0, 288], sizes = [16, 32], strides = [1, 1]} : vector<16x384xbf16> to vector<16x32xbf16>
    %cst_58 = arith.constant dense<0.000000e+00> : vector<16x16xf32>
    %195 = tpu.matmul %193, %194, %cst_58 {dimension_numbers = #tpu.dot_dimension_numbers<[1], [1], [0], [0], [0, 0, 1, 0], [], []>} : vector<16x32xbf16>, vector<16x32xbf16>, vector<16x16xf32> -> vector<16x16xf32>
    %196 = vector.broadcast %5 : vector<1x16xf32> to vector<16x16xf32>
    %197 = arith.addf %195, %196 : vector<16x16xf32>
    %cst_59 = arith.constant dense<0xFF800000> : vector<16xf32>
    %198 = vector.multi_reduction <maximumf>, %197, %cst_59 [1] : vector<16x16xf32> to vector<16xf32>
    %199 = vector.shape_cast %198 : vector<16xf32> to vector<16x1xf32>
    %200 = vector.broadcast %199 : vector<16x1xf32> to vector<16x16xf32>
    %201 = arith.subf %197, %200 : vector<16x16xf32>
    %202 = math.exp %201 : vector<16x16xf32>
    %cst_60 = arith.constant dense<0.000000e+00> : vector<16xf32>
    %203 = vector.multi_reduction <add>, %202, %cst_60 [1] : vector<16x16xf32> to vector<16xf32>
    %204 = vector.shape_cast %203 : vector<16xf32> to vector<16x1xf32>
    %205 = arith.truncf %202 : vector<16x16xf32> to vector<16x16xbf16>
    %206 = vector.extract_strided_slice %21 {offsets = [0, 288], sizes = [16, 32], strides = [1, 1]} : vector<16x384xbf16> to vector<16x32xbf16>
    %cst_61 = arith.constant dense<0.000000e+00> : vector<16x32xf32>
    %207 = tpu.matmul %205, %206, %cst_61 {dimension_numbers = #tpu.dot_dimension_numbers<[1], [0], [0], [1], [0, 0, 1, 1], [], []>} : vector<16x16xbf16>, vector<16x32xbf16>, vector<16x32xf32> -> vector<16x32xf32>
    %208 = tpu.reciprocal %204 {approx = true} : vector<16x1xf32> -> vector<16x1xf32>
    %209 = vector.broadcast %208 : vector<16x1xf32> to vector<16x32xf32>
    %210 = arith.mulf %207, %209 : vector<16x32xf32>
    %c0_62 = arith.constant 0 : index
    %c288 = arith.constant 288 : index
    %211 = vector.load %arg18[%c0_62, %c288] : memref<16x384xf32, #tpu.memory_space<vmem>>, vector<16x32xf32>
    tpu.vector_store %arg18[%c0_62, %c288], %210 {strides = array<i32>} : memref<16x384xf32, #tpu.memory_space<vmem>>, vector<16x32xf32>,
    %212 = vector.extract_strided_slice %17 {offsets = [0, 320], sizes = [16, 32], strides = [1, 1]} : vector<16x384xbf16> to vector<16x32xbf16>
    %213 = vector.extract_strided_slice %19 {offsets = [0, 320], sizes = [16, 32], strides = [1, 1]} : vector<16x384xbf16> to vector<16x32xbf16>
    %cst_63 = arith.constant dense<0.000000e+00> : vector<16x16xf32>
    %214 = tpu.matmul %212, %213, %cst_63 {dimension_numbers = #tpu.dot_dimension_numbers<[1], [1], [0], [0], [0, 0, 1, 0], [], []>} : vector<16x32xbf16>, vector<16x32xbf16>, vector<16x16xf32> -> vector<16x16xf32>
    %215 = vector.broadcast %5 : vector<1x16xf32> to vector<16x16xf32>
    %216 = arith.addf %214, %215 : vector<16x16xf32>
    %cst_64 = arith.constant dense<0xFF800000> : vector<16xf32>
    %217 = vector.multi_reduction <maximumf>, %216, %cst_64 [1] : vector<16x16xf32> to vector<16xf32>
    %218 = vector.shape_cast %217 : vector<16xf32> to vector<16x1xf32>
    %219 = vector.broadcast %218 : vector<16x1xf32> to vector<16x16xf32>
    %220 = arith.subf %216, %219 : vector<16x16xf32>
    %221 = math.exp %220 : vector<16x16xf32>
    %cst_65 = arith.constant dense<0.000000e+00> : vector<16xf32>
    %222 = vector.multi_reduction <add>, %221, %cst_65 [1] : vector<16x16xf32> to vector<16xf32>
    %223 = vector.shape_cast %222 : vector<16xf32> to vector<16x1xf32>
    %224 = arith.truncf %221 : vector<16x16xf32> to vector<16x16xbf16>
    %225 = vector.extract_strided_slice %21 {offsets = [0, 320], sizes = [16, 32], strides = [1, 1]} : vector<16x384xbf16> to vector<16x32xbf16>
    %cst_66 = arith.constant dense<0.000000e+00> : vector<16x32xf32>
    %226 = tpu.matmul %224, %225, %cst_66 {dimension_numbers = #tpu.dot_dimension_numbers<[1], [0], [0], [1], [0, 0, 1, 1], [], []>} : vector<16x16xbf16>, vector<16x32xbf16>, vector<16x32xf32> -> vector<16x32xf32>
    %227 = tpu.reciprocal %223 {approx = true} : vector<16x1xf32> -> vector<16x1xf32>
    %228 = vector.broadcast %227 : vector<16x1xf32> to vector<16x32xf32>
    %229 = arith.mulf %226, %228 : vector<16x32xf32>
    %c0_67 = arith.constant 0 : index
    %c320 = arith.constant 320 : index
    %230 = vector.load %arg18[%c0_67, %c320] : memref<16x384xf32, #tpu.memory_space<vmem>>, vector<16x32xf32>
    tpu.vector_store %arg18[%c0_67, %c320], %229 {strides = array<i32>} : memref<16x384xf32, #tpu.memory_space<vmem>>, vector<16x32xf32>,
    %231 = vector.extract_strided_slice %17 {offsets = [0, 352], sizes = [16, 32], strides = [1, 1]} : vector<16x384xbf16> to vector<16x32xbf16>
    %232 = vector.extract_strided_slice %19 {offsets = [0, 352], sizes = [16, 32], strides = [1, 1]} : vector<16x384xbf16> to vector<16x32xbf16>
    %cst_68 = arith.constant dense<0.000000e+00> : vector<16x16xf32>
    %233 = tpu.matmul %231, %232, %cst_68 {dimension_numbers = #tpu.dot_dimension_numbers<[1], [1], [0], [0], [0, 0, 1, 0], [], []>} : vector<16x32xbf16>, vector<16x32xbf16>, vector<16x16xf32> -> vector<16x16xf32>
    %234 = vector.broadcast %5 : vector<1x16xf32> to vector<16x16xf32>
    %235 = arith.addf %233, %234 : vector<16x16xf32>
    %cst_69 = arith.constant dense<0xFF800000> : vector<16xf32>
    %236 = vector.multi_reduction <maximumf>, %235, %cst_69 [1] : vector<16x16xf32> to vector<16xf32>
    %237 = vector.shape_cast %236 : vector<16xf32> to vector<16x1xf32>
    %238 = vector.broadcast %237 : vector<16x1xf32> to vector<16x16xf32>
    %239 = arith.subf %235, %238 : vector<16x16xf32>
    %240 = math.exp %239 : vector<16x16xf32>
    %cst_70 = arith.constant dense<0.000000e+00> : vector<16xf32>
    %241 = vector.multi_reduction <add>, %240, %cst_70 [1] : vector<16x16xf32> to vector<16xf32>
    %242 = vector.shape_cast %241 : vector<16xf32> to vector<16x1xf32>
    %243 = arith.truncf %240 : vector<16x16xf32> to vector<16x16xbf16>
    %244 = vector.extract_strided_slice %21 {offsets = [0, 352], sizes = [16, 32], strides = [1, 1]} : vector<16x384xbf16> to vector<16x32xbf16>
    %cst_71 = arith.constant dense<0.000000e+00> : vector<16x32xf32>
    %245 = tpu.matmul %243, %244, %cst_71 {dimension_numbers = #tpu.dot_dimension_numbers<[1], [0], [0], [1], [0, 0, 1, 1], [], []>} : vector<16x16xbf16>, vector<16x32xbf16>, vector<16x32xf32> -> vector<16x32xf32>
    %246 = tpu.reciprocal %242 {approx = true} : vector<16x1xf32> -> vector<16x1xf32>
    %247 = vector.broadcast %246 : vector<16x1xf32> to vector<16x32xf32>
    %248 = arith.mulf %245, %247 : vector<16x32xf32>
    %c0_72 = arith.constant 0 : index
    %c352 = arith.constant 352 : index
    %249 = vector.load %arg18[%c0_72, %c352] : memref<16x384xf32, #tpu.memory_space<vmem>>, vector<16x32xf32>
    tpu.vector_store %arg18[%c0_72, %c352], %248 {strides = array<i32>} : memref<16x384xf32, #tpu.memory_space<vmem>>, vector<16x32xf32>,
    %c0_73 = arith.constant 0 : index
    %c0_74 = arith.constant 0 : index
    %250 = vector.load %arg18[%c0_73, %c0_74] : memref<16x384xf32, #tpu.memory_space<vmem>>, vector<16x384xf32>
    %251 = arith.truncf %250 : vector<16x384xf32> to vector<16x384xbf16>
    %c0_75 = arith.constant 0 : index
    %c0_76 = arith.constant 0 : index
    %c0_77 = arith.constant 0 : index
    %252 = vector.load %arg6[%c0_75, %c0_76, %c0_77] : memref<1x384x384xbf16, #tpu.memory_space<vmem>>, vector<1x384x384xbf16>
    %253 = vector.shape_cast %252 : vector<1x384x384xbf16> to vector<384x384xbf16>
    %cst_78 = arith.constant dense<0.000000e+00> : vector<16x384xf32>
    %254 = tpu.matmul %251, %253, %cst_78 {dimension_numbers = #tpu.dot_dimension_numbers<[1], [0], [0], [1], [0, 0, 1, 1], [], []>} : vector<16x384xbf16>, vector<384x384xbf16>, vector<16x384xf32> -> vector<16x384xf32>
    %c0_79 = arith.constant 0 : index
    %c0_80 = arith.constant 0 : index
    %c0_81 = arith.constant 0 : index
    %255 = vector.load %arg7[%c0_79, %c0_80, %c0_81] : memref<1x1x384xf32, #tpu.memory_space<vmem>>, vector<1x1x384xf32>
    %256 = vector.shape_cast %255 : vector<1x1x384xf32> to vector<1x384xf32>
    %257 = vector.broadcast %256 : vector<1x384xf32> to vector<16x384xf32>
    %258 = arith.addf %254, %257 : vector<16x384xf32>
    %259 = arith.addf %3, %258 : vector<16x384xf32>
    %c0_82 = arith.constant 0 : index
    %c0_83 = arith.constant 0 : index
    %c0_84 = arith.constant 0 : index
    %260 = vector.load %arg8[%c0_82, %c0_83, %c0_84] : memref<1x1x384xf32, #tpu.memory_space<vmem>>, vector<1x1x384xf32>
    %261 = vector.shape_cast %260 : vector<1x1x384xf32> to vector<1x384xf32>
    %c0_85 = arith.constant 0 : index
    %c0_86 = arith.constant 0 : index
    %c0_87 = arith.constant 0 : index
    %262 = vector.load %arg9[%c0_85, %c0_86, %c0_87] : memref<1x1x384xf32, #tpu.memory_space<vmem>>, vector<1x1x384xf32>
    %263 = vector.shape_cast %262 : vector<1x1x384xf32> to vector<1x384xf32>
    %cst_88 = arith.constant dense<0.000000e+00> : vector<16xf32>
    %264 = vector.multi_reduction <add>, %259, %cst_88 [1] : vector<16x384xf32> to vector<16xf32>
    %265 = vector.shape_cast %264 : vector<16xf32> to vector<16x1xf32>
    %cst_89 = arith.constant 3.840000e+02 : f32
    %266 = vector.broadcast %cst_89 : f32 to vector<16x1xf32>
    %267 = arith.divf %265, %266 : vector<16x1xf32>
    %268 = vector.broadcast %267 : vector<16x1xf32> to vector<16x384xf32>
    %269 = arith.subf %259, %268 : vector<16x384xf32>
    %270 = arith.mulf %269, %269 : vector<16x384xf32>
    %cst_90 = arith.constant dense<0.000000e+00> : vector<16xf32>
    %271 = vector.multi_reduction <add>, %270, %cst_90 [1] : vector<16x384xf32> to vector<16xf32>
    %272 = vector.shape_cast %271 : vector<16xf32> to vector<16x1xf32>
    %cst_91 = arith.constant 3.840000e+02 : f32
    %273 = vector.broadcast %cst_91 : f32 to vector<16x1xf32>
    %274 = arith.divf %272, %273 : vector<16x1xf32>
    %275 = vector.broadcast %267 : vector<16x1xf32> to vector<16x384xf32>
    %276 = arith.subf %259, %275 : vector<16x384xf32>
    %cst_92 = arith.constant 9.99999974E-6 : f32
    %277 = vector.broadcast %cst_92 : f32 to vector<16x1xf32>
    %278 = arith.addf %274, %277 : vector<16x1xf32>
    %279 = math.rsqrt %278 : vector<16x1xf32>
    %280 = vector.broadcast %279 : vector<16x1xf32> to vector<16x384xf32>
    %281 = arith.mulf %276, %280 : vector<16x384xf32>
    %282 = vector.broadcast %261 : vector<1x384xf32> to vector<16x384xf32>
    %283 = arith.mulf %281, %282 : vector<16x384xf32>
    %284 = vector.broadcast %263 : vector<1x384xf32> to vector<16x384xf32>
    %285 = arith.addf %283, %284 : vector<16x384xf32>
    %286 = arith.truncf %285 : vector<16x384xf32> to vector<16x384xbf16>
    %c0_93 = arith.constant 0 : index
    %c0_94 = arith.constant 0 : index
    %c0_95 = arith.constant 0 : index
    %287 = vector.load %arg10[%c0_93, %c0_94, %c0_95] : memref<1x384x512xbf16, #tpu.memory_space<vmem>>, vector<1x384x512xbf16>
    %288 = vector.shape_cast %287 : vector<1x384x512xbf16> to vector<384x512xbf16>
    %cst_96 = arith.constant dense<0.000000e+00> : vector<16x512xf32>
    %289 = tpu.matmul %286, %288, %cst_96 {dimension_numbers = #tpu.dot_dimension_numbers<[1], [0], [0], [1], [0, 0, 1, 1], [], []>} : vector<16x384xbf16>, vector<384x512xbf16>, vector<16x512xf32> -> vector<16x512xf32>
    %c0_97 = arith.constant 0 : index
    %c0_98 = arith.constant 0 : index
    %c0_99 = arith.constant 0 : index
    %290 = vector.load %arg11[%c0_97, %c0_98, %c0_99] : memref<1x1x512xf32, #tpu.memory_space<vmem>>, vector<1x1x512xf32>
    %291 = vector.shape_cast %290 : vector<1x1x512xf32> to vector<1x512xf32>
    %292 = vector.broadcast %291 : vector<1x512xf32> to vector<16x512xf32>
    %293 = arith.addf %289, %292 : vector<16x512xf32>
    %cst_100 = arith.constant 5.000000e-01 : f32
    %294 = vector.broadcast %cst_100 : f32 to vector<16x512xf32>
    %295 = arith.mulf %294, %293 : vector<16x512xf32>
    %cst_101 = arith.constant 4.471500e-02 : f32
    %296 = vector.broadcast %cst_101 : f32 to vector<16x512xf32>
    %297 = arith.mulf %296, %293 : vector<16x512xf32>
    %298 = arith.mulf %297, %293 : vector<16x512xf32>
    %299 = arith.mulf %298, %293 : vector<16x512xf32>
    %300 = arith.addf %293, %299 : vector<16x512xf32>
    %cst_102 = arith.constant 0.797884583 : f32
    %301 = vector.broadcast %cst_102 : f32 to vector<16x512xf32>
    %302 = arith.mulf %301, %300 : vector<16x512xf32>
    %303 = math.tanh %302 : vector<16x512xf32>
    %cst_103 = arith.constant 1.000000e+00 : f32
    %304 = vector.broadcast %cst_103 : f32 to vector<16x512xf32>
    %305 = arith.addf %304, %303 : vector<16x512xf32>
    %306 = arith.mulf %295, %305 : vector<16x512xf32>
    %307 = arith.truncf %306 : vector<16x512xf32> to vector<16x512xbf16>
    %c0_104 = arith.constant 0 : index
    %c0_105 = arith.constant 0 : index
    %c0_106 = arith.constant 0 : index
    %308 = vector.load %arg12[%c0_104, %c0_105, %c0_106] : memref<1x512x384xbf16, #tpu.memory_space<vmem>>, vector<1x512x384xbf16>
    %309 = vector.shape_cast %308 : vector<1x512x384xbf16> to vector<512x384xbf16>
    %cst_107 = arith.constant dense<0.000000e+00> : vector<16x384xf32>
    %310 = tpu.matmul %307, %309, %cst_107 {dimension_numbers = #tpu.dot_dimension_numbers<[1], [0], [0], [1], [0, 0, 1, 1], [], []>} : vector<16x512xbf16>, vector<512x384xbf16>, vector<16x384xf32> -> vector<16x384xf32>
    %c0_108 = arith.constant 0 : index
    %c0_109 = arith.constant 0 : index
    %c0_110 = arith.constant 0 : index
    %311 = vector.load %arg13[%c0_108, %c0_109, %c0_110] : memref<1x1x384xf32, #tpu.memory_space<vmem>>, vector<1x1x384xf32>
    %312 = vector.shape_cast %311 : vector<1x1x384xf32> to vector<1x384xf32>
    %313 = vector.broadcast %312 : vector<1x384xf32> to vector<16x384xf32>
    %314 = arith.addf %310, %313 : vector<16x384xf32>
    %315 = arith.addf %285, %314 : vector<16x384xf32>
    %c0_111 = arith.constant 0 : index
    %c0_112 = arith.constant 0 : index
    %c0_113 = arith.constant 0 : index
    %316 = vector.load %arg14[%c0_111, %c0_112, %c0_113] : memref<1x1x384xf32, #tpu.memory_space<vmem>>, vector<1x1x384xf32>
    %317 = vector.shape_cast %316 : vector<1x1x384xf32> to vector<1x384xf32>
    %c0_114 = arith.constant 0 : index
    %c0_115 = arith.constant 0 : index
    %c0_116 = arith.constant 0 : index
    %318 = vector.load %arg15[%c0_114, %c0_115, %c0_116] : memref<1x1x384xf32, #tpu.memory_space<vmem>>, vector<1x1x384xf32>
    %319 = vector.shape_cast %318 : vector<1x1x384xf32> to vector<1x384xf32>
    %cst_117 = arith.constant dense<0.000000e+00> : vector<16xf32>
    %320 = vector.multi_reduction <add>, %315, %cst_117 [1] : vector<16x384xf32> to vector<16xf32>
    %321 = vector.shape_cast %320 : vector<16xf32> to vector<16x1xf32>
    %cst_118 = arith.constant 3.840000e+02 : f32
    %322 = vector.broadcast %cst_118 : f32 to vector<16x1xf32>
    %323 = arith.divf %321, %322 : vector<16x1xf32>
    %324 = vector.broadcast %323 : vector<16x1xf32> to vector<16x384xf32>
    %325 = arith.subf %315, %324 : vector<16x384xf32>
    %326 = arith.mulf %325, %325 : vector<16x384xf32>
    %cst_119 = arith.constant dense<0.000000e+00> : vector<16xf32>
    %327 = vector.multi_reduction <add>, %326, %cst_119 [1] : vector<16x384xf32> to vector<16xf32>
    %328 = vector.shape_cast %327 : vector<16xf32> to vector<16x1xf32>
    %cst_120 = arith.constant 3.840000e+02 : f32
    %329 = vector.broadcast %cst_120 : f32 to vector<16x1xf32>
    %330 = arith.divf %328, %329 : vector<16x1xf32>
    %331 = vector.broadcast %323 : vector<16x1xf32> to vector<16x384xf32>
    %332 = arith.subf %315, %331 : vector<16x384xf32>
    %cst_121 = arith.constant 9.99999974E-6 : f32
    %333 = vector.broadcast %cst_121 : f32 to vector<16x1xf32>
    %334 = arith.addf %330, %333 : vector<16x1xf32>
    %335 = math.rsqrt %334 : vector<16x1xf32>
    %336 = vector.broadcast %335 : vector<16x1xf32> to vector<16x384xf32>
    %337 = arith.mulf %332, %336 : vector<16x384xf32>
    %338 = vector.broadcast %317 : vector<1x384xf32> to vector<16x384xf32>
    %339 = arith.mulf %337, %338 : vector<16x384xf32>
    %340 = vector.broadcast %319 : vector<1x384xf32> to vector<16x384xf32>
    %341 = arith.addf %339, %340 : vector<16x384xf32>
    %c0_122 = arith.constant 0 : index
    %c0_123 = arith.constant 0 : index
    %342 = vector.load %arg17[%c0_122, %c0_123] : memref<16x384xf32, #tpu.memory_space<vmem>>, vector<16x384xf32>
    tpu.vector_store %arg17[%c0_122, %c0_123], %341 {strides = array<i32>} : memref<16x384xf32, #tpu.memory_space<vmem>>, vector<16x384xf32>,
    %c1_i32 = arith.constant 1 : i32
    %343 = arith.cmpi eq, %arg1, %c1_i32 : i32
    %344 = arith.extui %343 : i1 to i32
    %c0_i32_124 = arith.constant 0 : i32
    %345 = arith.cmpi ne, %344, %c0_i32_124 : i32
    scf.if %345 {
      %c0_125 = arith.constant 0 : index
      %c0_126 = arith.constant 0 : index
      %c0_127 = arith.constant 0 : index
      %346 = vector.load %arg16[%c0_125, %c0_126, %c0_127] : memref<1x16x384xf32, #tpu.memory_space<vmem>>, vector<1x16x384xf32>
      %347 = vector.shape_cast %346 : vector<1x16x384xf32> to vector<16x384xf32>
      %348 = vector.shape_cast %341 : vector<16x384xf32> to vector<1x16x384xf32>
      tpu.vector_store %arg16[%c0_125, %c0_126, %c0_127], %348 {strides = array<i32>} : memref<1x16x384xf32, #tpu.memory_space<vmem>>, vector<1x16x384xf32>,
    } else {
    }
    return
  }
  func.func @transform_0(%arg0: i32, %arg1: i32) -> (i32, i32, i32) {
    %c0_i32 = arith.constant 0 : i32
    %c0_i32_0 = arith.constant 0 : i32
    %c0_i32_1 = arith.constant 0 : i32
    return %arg0, %c0_i32, %c0_i32_0 : i32, i32, i32
  }
  func.func @transform_1(%arg0: i32, %arg1: i32) -> (i32, i32, i32) {
    %c0_i32 = arith.constant 0 : i32
    %c0_i32_0 = arith.constant 0 : i32
    %c0_i32_1 = arith.constant 0 : i32
    return %arg0, %c0_i32, %c0_i32_0 : i32, i32, i32
  }
  func.func @transform_2(%arg0: i32, %arg1: i32) -> (i32, i32, i32) {
    %c0_i32 = arith.constant 0 : i32
    %c0_i32_0 = arith.constant 0 : i32
    %c0_i32_1 = arith.constant 0 : i32
    return %arg1, %c0_i32, %c0_i32_0 : i32, i32, i32
  }
  func.func @transform_3(%arg0: i32, %arg1: i32) -> (i32, i32, i32) {
    %c0_i32 = arith.constant 0 : i32
    %c0_i32_0 = arith.constant 0 : i32
    %c0_i32_1 = arith.constant 0 : i32
    return %arg1, %c0_i32, %c0_i32_0 : i32, i32, i32
  }
  func.func @transform_4(%arg0: i32, %arg1: i32) -> (i32, i32, i32) {
    %c0_i32 = arith.constant 0 : i32
    %c0_i32_0 = arith.constant 0 : i32
    %c0_i32_1 = arith.constant 0 : i32
    return %arg1, %c0_i32, %c0_i32_0 : i32, i32, i32
  }
  func.func @transform_5(%arg0: i32, %arg1: i32) -> (i32, i32, i32) {
    %c0_i32 = arith.constant 0 : i32
    %c0_i32_0 = arith.constant 0 : i32
    %c0_i32_1 = arith.constant 0 : i32
    return %arg1, %c0_i32, %c0_i32_0 : i32, i32, i32
  }
  func.func @transform_6(%arg0: i32, %arg1: i32) -> (i32, i32, i32) {
    %c0_i32 = arith.constant 0 : i32
    %c0_i32_0 = arith.constant 0 : i32
    %c0_i32_1 = arith.constant 0 : i32
    return %arg1, %c0_i32, %c0_i32_0 : i32, i32, i32
  }
  func.func @transform_7(%arg0: i32, %arg1: i32) -> (i32, i32, i32) {
    %c0_i32 = arith.constant 0 : i32
    %c0_i32_0 = arith.constant 0 : i32
    %c0_i32_1 = arith.constant 0 : i32
    return %arg1, %c0_i32, %c0_i32_0 : i32, i32, i32
  }
  func.func @transform_8(%arg0: i32, %arg1: i32) -> (i32, i32, i32) {
    %c0_i32 = arith.constant 0 : i32
    %c0_i32_0 = arith.constant 0 : i32
    %c0_i32_1 = arith.constant 0 : i32
    return %arg1, %c0_i32, %c0_i32_0 : i32, i32, i32
  }
  func.func @transform_9(%arg0: i32, %arg1: i32) -> (i32, i32, i32) {
    %c0_i32 = arith.constant 0 : i32
    %c0_i32_0 = arith.constant 0 : i32
    %c0_i32_1 = arith.constant 0 : i32
    return %arg1, %c0_i32, %c0_i32_0 : i32, i32, i32
  }
  func.func @transform_10(%arg0: i32, %arg1: i32) -> (i32, i32, i32) {
    %c0_i32 = arith.constant 0 : i32
    %c0_i32_0 = arith.constant 0 : i32
    %c0_i32_1 = arith.constant 0 : i32
    return %arg1, %c0_i32, %c0_i32_0 : i32, i32, i32
  }
  func.func @transform_11(%arg0: i32, %arg1: i32) -> (i32, i32, i32) {
    %c0_i32 = arith.constant 0 : i32
    %c0_i32_0 = arith.constant 0 : i32
    %c0_i32_1 = arith.constant 0 : i32
    return %arg1, %c0_i32, %c0_i32_0 : i32, i32, i32
  }
  func.func @transform_12(%arg0: i32, %arg1: i32) -> (i32, i32, i32) {
    %c0_i32 = arith.constant 0 : i32
    %c0_i32_0 = arith.constant 0 : i32
    %c0_i32_1 = arith.constant 0 : i32
    return %arg1, %c0_i32, %c0_i32_0 : i32, i32, i32
  }
  func.func @transform_13(%arg0: i32, %arg1: i32) -> (i32, i32, i32) {
    %c0_i32 = arith.constant 0 : i32
    %c0_i32_0 = arith.constant 0 : i32
    %c0_i32_1 = arith.constant 0 : i32
    return %arg1, %c0_i32, %c0_i32_0 : i32, i32, i32
  }
  func.func @transform_14(%arg0: i32, %arg1: i32) -> (i32, i32, i32) {
    %c0_i32 = arith.constant 0 : i32
    %c0_i32_0 = arith.constant 0 : i32
    %c0_i32_1 = arith.constant 0 : i32
    return %arg0, %c0_i32, %c0_i32_0 : i32, i32, i32
  }
}

</mosaic_0001>

<bundles_post_ra>
// kernel: rnadlm_forward.3
= control target key start
LH: loop header
LB: loop body
LE: loop exit
PB: predicated region body
PF: predicated region fallthrough
CT: control target
= control target key end

     0   :  { %s631_s0 = inlined_call_operand.vmem [shape: f32[32,384], index: 0, kind: input, shape index: {}]   ;;  %s632_s1 = inlined_call_operand.vmem [shape: bf16[384,128], index: 1, kind: input, shape index: {}]   ;;  %s633_s2 = inlined_call_operand.vmem [shape: f32[1,128], index: 2, kind: input, shape index: {}]   ;;  %s634_s3 = inlined_call_operand.hbm [shape: f32[32,128], index: 3, kind: output, shape index: {}]  }
   0x1   :  { %v437_v0 = vld [vmem:[%s632_s1 + $0x40] sm:$0xff]   ;;  %v439_v2 = vld [vmem:[%s632_s1 + $0x48] sm:$0xff]   ;;  %v442_v5 = vld [vmem:[%s632_s1 + $0x50] sm:$0xff]  }
   0x2   :  { %v438_v1 = vld [vmem:[%s632_s1] sm:$0xff]   ;;  %376 = vmatprep.subr.bf16.mxu0 %v437_v0  ;;  %v441_v4 = vld [vmem:[%s632_s1 + $0x8] sm:$0xff]   ;;  %v444_v7 = vld [vmem:[%s632_s1 + $0x10] sm:$0xff]  }
   0x3   :  { %377 = vmatpush3.bf16.msra.mxu0 %v438_v1  ;;  %v440_v3 = vld [vmem:[%s632_s1 + $0x80] sm:$0xff]   ;;  %v443_v6 = vld [vmem:[%s632_s1 + $0x88] sm:$0xff]   ;;  %v445_v8 = vld [vmem:[%s632_s1 + $0x58] sm:$0xff]  }
   0x4   :  { %378 = vmatprep.subr.bf16.mxu0 %v439_v2  ;;  %414 = vmatprep.subr.bf16.mxu1 %v440_v3  ;;  %v446_v9 = vld [vmem:[%s632_s1 + $0x90] sm:$0xff]   ;;  %v447_v10 = vld [vmem:[%s632_s1 + $0x18] sm:$0xff]   ;;  %v448_v11 = vld [vmem:[%s632_s1 + $0x60] sm:$0xff]  }
   0x5   :  { %415 = vmatpush3.bf16.msra.mxu1 %v440_v3  ;;  %v449_v12 = vld [vmem:[%s632_s1 + $0x98] sm:$0xff]   ;;  %v450_v13 = vld [vmem:[%s632_s1 + $0x20] sm:$0xff]   ;;  %v451_v15 = vld [vmem:[%s632_s1 + $0x68] sm:$0xff]  }
   0x6   :  { %416 = vmatprep.subr.bf16.mxu1 %v443_v6  ;;  %v452_v14 = vld [vmem:[%s632_s1 + $0xa0] sm:$0xff]   ;;  %v453_v16 = vld [vmem:[%s632_s1 + $0x28] sm:$0xff]   ;;  %v454_v18 = vld [vmem:[%s632_s1 + $0x70] sm:$0xff]  }
   0x7   :  { %379 = vmatpush3.bf16.msra.mxu0 %v441_v4  ;;  %v455_v17 = vld [vmem:[%s632_s1 + $0xa8] sm:$0xff]   ;;  %v456_v19 = vld [vmem:[%s632_s1 + $0x30] sm:$0xff]   ;;  %v20_v22 = vld [vmem:[%s631_s0 + $0x20] sm:$0xff] }
   0x8   :  { %380 = vmatprep.subr.bf16.mxu0 %v442_v5  ;;  %v458_v20 = vld [vmem:[%s632_s1 + $0xb0] sm:$0xff]   ;;  %v17_v21 = vld [vmem:[%s631_s0 + $0x8] sm:$0xff]  ;;  %v457_v23 = vld [vmem:[%s632_s1 + $0x78] sm:$0xff]  }
   0x9   :  { %417 = vmatpush3.bf16.msra.mxu1 %v443_v6  ;;  %v29_v24 = vpack.c.bf16 %v20_v22, %v17_v21  ;;  %v18_v25 = vld [vmem:[%s631_s0 + $0x10] sm:$0xff]  ;;  %v21_v26 = vld [vmem:[%s631_s0 + $0x28] sm:$0xff]  ;;  %v459_v27 = vld [vmem:[%s632_s1 + $0x38] sm:$0xff]  }
   0xa   :  { %418 = vmatprep.subr.bf16.mxu1 %v446_v9  ;;  %v30_v28 = vpack.c.bf16 %v21_v26, %v18_v25  ;;  %v16_v29 = vld [vmem:[%s631_s0] sm:$0xff]  ;;  %v19_v30 = vld [vmem:[%s631_s0 + $0x18] sm:$0xff]  ;;  %v26_v33 = vld [vmem:[%s631_s0 + $0x50] sm:$0xff] }
   0xb   :  { %381 = vmatpush3.bf16.msra.mxu0 %v444_v7  ;;  %265 = vmatprep.mubr.bf16.mxu0 %v29_v24  ;;  %v460_v31 = vld [vmem:[%s632_s1 + $0xb8] sm:$0xff]  }
   0xc   :  { %382 = vmatprep.subr.bf16.mxu0 %v445_v8  ;;  %430 = vmatprep.mubr.bf16.mxu1 %v30_v28  ;;  %v23_v32 = vld [vmem:[%s631_s0 + $0x38] sm:$0xff] }
   0xd   :  { %419 = vmatpush3.bf16.msra.mxu1 %v446_v9 }
   0xe   :  { %420 = vmatprep.subr.bf16.mxu1 %v449_v12 }
   0xf   :  { %383 = vmatpush3.bf16.msra.mxu0 %v447_v10 }
  0x10   :  { %384 = vmatprep.subr.bf16.mxu0 %v448_v11 }
  0x11   :  { %421 = vmatpush3.bf16.msra.mxu1 %v449_v12 }
  0x12   :  { %422 = vmatprep.subr.bf16.mxu1 %v452_v14 }
  0x13   :  { %385 = vmatpush3.bf16.msra.mxu0 %v450_v13 }
  0x14   :  { %386 = vmatprep.subr.bf16.mxu0 %v451_v15 }
  0x15   :  { %423 = vmatpush3.bf16.msra.mxu1 %v452_v14 }
  0x16   :  { %424 = vmatprep.subr.bf16.mxu1 %v455_v17 }
  0x17   :  { %387 = vmatpush3.bf16.msra.mxu0 %v453_v16 }
  0x18   :  { %388 = vmatprep.subr.bf16.mxu0 %v454_v18 }
  0x19   :  { %425 = vmatpush3.bf16.msra.mxu1 %v455_v17 }
  0x1a   :  { %426 = vmatprep.subr.bf16.mxu1 %v458_v20 }
  0x1b   :  { %389 = vmatpush3.bf16.msra.mxu0 %v456_v19 }
  0x1c   :  { %390 = vmatprep.subr.bf16.mxu0 %v457_v23 }
  0x1d   :  { %8 = vsyncpa [#allocation3], 0  ;;  %427 = vmatpush3.bf16.msra.mxu1 %v458_v20  ;;  %v28_v34 = vpack.c.bf16 %v19_v30, %v16_v29  ;;  %v24_v35 = vld [vmem:[%s631_s0 + $0x40] sm:$0xff]  ;;  %v27_v36 = vld [vmem:[%s631_s0 + $0x58] sm:$0xff]  ;;  %v32_v37 = vpack.c.bf16 %v26_v33, %v23_v32 }
  0x1e   :  { %428 = vmatprep.subr.bf16.mxu1 %v460_v31  ;;  %v33_v38 = vpack.c.bf16 %v27_v36, %v24_v35  ;;  %v22_v39 = vld [vmem:[%s631_s0 + $0x30] sm:$0xff]  ;;  %v25_v40 = vld [vmem:[%s631_s0 + $0x48] sm:$0xff]  ;;  %v351_v44 = vld [vmem:[%s633_s2] ss:$0 sm:$0xff]  ;;  %s485_s0 = smov [#allocation2]  }
  0x1f   :  { %391 = vmatpush3.bf16.msra.mxu0 %v459_v27  ;;  %v31_v41 = vpack.c.bf16 %v25_v40, %v22_v39  ;;  %s340_s2 = sshll.u32 %s485_s0, 4  ;;  %s341_s2 = int_to_ptr.vmem [resolvable:$true] %s340_s2 }
  0x20   :  { %s461_s4 = scalar_lea.vmem %s341_s2, 512  ;;  %p466_p1 = scmp.lt.s32.totalorder %s341_s2, %s341_s2 }
  0x21   :  { %429 = vmatpush3.bf16.msra.mxu1 %v460_v31  ;;  %p462_p0 = scmp.ne.s32.totalorder %s341_s2, %s461_s4  ;;  %p467_p2 = scmp.lt.s32.totalorder %s461_s4, %s461_s4 }
  0x22   :  { %266 = vmatmul.mubr.bf16.vlgmr.msra.gmra.mrb[0].mxu0 %v28_v34 }
  0x23   :  { %273 = vmatprep.mubr.bf16.mxu0 %v32_v37  ;;  %p468_p3 = por %p467_p2, %p466_p1 }
  0x24   :  { %431 = vmatmul.mubr.bf16.vlgmr.msra.gmra.mrb[0].mxu1 %v33_v38 }
  0x25   :  { %p469_p4 = pnand %p468_p3, %p462_p0 }
  0x2a   :  { %274 = vmatmul.mubr.bf16.gmra.mrb[4].mxu0 %v31_v41 }
  0xf5   :  { %v392_v42 = vpop.f32.mrb[0].mxu0 }
  0xf6   :  { %v393_v43 = vpop.f32.mrb[1].mxu0 }
  0xf7   :  { %v394_v45 = vadd.f32 %v393_v43, %v392_v42  ;;  %v395_v46 = vpop.f32.mrb[2].mxu0  ;;  %v432_v48 = vpop.f32.mrb[0].mxu1 }
  0xf8   :  { %v396_v47 = vpop.f32.mrb[3].mxu0  ;;  %v316_v51 = vpop.f32.mrb[1].mxu1 }
  0xf9   :  { %v397_v49 = vadd.f32 %v396_v47, %v395_v46  ;;  %v268_v50 = vadd.f32 %v394_v45, %v351_v44  ;;  %v433_v52 = vpop.f32.mrb[2].mxu1 }
  0xfa   :  { %v319_v55 = vpop.f32.mrb[3].mxu1 }
  0xfb   :  { %v317_v53 = vadd.f32 %v316_v51, %v268_v50  ;;  %v271_v54 = vadd.f32 %v397_v49, %v351_v44 }
  0xfd   :  { %331 = vst [vmem:[#allocation2] sm:$0xff] %v317_v53  ;;  %v320_v56 = vadd.f32 %v319_v55, %v271_v54  ;;  %v398_v57 = vpop.f32.mrb[4].mxu0 }
  0xfe   :  { %v399_v58 = vpop.f32.mrb[5].mxu0 }
  0xff   :  { %332 = vst [vmem:[#allocation2 + $0x8] sm:$0xff] %v320_v56  ;;  %v400_v59 = vadd.f32 %v399_v58, %v398_v57  ;;  %v401_v60 = vpop.f32.mrb[6].mxu0 }
 0x100   :  { %v402_v61 = vpop.f32.mrb[7].mxu0 }
 0x101   :  { %v276_v62 = vadd.f32 %v400_v59, %v351_v44  ;;  %v403_v63 = vadd.f32 %v402_v61, %v401_v60 }
 0x103   :  { %v325_v0 = vadd.f32 %v432_v48, %v276_v62  ;;  %v279_v1 = vadd.f32 %v403_v63, %v351_v44 }
 0x105   :  { %333 = vst [vmem:[#allocation2 + $0x10] sm:$0xff] %v325_v0  ;;  %v328_v2 = vadd.f32 %v433_v52, %v279_v1 }
 0x107   :  { %334 = vst [vmem:[#allocation2 + $0x18] sm:$0xff] %v328_v2 }
 0x108   :  { %472 = shalt.err (!%p469_p4)
}
 0x109   :  { %s473_s7 = scalar_lea.hbm %s634_s3, 512 }
 0x10a   :  { %p474_p5 = scmp.ne.s32.totalorder %s634_s3, %s473_s7  ;;  %p477_p6 = scmp.lt.u32.totalorder %s473_s7, %s634_s3 }
 0x10c   :  { %p479_p7 = pnand %p477_p6, %p474_p5 }
 0x10e   :  { %482 = shalt.err (!%p479_p7)
}
 0x10f   :  { %s486_s12 = smov 128   ;;  %s487_s13 = smov 8  }
 0x110   :  { %346 = dma.vmem_to_hbm [thread:$0]  %s341_s2, 512, %s634_s3, [#allocation3], %s486_s12, %s486_s12, %s487_s13  }
 0x111   :  { %483 = dma.done.wait [#allocation3], 512  }
 0x112   :  { %484 = vsyncadd [#allocation3], 4294966784 }
 0x113   :  { %350 = vsyncpa [#allocation3], 1 }

// kernel: rnadlm_forward.2
= control target key start
LH: loop header
LB: loop body
LE: loop exit
PB: predicated region body
PF: predicated region fallthrough
CT: control target
= control target key end

     0   :  { %s11525_s0 = inlined_call_operand.vmem [shape: f32[2,16,384], index: 0, kind: input, shape index: {}]   ;;  %s11526_s1 = inlined_call_operand.vmem [shape: f32[2,1,16], index: 1, kind: input, shape index: {}]   ;;  %s11527_s2 = inlined_call_operand.hbm [shape: bf16[2,384,1152], index: 2, kind: input, shape index: {}]   ;;  %s11528_s3 = inlined_call_operand.hbm [shape: f32[2,1,1152], index: 3, kind: input, shape index: {}]   ;;  %s11529_s4 = inlined_call_operand.hbm [shape: bf16[2,384,384], index: 4, kind: input, shape index: {}]   ;;  %s11530_s5 = inlined_call_operand.hbm [shape: f32[2,1,384], index: 5, kind: input, shape index: {}]   ;;  %s11531_s6 = inlined_call_operand.hbm [shape: f32[2,1,384], index: 6, kind: input, shape index: {}]   ;;  %s11532_s7 = inlined_call_operand.hbm [shape: f32[2,1,384], index: 7, kind: input, shape index: {}]   ;;  %s11533_s8 = inlined_call_operand.hbm [shape: bf16[2,384,512], index: 8, kind: input, shape index: {}]   ;;  %s11534_s9 = inlined_call_operand.hbm [shape: f32[2,1,512], index: 9, kind: input, shape index: {}]   ;;  %s11535_s10 = inlined_call_operand.hbm [shape: bf16[2,512,384], index: 10, kind: input, shape index: {}]   ;;  %s11536_s11 = inlined_call_operand.hbm [shape: f32[2,1,384], index: 11, kind: input, shape index: {}]   ;;  %s11537_s12 = inlined_call_operand.hbm [shape: f32[2,1,384], index: 12, kind: input, shape index: {}]   ;;  %s11538_s13 = inlined_call_operand.hbm [shape: f32[2,1,384], index: 13, kind: input, shape index: {}]   ;;  %s11539_s14 = inlined_call_operand.vmem [shape: f32[2,16,384], index: 14, kind: output, shape index: {}]  }
   0x1   :  { %11559 = sst [smem:[#allocation41_spill]] %s11525_s0 }
   0x2   :  { %11560 = sst [smem:[#allocation42_spill]] %s11526_s1 }
   0x3   :  { %11561 = sst [smem:[#allocation43_spill]] %s11527_s2 }
   0x4   :  { %11562 = sst [smem:[#allocation44_spill]] %s11528_s3 }
   0x5   :  { %11563 = sst [smem:[#allocation45_spill]] %s11529_s4 }
   0x6   :  { %11564 = sst [smem:[#allocation46_spill]] %s11530_s5 }
   0x7   :  { %11565 = sst [smem:[#allocation47_spill]] %s11539_s14 }
   0x8   :  { %19 = vsyncpa [#allocation5], 0 }
   0x9   :  { %21 = vsyncpa [#allocation5 + $0x1], 0 }
   0xa   :  { %22 = vsyncpa [#allocation7], 0 }
   0xb   :  { %24 = vsyncpa [#allocation7 + $0x1], 0 }
   0xc   :  { %25 = vsyncpa [#allocation10], 0 }
   0xd   :  { %27 = vsyncpa [#allocation10 + $0x1], 0 }
   0xe   :  { %28 = vsyncpa [#allocation13], 0 }
   0xf   :  { %30 = vsyncpa [#allocation13 + $0x1], 0 }
  0x10   :  { %31 = vsyncpa [#allocation16], 0 }
  0x11   :  { %33 = vsyncpa [#allocation16 + $0x1], 0 }
  0x12   :  { %34 = vsyncpa [#allocation19], 0 }
  0x13   :  { %36 = vsyncpa [#allocation19 + $0x1], 0 }
  0x14   :  { %37 = vsyncpa [#allocation22], 0 }
  0x15   :  { %39 = vsyncpa [#allocation22 + $0x1], 0  ;;  %s9699_s29 = smov 0   ;;  %s9701_s30 = smov 0  }
  0x16   :  { %s9703_s15 = smov 0   ;;  %s9705_s16 = smov 0  }
  0x17   :  { %s9707_s17 = smov 0   ;;  %s9709_s18 = smov 0  }
  0x18   :  { %s9711_s19 = smov 0   ;;  %s9713_s20 = smov 0  }
  0x19 LB: > { %11566 = sst [smem:[#allocation30_spill]] %s9574_s30  ;;  %s11541_s21 = sadd.s32 4294967295, %s9598_s20   ;;  %s9598_s20 = sphi %s9713_s20, %s45_s20   ;;  %s9594_s19 = sphi %s9711_s19, %s11622_s19   ;;  %s9590_s18 = sphi %s9709_s18, %s11624_s18   ;;  %s9586_s17 = sphi %s9707_s17, %s11620_s17   ;;  %s9582_s16 = sphi %s9705_s16, %s11623_s16   ;;  %s9578_s15 = sphi %s9703_s15, %s11619_s15   ;;  %s9574_s30 = sphi %s9701_s30, %s11618_s30   ;;  %s9570_s29 = sphi %s9699_s29, %s11617_s29  }
  0x1a   : > { %11567 = sst [smem:[#allocation31_spill]] %s9578_s15  ;;  %s54_s22 = sadd.s32 1, %s9590_s18 }
  0x1b   : > { %11568 = sst [smem:[#allocation32_spill]] %s9582_s16  ;;  %p55_p0 = scmp.ge.s32.totalorder %s54_s22, 2 }
  0x1c   : > { %11569 = sst [smem:[#allocation33_spill]] %s9586_s17  ;;  %s57_s23 = sadd.s32 1, %s9594_s19 }
  0x1d   : > { %11570 = sst [smem:[#allocation34_spill]] %s9594_s19  ;;  %s116_s24 = sadd.s32 1, %s9578_s15 }
  0x1e   : > { %11571 = sst [smem:[#allocation35_spill]] %s9598_s20  ;;  %p123_p1 = scmp.ne.s32.totalorder %s9578_s15, %s9574_s30 }
  0x1f   : > { %s11626_s22 = smov (%p55_p0, %s54_s22), 0  ;;  %s11628_s23 = smov (!%p55_p0, %s57_s23), %s9594_s19 }
  0x20   : > { %11572 = sst [smem:[#allocation36_spill]] %s11626_s22  ;;  %s113_s25 = ssub.s32 %s9590_s18, %s11626_s22 }
  0x21   : > { %p124_p2 = scmp.eq.s32.totalorder %s9598_s20, 0  ;;  %p59_p3 = scmp.ge.s32.totalorder %s11628_s23, 2 }
  0x22   : > { %p114_p4 = scmp.eq.s32.totalorder %s113_s25, 0  ;;  %p129_p6 = scmp.ne.s32.totalorder %s9574_s30, %s9570_s29 }
  0x23   : > { %p125_p5 = por %p124_p2, %p123_p1  ;;  %s11630_s23 = smov (%p59_p3, %s11628_s23), 0 }
  0x24   : > { %11573 = sst [smem:[#allocation37_spill]] %s11630_s23  ;;  %p130_p7 = scmp.eq.s32.totalorder %s11541_s21, 0 }
  0x25   : > { %s9753_s26 = scalar_select %p114_p4, %s9578_s15, %s116_s24  }
  0x26   : > { %p8265_p8 = scmp.lt.s32.totalorder %s9598_s20, 4  ;;  %s9759_s27 = sand.u32 1, %s9578_s15  }
  0x27   : > { %11574 = sst [smem:[#allocation38_spill]] %s9753_s26  ;;  %p9761_p9 = por %p130_p7, %p129_p6 }
  0x28   : > { %s9766_s22 = sand.u32 1, %s9598_s20   ;;  %p9768_p10 = pnand %p8265_p8, %p125_p5 }
  0x29   : > { %s11575_s28 = scalar_select %p9761_p9, 1, 0 }
  0x2a   : > { %s11577_s25 = scalar_select %p9768_p10, 1, 0 }
  0x2b   : > { %11576 = sst [smem:[#allocation39_spill]] %s11575_s28  ;;  %s8178_s29 = smul.u32 9, %s9759_s27 }
  0x2c   : > { %p7259_p11 = scmp.ge.s32.totalorder %s9598_s20, 1  ;;  %s8179_s24 = smul.u32 144, %s9590_s18 }
  0x2d   : > { %p713_p12 = scmp.lt.s32.totalorder %s9598_s20, 5  ;;  %s11578_s3 = sld [smem:[#allocation44_spill]] }
  0x2e   : > { %s504_s26 = scalar_lea.vmem [#allocation6], %s8178_s29  ;;  %p9792_p1 = pneg %p9768_p10 }
  0x2f   : > { %s512_s15 = sshll.u32 %s504_s26, 4  ;;  %p9783_p13 = pnand %p7259_p11, %p713_p12  ;;  %s9781_s15 = int_to_ptr.vmem [resolvable:$true] %s512_s15 }
  0x31   : > { %s11579_s16 = scalar_select %p9783_p13, 1, 0 }
  0x33   : > { %s9779_s19 = scalar_lea.hbm %s11578_s3, %s8179_s24  ;;  %11580 = sst [smem:[#allocation40_spill]] %s11579_s16 }
  0x34   : > { %s9148_s0 = scalar_lea.hbm %s9779_s19, 144  ;;  %s9153_s29 = scalar_lea.hbm %s11578_s3, 288 }
  0x35   : > { %p9149_p0 = scmp.ne.s32.totalorder %s9779_s19, %s9148_s0  ;;  %p9154_p4 = scmp.lt.u32.totalorder %s9779_s19, %s11578_s3 }
  0x36   : > { %p9155_p5 = scmp.lt.u32.totalorder %s9153_s29, %s9148_s0  ;;  %p9157_p7 = scmp.lt.u32.totalorder %s9148_s0, %s9779_s19 }
  0x37   : > { %p9151_p2 = pnand %p9792_p1, %p9149_p0 }
  0x38   : > { %p9156_p6 = por %p9155_p5, %p9154_p4 }
  0x39   : > { %p9152_p3 = pneg %p9151_p2 }
  0x3a   : > { %p9158_p8 = por %p9157_p7, %p9156_p6 }
  0x3c   : > { %p9159_p11 = pnand %p9158_p8, %p9152_p3 }
  0x3e   : > { %9162 = shalt.err (!%p9159_p11)
}
  0x3f   : > { %s9163_s14 = scalar_lea.vmem %s9781_s15, 144  ;;  %s9600_s23 = smov [#allocation6]  }
  0x40   : > { %p9164_p12 = scmp.ne.s32.totalorder %s9781_s15, %s9163_s14  ;;  %s9168_s26 = sshll.u32 %s9600_s23, 4  ;;  %s9169_s26 = int_to_ptr.vmem [resolvable:$false] %s9168_s26 }
  0x41   : > { %s9170_s1 = scalar_lea.vmem %s9169_s26, 288  ;;  %p9171_p9 = scmp.lt.s32.totalorder %s9781_s15, %s9169_s26 }
  0x42   : > { %p9166_p0 = pnand %p9164_p12, %p9792_p1  ;;  %p9172_p13 = scmp.lt.s32.totalorder %s9170_s1, %s9163_s14 }
  0x44   : > { %p9167_p2 = pneg %p9166_p0  ;;  %p9173_p4 = por %p9172_p13, %p9171_p9 }
  0x46   : > { %p9174_p5 = pnand %p9173_p4, %p9167_p2 }
  0x48   : > { %9177 = shalt.err (!%p9174_p5)
}
  0x49   : > { %s11582_s0 = scalar_lea.sflag [#allocation7], %s9766_s22  ;;  %s9818_s29 = smul.u32 3, %s9759_s27 }
  0x4a   : > { %8234 = dma.hbm_to_vmem [thread:$0]  (!%p9768_p10), %s9779_s19, 144, %s9781_s15, %s11582_s0  }
  0x4b   : > { %s9821_s24 = smul.u32 48, %s9590_s18  ;;  %s11583_s5 = sld [smem:[#allocation46_spill]] }
  0x4c   : > { %s544_s1 = scalar_lea.vmem [#allocation9], %s9818_s29  ;;  %s541_s17 = scalar_lea.sflag [#allocation10], %s9766_s22 }
  0x4d   : > { %s552_s3 = sshll.u32 %s544_s1, 4  ;;  %s9836_s0 = scalar_lea.hbm %s11532_s7, %s9821_s24  ;;  %s9830_s3 = int_to_ptr.vmem [resolvable:$true] %s552_s3 }
  0x51   : > { %s9827_s26 = scalar_lea.hbm %s11583_s5, %s9821_s24  ;;  %s9183_s28 = scalar_lea.hbm %s11583_s5, 96 }
  0x52   : > { %s9178_s20 = scalar_lea.hbm %s9827_s26, 48  ;;  %p9184_p6 = scmp.lt.u32.totalorder %s9827_s26, %s11583_s5 }
  0x53   : > { %p9179_p9 = scmp.ne.s32.totalorder %s9827_s26, %s9178_s20  ;;  %p9185_p7 = scmp.lt.u32.totalorder %s9183_s28, %s9178_s20 }
  0x54   : > { %p9187_p11 = scmp.lt.u32.totalorder %s9178_s20, %s9827_s26 }
  0x55   : > { %p9181_p13 = pnand %p9179_p9, %p9792_p1  ;;  %p9186_p8 = por %p9185_p7, %p9184_p6 }
  0x57   : > { %p9182_p3 = pneg %p9181_p13  ;;  %p9188_p12 = por %p9187_p11, %p9186_p8 }
  0x59   : > { %p9189_p0 = pnand %p9188_p12, %p9182_p3 }
  0x5b   : > { %9192 = shalt.err (!%p9189_p0)
}
  0x5c   : > { %s9193_s1 = scalar_lea.vmem %s9830_s3, 48  ;;  %s9601_s15 = smov [#allocation9]  }
  0x5d   : > { %p9194_p2 = scmp.ne.s32.totalorder %s9830_s3, %s9193_s1  ;;  %s9198_s19 = sshll.u32 %s9601_s15, 4  ;;  %s9199_s19 = int_to_ptr.vmem [resolvable:$false] %s9198_s19 }
  0x5e   : > { %s9200_s30 = scalar_lea.vmem %s9199_s19, 96  ;;  %p9201_p9 = scmp.lt.s32.totalorder %s9830_s3, %s9199_s19 }
  0x5f   : > { %p9196_p4 = pnand %p9194_p2, %p9792_p1  ;;  %p9202_p13 = scmp.lt.s32.totalorder %s9200_s30, %s9193_s1 }
  0x61   : > { %p9197_p5 = pneg %p9196_p4  ;;  %p9203_p6 = por %p9202_p13, %p9201_p9 }
  0x63   : > { %p9204_p7 = pnand %p9203_p6, %p9197_p5 }
  0x65   : > { %9207 = shalt.err (!%p9204_p7)
}
  0x66   : > { %8240 = dma.hbm_to_vmem [thread:$0]  (!%p9768_p10), %s9827_s26, 48, %s9830_s3, %s541_s17  }
  0x67   : > { %s582_s16 = scalar_lea.vmem [#allocation12], %s9818_s29  ;;  %s7252_s28 = sshll.u32 %s9759_s27, 2 }
  0x68   : > { %s590_s20 = sshll.u32 %s582_s16, 4  ;;  %s11554_s14 = scalar_lea.sflag [#allocation13], %s9766_s22  ;;  %s9863_s20 = int_to_ptr.vmem [resolvable:$true] %s590_s20 }
  0x69   : > { %s9208_s23 = scalar_lea.hbm %s9836_s0, 48  ;;  %s9213_s19 = scalar_lea.hbm %s11532_s7, 96 }
  0x6a   : > { %p9209_p3 = scmp.ne.s32.totalorder %s9836_s0, %s9208_s23  ;;  %p9214_p12 = scmp.lt.u32.totalorder %s9836_s0, %s11532_s7 }
  0x6b   : > { %p9215_p0 = scmp.lt.u32.totalorder %s9213_s19, %s9208_s23  ;;  %p9217_p4 = scmp.lt.u32.totalorder %s9208_s23, %s9836_s0 }
  0x6c   : > { %p9211_p8 = pnand %p9209_p3, %p9792_p1 }
  0x6d   : > { %p9216_p2 = por %p9215_p0, %p9214_p12 }
  0x6e   : > { %p9212_p11 = pneg %p9211_p8 }
  0x6f   : > { %p9218_p5 = por %p9217_p4, %p9216_p2 }
  0x71   : > { %p9219_p9 = pnand %p9218_p5, %p9212_p11 }
  0x73   : > { %9222 = shalt.err (!%p9219_p9)
}
  0x74   : > { %s9223_s3 = scalar_lea.vmem %s9863_s20, 48  ;;  %s9602_s26 = smov [#allocation12]  }
  0x75   : > { %p9224_p13 = scmp.ne.s32.totalorder %s9863_s20, %s9223_s3  ;;  %s9228_s16 = sshll.u32 %s9602_s26, 4  ;;  %s9229_s16 = int_to_ptr.vmem [resolvable:$false] %s9228_s16 }
  0x76   : > { %s9230_s5 = scalar_lea.vmem %s9229_s16, 96  ;;  %p9231_p3 = scmp.lt.s32.totalorder %s9863_s20, %s9229_s16 }
  0x77   : > { %p9226_p6 = pnand %p9224_p13, %p9792_p1  ;;  %p9232_p8 = scmp.lt.s32.totalorder %s9230_s5, %s9223_s3 }
  0x79   : > { %p9227_p7 = pneg %p9226_p6  ;;  %p9233_p12 = por %p9232_p8, %p9231_p3 }
  0x7b   : > { %p9234_p0 = pnand %p9233_p12, %p9227_p7 }
  0x7d   : > { %9237 = shalt.err (!%p9234_p0)
}
  0x7e   : > { %8246 = dma.hbm_to_vmem [thread:$0]  (!%p9768_p10), %s9836_s0, 48, %s9863_s20, %s11554_s14  }
  0x7f   : > { %s7773_s23 = sshll.u32 %s9590_s18, 6  ;;  %s622_s30 = scalar_lea.vmem [#allocation15], %s7252_s28 }
  0x80   : > { %s9894_s19 = scalar_lea.hbm %s11534_s9, %s7773_s23  ;;  %s630_s3 = sshll.u32 %s622_s30, 4  ;;  %s631_s3 = int_to_ptr.vmem [resolvable:$true] %s630_s3 }
  0x81   : > { %s11553_s26 = scalar_lea.sflag [#allocation16], %s9766_s22  ;;  %s9238_s16 = scalar_lea.hbm %s9894_s19, 64 }
  0x82   : > { %p9239_p11 = scmp.ne.s32.totalorder %s9894_s19, %s9238_s16  ;;  %s9243_s5 = scalar_lea.hbm %s11534_s9, 128 }
  0x83   : > { %p9244_p5 = scmp.lt.u32.totalorder %s9894_s19, %s11534_s9  ;;  %p9245_p9 = scmp.lt.u32.totalorder %s9243_s5, %s9238_s16 }
  0x84   : > { %p9241_p2 = pnand %p9239_p11, %p9792_p1  ;;  %p9247_p6 = scmp.lt.u32.totalorder %s9238_s16, %s9894_s19 }
  0x85   : > { %p9246_p13 = por %p9245_p9, %p9244_p5 }
  0x86   : > { %p9242_p4 = pneg %p9241_p2 }
  0x87   : > { %p9248_p7 = por %p9247_p6, %p9246_p13 }
  0x89   : > { %p9249_p3 = pnand %p9248_p7, %p9242_p4 }
  0x8b   : > { %9252 = shalt.err (!%p9249_p3)
}
  0x8c   : > { %s9253_s28 = scalar_lea.vmem %s631_s3, 64  ;;  %s9603_s15 = smov [#allocation15]  }
  0x8d   : > { %p9254_p8 = scmp.ne.s32.totalorder %s631_s3, %s9253_s28  ;;  %s9258_s30 = sshll.u32 %s9603_s15, 4  ;;  %s9259_s30 = int_to_ptr.vmem [resolvable:$false] %s9258_s30 }
  0x8e   : > { %s9260_s0 = scalar_lea.vmem %s9259_s30, 128  ;;  %p9261_p11 = scmp.lt.s32.totalorder %s631_s3, %s9259_s30 }
  0x8f   : > { %p9256_p12 = pnand %p9254_p8, %p9792_p1  ;;  %p9262_p2 = scmp.lt.s32.totalorder %s9260_s0, %s9253_s28 }
  0x91   : > { %p9257_p0 = pneg %p9256_p12  ;;  %p9263_p10 = por %p9262_p2, %p9261_p11 }
  0x93   : > { %p9264_p5 = pnand %p9263_p10, %p9257_p0 }
  0x95   : > { %9267 = shalt.err (!%p9264_p5)
}
  0x96   : > { %p11584_p9 = scmp.ne.s32.totalorder %s11577_s25, 0  ;;  %s9922_s5 = scalar_lea.hbm %s11536_s11, %s9821_s24 }
  0x97   : > { %s662_s23 = scalar_lea.vmem [#allocation18], %s9818_s29  ;;  %s11555_s28 = scalar_lea.sflag [#allocation19], %s9766_s22 }
  0x98   : > { %8252 = dma.hbm_to_vmem [thread:$0]  (!%p11584_p9), %s9894_s19, 64, %s631_s3, %s11553_s26  }
  0x99   : > { %s670_s1 = sshll.u32 %s662_s23, 4  ;;  %s9268_s15 = scalar_lea.hbm %s9922_s5, 48  ;;  %s671_s1 = int_to_ptr.vmem [resolvable:$true] %s670_s1 }
  0x9a   : > { %p9269_p10 = scmp.ne.s32.totalorder %s9922_s5, %s9268_s15  ;;  %s9273_s3 = scalar_lea.hbm %s11536_s11, 96 }
  0x9b   : > { %p9274_p6 = scmp.lt.u32.totalorder %s9922_s5, %s11536_s11  ;;  %p9275_p7 = scmp.lt.u32.totalorder %s9273_s3, %s9268_s15 }
  0x9c   : > { %p9271_p4 = pnand %p9269_p10, %p9792_p1  ;;  %p9277_p8 = scmp.lt.u32.totalorder %s9268_s15, %s9922_s5 }
  0x9d   : > { %p9276_p3 = por %p9275_p7, %p9274_p6 }
  0x9e   : > { %p9272_p13 = pneg %p9271_p4 }
  0x9f   : > { %p9278_p12 = por %p9277_p8, %p9276_p3 }
  0xa1   : > { %p9279_p0 = pnand %p9278_p12, %p9272_p13 }
  0xa3   : > { %9282 = shalt.err (!%p9279_p0)
}
  0xa4   : > { %s9283_s20 = scalar_lea.vmem %s671_s1, 48  ;;  %s9604_s23 = smov [#allocation18]  }
  0xa5   : > { %p9284_p11 = scmp.ne.s32.totalorder %s671_s1, %s9283_s20  ;;  %s9288_s26 = sshll.u32 %s9604_s23, 4  ;;  %s9289_s26 = int_to_ptr.vmem [resolvable:$false] %s9288_s26 }
  0xa6   : > { %s9290_s30 = scalar_lea.vmem %s9289_s26, 96  ;;  %p9291_p10 = scmp.lt.s32.totalorder %s671_s1, %s9289_s26 }
  0xa7   : > { %p9286_p2 = pnand %p9284_p11, %p9792_p1  ;;  %p9292_p4 = scmp.lt.s32.totalorder %s9290_s30, %s9283_s20 }
  0xa9   : > { %p9287_p5 = pneg %p9286_p2  ;;  %p9293_p9 = por %p9292_p4, %p9291_p10 }
  0xab   : > { %p9294_p6 = pnand %p9293_p9, %p9287_p5 }
  0xad   : > { %9297 = shalt.err (!%p9294_p6)
}
  0xae   : > { %p11585_p7 = scmp.ne.s32.totalorder %s11577_s25, 0  ;;  %s8176_s15 = smul.u32 1728, %s9759_s27 }
  0xaf   : > { %s8177_s19 = smul.u32 27648, %s9590_s18  ;;  %s11586_s2 = sld [smem:[#allocation43_spill]] }
  0xb0   : > { %8258 = dma.hbm_to_vmem [thread:$0]  (!%p11585_p7), %s9922_s5, 48, %s671_s1, %s11555_s28  }
  0xb1   : > { %s483_s16 = scalar_lea.vmem [#allocation4], %s8176_s15  ;;  %s8180_s23 = smul.u32 576, %s9759_s27 }
  0xb2   : > { %s490_s20 = sshll.u32 %s483_s16, 4  ;;  %s480_s30 = scalar_lea.sflag [#allocation5], %s9759_s27  ;;  %s9952_s20 = int_to_ptr.vmem [resolvable:$true] %s490_s20 }
  0xb5   : > { %s9950_s26 = scalar_lea.hbm %s11586_s2, %s8177_s19  ;;  %s9303_s19 = scalar_lea.hbm %s11586_s2, 55296 }
  0xb6   : > { %s9298_s14 = scalar_lea.hbm %s9950_s26, 27648  ;;  %p9304_p8 = scmp.lt.u32.totalorder %s9950_s26, %s11586_s2 }
  0xb7   : > { %p9299_p9 = scmp.ne.s32.totalorder %s9950_s26, %s9298_s14  ;;  %p9305_p12 = scmp.lt.u32.totalorder %s9303_s19, %s9298_s14 }
  0xb8   : > { %p9307_p11 = scmp.lt.u32.totalorder %s9298_s14, %s9950_s26 }
  0xb9   : > { %p9301_p13 = pnand %p9299_p9, %p9792_p1  ;;  %p9306_p0 = por %p9305_p12, %p9304_p8 }
  0xbb   : > { %p9302_p3 = pneg %p9301_p13  ;;  %p9308_p2 = por %p9307_p11, %p9306_p0 }
  0xbd   : > { %p9309_p5 = pnand %p9308_p2, %p9302_p3 }
  0xbf   : > { %9312 = shalt.err (!%p9309_p5)
}
  0xc0   : > { %s9313_s15 = scalar_lea.vmem %s9952_s20, 27648  ;;  %s9605_s16 = smov [#allocation4]  }
  0xc1   : > { %p9314_p10 = scmp.ne.s32.totalorder %s9952_s20, %s9313_s15  ;;  %s9318_s5 = sshll.u32 %s9605_s16, 4  ;;  %s9319_s5 = int_to_ptr.vmem [resolvable:$false] %s9318_s5 }
  0xc2   : > { %s9320_s1 = scalar_lea.vmem %s9319_s5, 55296  ;;  %p9321_p9 = scmp.lt.s32.totalorder %s9952_s20, %s9319_s5 }
  0xc3   : > { %p9316_p4 = pnand %p9314_p10, %p9792_p1  ;;  %p9322_p13 = scmp.lt.s32.totalorder %s9320_s1, %s9313_s15 }
  0xc5   : > { %p9317_p6 = pneg %p9316_p4  ;;  %p9323_p8 = por %p9322_p13, %p9321_p9 }
  0xc7   : > { %p9324_p12 = pnand %p9323_p8, %p9317_p6 }
  0xc9   : > { %9327 = shalt.err (!%p9324_p12)
}
  0xca   : > { %s9606_s14 = smov 576   ;;  %s9607_s19 = smov 36  }
  0xcb   : > { %8231 = dma.hbm_to_vmem [thread:$0]  (!%p11585_p7), %s9950_s26, 27648, %s9952_s20, %s480_s30, %s9606_s14, %s9606_s14, %s9607_s19  }
  0xcc   : > { %s8181_s3 = smul.u32 9216, %s9590_s18  ;;  %s523_s0 = scalar_lea.vmem [#allocation8], %s8180_s23 }
  0xcd   : > { %s530_s16 = sshll.u32 %s523_s0, 4  ;;  %s11587_s4 = sld [smem:[#allocation45_spill]]  ;;  %s9987_s16 = int_to_ptr.vmem [resolvable:$true] %s530_s16 }
  0xd3   : > { %s9985_s1 = scalar_lea.hbm %s11587_s4, %s8181_s3  ;;  %s9333_s23 = scalar_lea.hbm %s11587_s4, 18432 }
  0xd4   : > { %s9328_s28 = scalar_lea.hbm %s9985_s1, 9216  ;;  %p9334_p2 = scmp.lt.u32.totalorder %s9985_s1, %s11587_s4 }
  0xd5   : > { %p9329_p3 = scmp.ne.s32.totalorder %s9985_s1, %s9328_s28  ;;  %p9335_p5 = scmp.lt.u32.totalorder %s9333_s23, %s9328_s28 }
  0xd6   : > { %p9337_p4 = scmp.lt.u32.totalorder %s9328_s28, %s9985_s1 }
  0xd7   : > { %p9331_p0 = pnand %p9329_p3, %p9792_p1  ;;  %p9336_p10 = por %p9335_p5, %p9334_p2 }
  0xd9   : > { %p9332_p11 = pneg %p9331_p0  ;;  %p9338_p6 = por %p9337_p4, %p9336_p10 }
  0xdb   : > { %p9339_p9 = pnand %p9338_p6, %p9332_p11 }
  0xdd   : > { %9342 = shalt.err (!%p9339_p9)
}
  0xde   : > { %s9343_s19 = scalar_lea.vmem %s9987_s16, 9216  ;;  %s9608_s3 = smov [#allocation8]  }
  0xdf   : > { %p9344_p13 = scmp.ne.s32.totalorder %s9987_s16, %s9343_s19  ;;  %s9348_s0 = sshll.u32 %s9608_s3, 4  ;;  %s9349_s0 = int_to_ptr.vmem [resolvable:$false] %s9348_s0 }
  0xe0   : > { %s9350_s15 = scalar_lea.vmem %s9349_s0, 18432  ;;  %p9351_p3 = scmp.lt.s32.totalorder %s9987_s16, %s9349_s0 }
  0xe1   : > { %p9346_p8 = pnand %p9344_p13, %p9792_p1  ;;  %p9352_p0 = scmp.lt.s32.totalorder %s9350_s15, %s9343_s19 }
  0xe3   : > { %p9347_p12 = pneg %p9346_p8  ;;  %p9353_p2 = por %p9352_p0, %p9351_p3 }
  0xe5   : > { %p9354_p5 = pnand %p9353_p2, %p9347_p12 }
  0xe7   : > { %9357 = shalt.err (!%p9354_p5)
}
  0xe8   : > { %s11556_s28 = smov 192   ;;  %s9610_s5 = smov 12  }
  0xe9   : > { %s11588_s26 = scalar_lea.sflag [#allocation7], %s9766_s22  ;;  %s10019_s30 = scalar_lea.hbm %s11531_s6, %s9821_s24 }
  0xea   : > { %8237 = dma.hbm_to_vmem [thread:$0]  (!%p11585_p7), %s9985_s1, 9216, %s9987_s16, %s11588_s26, %s11556_s28, %s11556_s28, %s9610_s5  }
  0xeb   : > { %s563_s14 = scalar_lea.vmem [#allocation11], %s9818_s29  ;;  %s8188_s3 = smul.u32 768, %s9759_s27 }
  0xec   : > { %s571_s19 = sshll.u32 %s563_s14, 4  ;;  %s9358_s0 = scalar_lea.hbm %s10019_s30, 48  ;;  %s572_s19 = int_to_ptr.vmem [resolvable:$true] %s571_s19 }
  0xed   : > { %p9359_p11 = scmp.ne.s32.totalorder %s10019_s30, %s9358_s0  ;;  %s9363_s1 = scalar_lea.hbm %s11531_s6, 96 }
  0xee   : > { %p9364_p6 = scmp.lt.u32.totalorder %s10019_s30, %s11531_s6  ;;  %p9365_p9 = scmp.lt.u32.totalorder %s9363_s1, %s9358_s0 }
  0xef   : > { %p9361_p10 = pnand %p9359_p11, %p9792_p1  ;;  %p9367_p8 = scmp.lt.u32.totalorder %s9358_s0, %s10019_s30 }
  0xf0   : > { %p9366_p13 = por %p9365_p9, %p9364_p6 }
  0xf1   : > { %p9362_p4 = pneg %p9361_p10 }
  0xf2   : > { %p9368_p12 = por %p9367_p8, %p9366_p13 }
  0xf4   : > { %p9369_p3 = pnand %p9368_p12, %p9362_p4 }
  0xf6   : > { %9372 = shalt.err (!%p9369_p3)
}
  0xf7   : > { %s9373_s23 = scalar_lea.vmem %s572_s19, 48  ;;  %s9611_s14 = smov [#allocation11]  }
  0xf8   : > { %p9374_p0 = scmp.ne.s32.totalorder %s572_s19, %s9373_s23  ;;  %s9378_s28 = sshll.u32 %s9611_s14, 4  ;;  %s9379_s28 = int_to_ptr.vmem [resolvable:$false] %s9378_s28 }
  0xf9   : > { %s9380_s15 = scalar_lea.vmem %s9379_s28, 96  ;;  %p9381_p11 = scmp.lt.s32.totalorder %s572_s19, %s9379_s28 }
  0xfa   : > { %p9376_p2 = pnand %p9374_p0, %p9792_p1  ;;  %p9382_p10 = scmp.lt.s32.totalorder %s9380_s15, %s9373_s23 }
  0xfc   : > { %p9377_p5 = pneg %p9376_p2  ;;  %p9383_p7 = por %p9382_p10, %p9381_p11 }
  0xfe   : > { %p9384_p6 = pnand %p9383_p7, %p9377_p5 }
 0x100   : > { %9387 = shalt.err (!%p9384_p6)
}
 0x101   : > { %p11589_p9 = scmp.ne.s32.totalorder %s11577_s25, 0  ;;  %s8189_s0 = smul.u32 12288, %s9590_s18 }
 0x102   : > { %s601_s16 = scalar_lea.vmem [#allocation14], %s8188_s3 }
 0x103   : > { %8243 = dma.hbm_to_vmem [thread:$0]  (!%p11589_p9), %s10019_s30, 48, %s572_s19, %s541_s17  }
 0x104   : > { %s608_s1 = sshll.u32 %s601_s16, 4  ;;  %s10050_s20 = scalar_lea.hbm %s11533_s8, %s8189_s0  ;;  %s10052_s1 = int_to_ptr.vmem [resolvable:$true] %s608_s1 }
 0x105   : > { %s9388_s23 = scalar_lea.hbm %s10050_s20, 12288  ;;  %s9393_s19 = scalar_lea.hbm %s11533_s8, 24576 }
 0x106   : > { %p9389_p7 = scmp.ne.s32.totalorder %s10050_s20, %s9388_s23  ;;  %p9394_p8 = scmp.lt.u32.totalorder %s10050_s20, %s11533_s8 }
 0x107   : > { %p9395_p12 = scmp.lt.u32.totalorder %s9393_s19, %s9388_s23  ;;  %p9397_p0 = scmp.lt.u32.totalorder %s9388_s23, %s10050_s20 }
 0x108   : > { %p9391_p4 = pnand %p9389_p7, %p9792_p1 }
 0x109   : > { %p9396_p3 = por %p9395_p12, %p9394_p8 }
 0x10a   : > { %p9392_p13 = pneg %p9391_p4 }
 0x10b   : > { %p9398_p2 = por %p9397_p0, %p9396_p3 }
 0x10d   : > { %p9399_p5 = pnand %p9398_p2, %p9392_p13 }
 0x10f   : > { %9402 = shalt.err (!%p9399_p5)
}
 0x110   : > { %s9403_s16 = scalar_lea.vmem %s10052_s1, 12288  ;;  %s9612_s28 = smov [#allocation14]  }
 0x111   : > { %p9404_p11 = scmp.ne.s32.totalorder %s10052_s1, %s9403_s16  ;;  %s9408_s26 = sshll.u32 %s9612_s28, 4  ;;  %s9409_s26 = int_to_ptr.vmem [resolvable:$false] %s9408_s26 }
 0x112   : > { %s9410_s17 = scalar_lea.vmem %s9409_s26, 24576  ;;  %p9411_p7 = scmp.lt.s32.totalorder %s10052_s1, %s9409_s26 }
 0x113   : > { %p9406_p10 = pnand %p9404_p11, %p9792_p1  ;;  %p9412_p4 = scmp.lt.s32.totalorder %s9410_s17, %s9403_s16 }
 0x115   : > { %p9407_p6 = pneg %p9406_p10  ;;  %p9413_p8 = por %p9412_p4, %p9411_p7 }
 0x117   : > { %p9414_p12 = pnand %p9413_p8, %p9407_p6 }
 0x119   : > { %9417 = shalt.err (!%p9414_p12)
}
 0x11a   : > { %s9613_s23 = smov 256   ;;  %s9614_s30 = smov 16  }
 0x11b   : > { %s11590_s19 = scalar_lea.sflag [#allocation13], %s9766_s22  ;;  %s10082_s16 = scalar_lea.hbm %s11535_s10, %s8189_s0 }
 0x11c   : > { %8249 = dma.hbm_to_vmem [thread:$0]  (!%p11589_p9), %s10050_s20, 12288, %s10052_s1, %s11590_s19, %s9613_s23, %s9613_s23, %s9614_s30  }
 0x11d   : > { %s641_s28 = scalar_lea.vmem [#allocation17], %s8188_s3  ;;  %s9418_s17 = scalar_lea.hbm %s10082_s16, 12288 }
 0x11e   : > { %s648_s26 = sshll.u32 %s641_s28, 4  ;;  %p9419_p13 = scmp.ne.s32.totalorder %s10082_s16, %s9418_s17  ;;  %s10086_s26 = int_to_ptr.vmem [resolvable:$true] %s648_s26 }
 0x11f   : > { %s9423_s23 = scalar_lea.hbm %s11535_s10, 24576  ;;  %p9424_p2 = scmp.lt.u32.totalorder %s10082_s16, %s11535_s10 }
 0x120   : > { %p9421_p3 = pnand %p9419_p13, %p9792_p1  ;;  %p9425_p5 = scmp.lt.u32.totalorder %s9423_s23, %s9418_s17 }
 0x121   : > { %p9427_p10 = scmp.lt.u32.totalorder %s9418_s17, %s10082_s16 }
 0x122   : > { %p9422_p0 = pneg %p9421_p3  ;;  %p9426_p11 = por %p9425_p5, %p9424_p2 }
 0x124   : > { %p9428_p6 = por %p9427_p10, %p9426_p11 }
 0x126   : > { %p9429_p7 = pnand %p9428_p6, %p9422_p0 }
 0x128   : > { %9432 = shalt.err (!%p9429_p7)
}
 0x129   : > { %s9433_s3 = scalar_lea.vmem %s10086_s26, 12288  ;;  %s9615_s19 = smov [#allocation17]  }
 0x12a   : > { %p9434_p4 = scmp.ne.s32.totalorder %s10086_s26, %s9433_s3  ;;  %s9438_s14 = sshll.u32 %s9615_s19, 4  ;;  %s9439_s14 = int_to_ptr.vmem [resolvable:$false] %s9438_s14 }
 0x12b   : > { %s9440_s15 = scalar_lea.vmem %s9439_s14, 24576  ;;  %p9441_p13 = scmp.lt.s32.totalorder %s10086_s26, %s9439_s14 }
 0x12c   : > { %p9436_p8 = pnand %p9434_p4, %p9792_p1  ;;  %p9442_p3 = scmp.lt.s32.totalorder %s9440_s15, %s9433_s3 }
 0x12e   : > { %p9437_p12 = pneg %p9436_p8  ;;  %p9443_p2 = por %p9442_p3, %p9441_p13 }
 0x130   : > { %p9444_p5 = pnand %p9443_p2, %p9437_p12 }
 0x132   : > { %9447 = shalt.err (!%p9444_p5)
}
 0x133   : > { %s11591_s28 = smov 192   ;;  %s11592_s17 = scalar_lea.sflag [#allocation16], %s9766_s22 }
 0x134   : > { %8255 = dma.hbm_to_vmem [thread:$0]  (!%p11589_p9), %s10082_s16, 12288, %s10086_s26, %s11592_s17, %s11591_s28, %s11591_s28, %s9610_s5  }
 0x135   : > { %s10118_s23 = scalar_lea.hbm %s11537_s12, %s9821_s24  ;;  %s681_s0 = scalar_lea.vmem [#allocation20], %s9818_s29 }
 0x136   : > { %s689_s30 = sshll.u32 %s681_s0, 4  ;;  %s9448_s3 = scalar_lea.hbm %s10118_s23, 48  ;;  %s690_s30 = int_to_ptr.vmem [resolvable:$true] %s689_s30 }
 0x137   : > { %p9449_p0 = scmp.ne.s32.totalorder %s10118_s23, %s9448_s3  ;;  %s9453_s5 = scalar_lea.hbm %s11537_s12, 96 }
 0x138   : > { %p9454_p6 = scmp.lt.u32.totalorder %s10118_s23, %s11537_s12  ;;  %p9455_p7 = scmp.lt.u32.totalorder %s9453_s5, %s9448_s3 }
 0x139   : > { %p9451_p11 = pnand %p9449_p0, %p9792_p1  ;;  %p9457_p8 = scmp.lt.u32.totalorder %s9448_s3, %s10118_s23 }
 0x13a   : > { %p9456_p4 = por %p9455_p7, %p9454_p6 }
 0x13b   : > { %p9452_p10 = pneg %p9451_p11 }
 0x13c   : > { %p9458_p12 = por %p9457_p8, %p9456_p4 }
 0x13e   : > { %p9459_p13 = pnand %p9458_p12, %p9452_p10 }
 0x140   : > { %9462 = shalt.err (!%p9459_p13)
}
 0x141   : > { %s9463_s15 = scalar_lea.vmem %s690_s30, 48  ;;  %s9616_s28 = smov [#allocation20]  }
 0x142   : > { %p9464_p3 = scmp.ne.s32.totalorder %s690_s30, %s9463_s15  ;;  %s9468_s17 = sshll.u32 %s9616_s28, 4  ;;  %s9469_s17 = int_to_ptr.vmem [resolvable:$false] %s9468_s17 }
 0x143   : > { %s9470_s1 = scalar_lea.vmem %s9469_s17, 96  ;;  %p9471_p0 = scmp.lt.s32.totalorder %s690_s30, %s9469_s17 }
 0x144   : > { %p9466_p2 = pnand %p9464_p3, %p9792_p1  ;;  %p9472_p11 = scmp.lt.s32.totalorder %s9470_s1, %s9463_s15 }
 0x146   : > { %p9467_p5 = pneg %p9466_p2  ;;  %p9473_p9 = por %p9472_p11, %p9471_p0 }
 0x148   : > { %p9474_p6 = pnand %p9473_p9, %p9467_p5 }
 0x14a   : > { %9477 = shalt.err (!%p9474_p6)
}
 0x14b   : > { %p11593_p7 = scmp.ne.s32.totalorder %s11577_s25, 0  ;;  %s11594_s20 = scalar_lea.sflag [#allocation19], %s9766_s22 }
 0x14c   : > { %s10144_s19 = scalar_lea.hbm %s11538_s13, %s9821_s24  ;;  %s700_s14 = scalar_lea.vmem [#allocation21], %s9818_s29 }
 0x14d   : > { %8261 = dma.hbm_to_vmem [thread:$0]  (!%p11593_p7), %s10118_s23, 48, %s690_s30, %s11594_s20  }
 0x14e   : > { %s708_s5 = sshll.u32 %s700_s14, 4  ;;  %s697_s16 = scalar_lea.sflag [#allocation22], %s9759_s27  ;;  %s709_s5 = int_to_ptr.vmem [resolvable:$true] %s708_s5 }
 0x14f   : > { %s9478_s22 = scalar_lea.hbm %s10144_s19, 48  ;;  %s9483_s30 = scalar_lea.hbm %s11538_s13, 96 }
 0x150   : > { %p9479_p9 = scmp.ne.s32.totalorder %s10144_s19, %s9478_s22  ;;  %p9484_p8 = scmp.lt.u32.totalorder %s10144_s19, %s11538_s13 }
 0x151   : > { %p9485_p12 = scmp.lt.u32.totalorder %s9483_s30, %s9478_s22  ;;  %p9487_p3 = scmp.lt.u32.totalorder %s9478_s22, %s10144_s19 }
 0x152   : > { %p9481_p10 = pnand %p9479_p9, %p9792_p1 }
 0x153   : > { %p9486_p13 = por %p9485_p12, %p9484_p8 }
 0x154   : > { %p9482_p4 = pneg %p9481_p10 }
 0x155   : > { %p9488_p2 = por %p9487_p3, %p9486_p13 }
 0x157   : > { %p9489_p5 = pnand %p9488_p2, %p9482_p4 }
 0x159   : > { %9492 = shalt.err (!%p9489_p5)
}
 0x15a   : > { %s9493_s27 = scalar_lea.vmem %s709_s5, 48  ;;  %s9617_s29 = smov [#allocation21]  }
 0x15b   : > { %p9494_p0 = scmp.ne.s32.totalorder %s709_s5, %s9493_s27  ;;  %s9498_s28 = sshll.u32 %s9617_s29, 4  ;;  %s9499_s28 = int_to_ptr.vmem [resolvable:$false] %s9498_s28 }
 0x15c   : > { %s9500_s17 = scalar_lea.vmem %s9499_s28, 96  ;;  %p9501_p9 = scmp.lt.s32.totalorder %s709_s5, %s9499_s28 }
 0x15d   : > { %p9496_p11 = pnand %p9494_p0, %p9792_p1  ;;  %p9502_p10 = scmp.lt.s32.totalorder %s9500_s17, %s9493_s27 }
 0x15f   : > { %p9497_p6 = pneg %p9496_p11  ;;  %p9503_p7 = por %p9502_p10, %p9501_p9 }
 0x161   : > { %p9504_p8 = pnand %p9503_p7, %p9497_p6 }
 0x163   : > { %9507 = shalt.err (!%p9504_p8)
}
 0x164   : > { %p11595_p12 = scmp.ne.s32.totalorder %s11577_s25, 0  ;;  %s11596_s1 = sld [smem:[#allocation40_spill]] }
 0x166   : > { %8264 = dma.hbm_to_vmem [thread:$0]  (!%p11595_p12), %s10144_s19, 48, %s709_s5, %s697_s16  }
 0x16a   : > { %p11597_p4 = scmp.ne.s32.totalorder %s11596_s1, 0 }
 0x16b   : > { %s11598_s20 = sld [smem:[#allocation30_spill]] (!%p11597_p4)  ;;  %s11599_s21 = sld [smem:[#allocation39_spill]] (!%p11597_p4) }
 0x16c   : > { %717 = sbr.rel (%p11597_p4) target bundleno = 3930 (0xf5a), region = 76 }
 0x171   : > { %s10168_s0 = sand.u32 (!%p11597_p4), 1, %s11598_s20   ;;  %p11600_p1 = scmp.ne.s32.totalorder (!%p11597_p4), %s11599_s21, 0 }
 0x172   : > { %s8198_s3 = smul.u32 (!%p11597_p4), 1728, %s10168_s0  ;;  %s720_s14 = scalar_lea.sflag (!%p11597_p4), [#allocation5], %s10168_s0 }
 0x174   : > { %s10172_s22 = scalar_lea.vmem [#allocation4], %s8198_s3 }
 0x175   : > { %9541 = dma.done.wait (%p11600_p1), %s720_s14, 27648  }
 0x176   : > { %9543 = vsyncadd (%p11600_p1), %s720_s14, 4294939648  ;;  %s11601_s25 = sld [smem:[#allocation35_spill]]  ;;  %s8199_s16 = smul.u32 9, %s10168_s0 }
 0x178   : > { %s10184_s23 = scalar_lea.vmem [#allocation6], %s8199_s16 }
 0x17c   : > { %s11602_s19 = sadd.s32 4294967295, %s11601_s25  }
 0x17d   : > { %s10180_s5 = sand.u32 1, %s11602_s19  }
 0x17e   : > { %s729_s26 = scalar_lea.sflag [#allocation7], %s10180_s5 }
 0x17f   : > { %9545 = dma.done.wait (%p11600_p1), %s729_s26, 9360  }
 0x180   : > { %9547 = vsyncadd (%p11600_p1), %s729_s26, 4294957936  ;;  %s8200_s30 = smul.u32 576, %s10168_s0  ;;  %s747_s27 = scalar_lea.sflag [#allocation10], %s10180_s5 }
 0x181   : > { %s10192_s15 = smul.u32 3, %s10168_s0 }
 0x182   : > { %s10194_s24 = scalar_lea.vmem [#allocation8], %s8200_s30 }
 0x183   : > { %9549 = dma.done.wait (%p11600_p1), %s747_s27, 96  }
 0x184   : > { %9551 = vsyncadd (%p11600_p1), %s747_s27, 4294967200  ;;  %s765_s17 = scalar_lea.sflag [#allocation13], %s10180_s5 }
 0x185   : > { %9553 = dma.done.wait (%p11600_p1), %s765_s17, 12336  }
 0x186   : > { %9555 = vsyncadd (%p11600_p1), %s765_s17, 4294954960  ;;  %s8202_s20 = smul.u32 768, %s10168_s0  ;;  %s7260_s3 = sshll.u32 %s10168_s0, 2 }
 0x187   : > { %s783_s25 = scalar_lea.sflag [#allocation16], %s10180_s5  ;;  %s10214_s19 = scalar_lea.vmem [#allocation15], %s7260_s3 }
 0x188   : > { %s10211_s14 = scalar_lea.vmem [#allocation14], %s8202_s20 }
 0x189   : > { %9557 = dma.done.wait (%p11600_p1), %s783_s25, 12352  }
 0x18a   : > { %9559 = vsyncadd (%p11600_p1), %s783_s25, 4294954944  ;;  %s10220_s16 = scalar_lea.vmem [#allocation17], %s8202_s20  ;;  %s801_s26 = scalar_lea.sflag [#allocation19], %s10180_s5 }
 0x18b   : > { %9561 = dma.done.wait (%p11600_p1), %s801_s26, 96  }
 0x18c   : > { %9563 = vsyncadd (%p11600_p1), %s801_s26, 4294967200  ;;  %s819_s17 = scalar_lea.sflag [#allocation22], %s10168_s0 }
 0x18d   : > { %9565 = dma.done.wait (%p11600_p1), %s819_s17, 48  }
 0x18e   : > { %9567 = vsyncadd (%p11600_p1), %s819_s17, 4294967248  ;;  %s11603_s20 = sld [smem:[#allocation33_spill]]  ;;  %s11604_s30 = sld [smem:[#allocation42_spill]] }
 0x18f   : > { %s11605_s3 = sld [smem:[#allocation41_spill]]  ;;  %s11606_s21 = sld [smem:[#allocation47_spill]] }
 0x190   : > { %s11607_s4 = sld [smem:[#allocation32_spill]] }
 0x194   : > { %p930_p7 = scmp.lt.s32.totalorder %s11603_s20, 1 }
 0x196   : > { %s11632_s20 = smov (!%p930_p7, %s11603_s20), 1  ;;  %p7263_p13 = scmp.ne.s32.totalorder %s11607_s4, 0 }
 0x197   : > { %s8203_s5 = smul.u32 48, %s11632_s20  ;;  %s937_s1 = scalar_lea.vmem %s11604_s30, %s11632_s20 }
 0x198   : > { %947 = sbr.rel (%p7263_p13) target bundleno = 415 (0x19f), region = 128 }
 0x199   : > { %s934_s28 = scalar_lea.vmem %s11605_s3, %s8203_s5  ;;  %s10250_s17 = scalar_lea.vmem %s11606_s21, %s8203_s5 }
 0x19a   : > { %v948_v0 = vld [vmem:[%s934_s28] sm:$0xff] (!%p7263_p13)  ;;  %v949_v1 = vld [vmem:[%s934_s28 + $0x8] sm:$0xff] (!%p7263_p13)  ;;  %v950_v2 = vld [vmem:[%s934_s28 + $0x10] sm:$0xff] (!%p7263_p13) }
 0x19b   : > { %954 = vst [vmem:[#allocation2] sm:$0xff] (!%p7263_p13), %v948_v0  ;;  %955 = vst [vmem:[#allocation2 + $0x8] sm:$0xff] (!%p7263_p13), %v949_v1  ;;  %v951_v3 = vld [vmem:[%s934_s28 + $0x18] sm:$0xff] (!%p7263_p13)  ;;  %v952_v4 = vld [vmem:[%s934_s28 + $0x20] sm:$0xff] (!%p7263_p13) }
 0x19c   : > { %956 = vst [vmem:[#allocation2 + $0x10] sm:$0xff] (!%p7263_p13), %v950_v2  ;;  %v953_v5 = vld [vmem:[%s934_s28 + $0x28] sm:$0xff] (!%p7263_p13)  ;;  %957 = vst [vmem:[#allocation2 + $0x18] sm:$0xff] (!%p7263_p13), %v951_v3 }
 0x19d   : > { %958 = vst [vmem:[#allocation2 + $0x20] sm:$0xff] (!%p7263_p13), %v952_v4  ;;  %959 = vst [vmem:[#allocation2 + $0x28] sm:$0xff] (!%p7263_p13), %v953_v5 }
 0x19f PF: > { %v8342_v6 = vld [vmem:[%s10172_s22 + $0x4] ss:$36 sps:$4 sm:$0xff]   ;;  %v8344_v7 = vld [vmem:[%s10172_s22 + $0xc] ss:$36 sps:$4 sm:$0xff]   ;;  %v8350_v11 = vld [vmem:[%s10172_s22 + $0x54] ss:$36 sps:$4 sm:$0xff]  }
 0x1a0   : > { %2363 = vmatprep.subr.bf16.mxu0 %v8342_v6  ;;  %v8346_v8 = vld [vmem:[%s10172_s22] ss:$36 sps:$4 sm:$0xff]   ;;  %v8347_v9 = vld [vmem:[%s10172_s22 + $0x8] ss:$36 sps:$4 sm:$0xff]   ;;  %2449 = vmatprep.subr.bf16.mxu1 %v8344_v7  ;;  %v8353_v13 = vld [vmem:[%s10172_s22 + $0x50] ss:$36 sps:$4 sm:$0xff]  }
 0x1a1   : > { %v8348_v10 = vld [vmem:[%s10172_s22 + $0x4c] ss:$36 sps:$4 sm:$0xff]   ;;  %2364 = vmatpush1.bf16.msra.mxu0 %v8346_v8  ;;  %2450 = vmatpush1.bf16.msra.mxu1 %v8347_v9  ;;  %v8354_v14 = vld [vmem:[%s10172_s22 + $0x94] ss:$36 sps:$4 sm:$0xff]   ;;  %v8356_v15 = vld [vmem:[%s10172_s22 + $0x9c] ss:$36 sps:$4 sm:$0xff]  }
 0x1a2   : > { %v8352_v12 = vld [vmem:[%s10172_s22 + $0x48] ss:$36 sps:$4 sm:$0xff]   ;;  %2365 = vmatprep.subr.bf16.mxu0 %v8348_v10  ;;  %2451 = vmatprep.subr.bf16.mxu1 %v8350_v11  ;;  %v8358_v16 = vld [vmem:[%s10172_s22 + $0x90] ss:$36 sps:$4 sm:$0xff]   ;;  %v8359_v17 = vld [vmem:[%s10172_s22 + $0x98] ss:$36 sps:$4 sm:$0xff]  }
 0x1a3   : > { %v8360_v18 = vld [vmem:[%s10172_s22 + $0xdc] ss:$36 sps:$4 sm:$0xff]   ;;  %v8362_v19 = vld [vmem:[%s10172_s22 + $0xe4] ss:$36 sps:$4 sm:$0xff]   ;;  %v8368_v23 = vld [vmem:[%s10172_s22 + $0x12c] ss:$36 sps:$4 sm:$0xff]  }
 0x1a4   : > { %v8364_v20 = vld [vmem:[%s10172_s22 + $0xd8] ss:$36 sps:$4 sm:$0xff]   ;;  %v8365_v21 = vld [vmem:[%s10172_s22 + $0xe0] ss:$36 sps:$4 sm:$0xff]   ;;  %v8371_v25 = vld [vmem:[%s10172_s22 + $0x128] ss:$36 sps:$4 sm:$0xff]  }
 0x1a5   : > { %2366 = vmatpush1.bf16.msra.mxu0 %v8352_v12  ;;  %2452 = vmatpush1.bf16.msra.mxu1 %v8353_v13  ;;  %v8366_v22 = vld [vmem:[%s10172_s22 + $0x124] ss:$36 sps:$4 sm:$0xff]   ;;  %v8372_v26 = vld [vmem:[%s10172_s22 + $0x16c] ss:$36 sps:$4 sm:$0xff]   ;;  %v8374_v27 = vld [vmem:[%s10172_s22 + $0x174] ss:$36 sps:$4 sm:$0xff]  }
 0x1a6   : > { %2367 = vmatprep.subr.bf16.mxu0 %v8354_v14  ;;  %2453 = vmatprep.subr.bf16.mxu1 %v8356_v15  ;;  %v8370_v24 = vld [vmem:[%s10172_s22 + $0x120] ss:$36 sps:$4 sm:$0xff]   ;;  %v8376_v28 = vld [vmem:[%s10172_s22 + $0x168] ss:$36 sps:$4 sm:$0xff]   ;;  %v8377_v29 = vld [vmem:[%s10172_s22 + $0x170] ss:$36 sps:$4 sm:$0xff]  }
 0x1a7   : > { %v8378_v30 = vld [vmem:[%s10172_s22 + $0x1b4] ss:$36 sps:$4 sm:$0xff]   ;;  %v8380_v31 = vld [vmem:[%s10172_s22 + $0x1bc] ss:$36 sps:$4 sm:$0xff]   ;;  %v8386_v35 = vld [vmem:[%s10172_s22 + $0x204] ss:$36 sps:$4 sm:$0xff]  }
 0x1a8   : > { %v8382_v32 = vld [vmem:[%s10172_s22 + $0x1b0] ss:$36 sps:$4 sm:$0xff]   ;;  %v8383_v33 = vld [vmem:[%s10172_s22 + $0x1b8] ss:$36 sps:$4 sm:$0xff]   ;;  %v8389_v37 = vld [vmem:[%s10172_s22 + $0x200] ss:$36 sps:$4 sm:$0xff]  }
 0x1a9   : > { %2368 = vmatpush1.bf16.msra.mxu0 %v8358_v16  ;;  %2454 = vmatpush1.bf16.msra.mxu1 %v8359_v17  ;;  %v8384_v34 = vld [vmem:[%s10172_s22 + $0x1fc] ss:$36 sps:$4 sm:$0xff]   ;;  %v8390_v38 = vld [vmem:[%s10172_s22 + $0x244] ss:$36 sps:$4 sm:$0xff]   ;;  %v8392_v39 = vld [vmem:[%s10172_s22 + $0x24c] ss:$36 sps:$4 sm:$0xff]  }
 0x1aa   : > { %2369 = vmatprep.subr.bf16.mxu0 %v8360_v18  ;;  %2455 = vmatprep.subr.bf16.mxu1 %v8362_v19  ;;  %v8388_v36 = vld [vmem:[%s10172_s22 + $0x1f8] ss:$36 sps:$4 sm:$0xff]   ;;  %v8394_v40 = vld [vmem:[%s10172_s22 + $0x240] ss:$36 sps:$4 sm:$0xff]   ;;  %v8395_v41 = vld [vmem:[%s10172_s22 + $0x248] ss:$36 sps:$4 sm:$0xff]  }
 0x1ab   : > { %v8396_v42 = vld [vmem:[%s10172_s22 + $0x28c] ss:$36 sps:$4 sm:$0xff]   ;;  %v8398_v43 = vld [vmem:[%s10172_s22 + $0x294] ss:$36 sps:$4 sm:$0xff]   ;;  %v8404_v47 = vld [vmem:[%s10172_s22 + $0x2dc] ss:$36 sps:$4 sm:$0xff]  }
 0x1ac   : > { %v8400_v44 = vld [vmem:[%s10172_s22 + $0x288] ss:$36 sps:$4 sm:$0xff]   ;;  %v8401_v45 = vld [vmem:[%s10172_s22 + $0x290] ss:$36 sps:$4 sm:$0xff]   ;;  %v8407_v49 = vld [vmem:[%s10172_s22 + $0x2d8] ss:$36 sps:$4 sm:$0xff]  }
 0x1ad   : > { %2370 = vmatpush1.bf16.msra.mxu0 %v8364_v20  ;;  %2456 = vmatpush1.bf16.msra.mxu1 %v8365_v21  ;;  %v8402_v46 = vld [vmem:[%s10172_s22 + $0x2d4] ss:$36 sps:$4 sm:$0xff]   ;;  %v8408_v50 = vld [vmem:[%s10172_s22 + $0x31c] ss:$36 sps:$4 sm:$0xff]   ;;  %v8410_v51 = vld [vmem:[%s10172_s22 + $0x324] ss:$36 sps:$4 sm:$0xff]  }
 0x1ae   : > { %2371 = vmatprep.subr.bf16.mxu0 %v8366_v22  ;;  %2457 = vmatprep.subr.bf16.mxu1 %v8368_v23  ;;  %v8406_v48 = vld [vmem:[%s10172_s22 + $0x2d0] ss:$36 sps:$4 sm:$0xff]   ;;  %v961_v52 = vld [vmem:[#allocation2 + $0x8] sm:$0xff]  ;;  %v964_v53 = vld [vmem:[#allocation2 + $0x20] sm:$0xff]  ;;  %v9618_v22 = vmov 0   ;;  %vm9620_vm0 = vmmov 0  }
 0x1af   : > { %v8412_v54 = vld [vmem:[%s10172_s22 + $0x318] ss:$36 sps:$4 sm:$0xff]   ;;  %v8413_v55 = vld [vmem:[%s10172_s22 + $0x320] ss:$36 sps:$4 sm:$0xff]   ;;  %v10301_v56 = vpack.c.bf16 %v964_v53, %v961_v52  ;;  %v8416_v58 = vld [vmem:[%s10172_s22 + $0x36c] ss:$36 sps:$4 sm:$0xff]  }
 0x1b0   : > { %v8414_v57 = vld [vmem:[%s10172_s22 + $0x364] ss:$36 sps:$4 sm:$0xff]   ;;  %v8420_v61 = vld [vmem:[%s10172_s22 + $0x3ac] ss:$36 sps:$4 sm:$0xff]   ;;  %v8422_v62 = vld [vmem:[%s10172_s22 + $0x3b4] ss:$36 sps:$4 sm:$0xff]  }
 0x1b1   : > { %2372 = vmatpush1.bf16.msra.mxu0 %v8370_v24  ;;  %2458 = vmatpush1.bf16.msra.mxu1 %v8371_v25  ;;  %v8418_v59 = vld [vmem:[%s10172_s22 + $0x360] ss:$36 sps:$4 sm:$0xff]   ;;  %v8419_v60 = vld [vmem:[%s10172_s22 + $0x368] ss:$36 sps:$4 sm:$0xff]   ;;  %v8425_v0 = vld [vmem:[%s10172_s22 + $0x3b0] ss:$36 sps:$4 sm:$0xff]  }
 0x1b2   : > { %2373 = vmatprep.subr.bf16.mxu0 %v8372_v26  ;;  %2459 = vmatprep.subr.bf16.mxu1 %v8374_v27  ;;  %v8424_v63 = vld [vmem:[%s10172_s22 + $0x3a8] ss:$36 sps:$4 sm:$0xff]   ;;  %v8426_v1 = vld [vmem:[%s10172_s22 + $0x3f4] ss:$36 sps:$4 sm:$0xff]   ;;  %v8428_v2 = vld [vmem:[%s10172_s22 + $0x3fc] ss:$36 sps:$4 sm:$0xff]  }
 0x1b3   : > { %2395 = vmatprep.mubr.bf16.mxu0 %v10301_v56  ;;  %2481 = vmatprep.mubr.bf16.mxu1 %v10301_v56  ;;  %v8430_v3 = vld [vmem:[%s10172_s22 + $0x3f0] ss:$36 sps:$4 sm:$0xff]   ;;  %v8431_v4 = vld [vmem:[%s10172_s22 + $0x3f8] ss:$36 sps:$4 sm:$0xff]   ;;  %v8434_v6 = vld [vmem:[%s10172_s22 + $0x444] ss:$36 sps:$4 sm:$0xff]  }
 0x1b4   : > { %v8432_v5 = vld [vmem:[%s10172_s22 + $0x43c] ss:$36 sps:$4 sm:$0xff]   ;;  %v8440_v9 = vld [vmem:[%s10172_s22 + $0x484] ss:$36 sps:$4 sm:$0xff]   ;;  %v8443_v12 = vld [vmem:[%s10172_s22 + $0x48c] ss:$36 sps:$4 sm:$0xff]  }
 0x1b5   : > { %2374 = vmatpush1.bf16.msra.mxu0 %v8376_v28  ;;  %2460 = vmatpush1.bf16.msra.mxu1 %v8377_v29  ;;  %v8436_v7 = vld [vmem:[%s10172_s22 + $0x438] ss:$36 sps:$4 sm:$0xff]   ;;  %v8437_v8 = vld [vmem:[%s10172_s22 + $0x440] ss:$36 sps:$4 sm:$0xff]   ;;  %v8441_v15 = vld [vmem:[%s10172_s22 + $0x488] ss:$36 sps:$4 sm:$0xff]  }
 0x1b6   : > { %2375 = vmatprep.subr.bf16.mxu0 %v8378_v30  ;;  %2461 = vmatprep.subr.bf16.mxu1 %v8380_v31  ;;  %v960_v10 = vld [vmem:[#allocation2] sm:$0xff]  ;;  %v963_v11 = vld [vmem:[#allocation2 + $0x18] sm:$0xff]  ;;  %v8446_v16 = vld [vmem:[%s10172_s22 + $0x4cc] ss:$36 sps:$4 sm:$0xff]   ;;  %vm2810_vm1 = vcmask 261120   ;;  %s9621_s2 = smov 96  }
 0x1b7   : > { %v8438_v13 = vld [vmem:[%s10172_s22 + $0x480] ss:$36 sps:$4 sm:$0xff]   ;;  %v10324_v14 = vpack.c.bf16 %v963_v11, %v960_v10  ;;  %v8449_v17 = vld [vmem:[%s10172_s22 + $0x4d4] ss:$36 sps:$4 sm:$0xff]   ;;  %v8444_v18 = vld [vmem:[%s10172_s22 + $0x4c8] ss:$36 sps:$4 sm:$0xff]  }
 0x1b8   : > { %v8447_v19 = vld [vmem:[%s10172_s22 + $0x4d0] ss:$36 sps:$4 sm:$0xff]   ;;  %v8455_v21 = vld [vmem:[%s10172_s22 + $0x51c] ss:$36 sps:$4 sm:$0xff]   ;;  %v8461_v26 = vld [vmem:[%s10172_s22 + $0x564] ss:$36 sps:$4 sm:$0xff]  }
 0x1b9   : > { %2376 = vmatpush1.bf16.msra.mxu0 %v8382_v32  ;;  %2462 = vmatpush1.bf16.msra.mxu1 %v8383_v33  ;;  %v8452_v20 = vld [vmem:[%s10172_s22 + $0x514] ss:$36 sps:$4 sm:$0xff]   ;;  %v8458_v25 = vld [vmem:[%s10172_s22 + $0x55c] ss:$36 sps:$4 sm:$0xff]   ;;  %v8464_v29 = vld [vmem:[%s10172_s22 + $0x5a4] ss:$36 sps:$4 sm:$0xff]  }
 0x1ba   : > { %2377 = vmatprep.subr.bf16.mxu0 %v8384_v34  ;;  %2463 = vmatprep.subr.bf16.mxu1 %v8386_v35  ;;  %v8450_v23 = vld [vmem:[%s10172_s22 + $0x510] ss:$36 sps:$4 sm:$0xff]   ;;  %v8453_v24 = vld [vmem:[%s10172_s22 + $0x518] ss:$36 sps:$4 sm:$0xff]   ;;  %v8459_v28 = vld [vmem:[%s10172_s22 + $0x560] ss:$36 sps:$4 sm:$0xff]  }
 0x1bb   : > { %v8456_v27 = vld [vmem:[%s10172_s22 + $0x558] ss:$36 sps:$4 sm:$0xff]   ;;  %v8467_v30 = vld [vmem:[%s10172_s22 + $0x5ac] ss:$36 sps:$4 sm:$0xff]   ;;  %v8462_v31 = vld [vmem:[%s10172_s22 + $0x5a0] ss:$36 sps:$4 sm:$0xff]  }
 0x1bc   : > { %v8465_v32 = vld [vmem:[%s10172_s22 + $0x5a8] ss:$36 sps:$4 sm:$0xff]   ;;  %v8473_v34 = vld [vmem:[%s10172_s22 + $0x5f4] ss:$36 sps:$4 sm:$0xff]   ;;  %v8491_v52 = vld [vmem:[%s10172_s22 + $0x5c] ss:$36 sps:$4 sm:$0xff]  }
 0x1bd   : > { %2378 = vmatpush1.bf16.msra.mxu0 %v8388_v36  ;;  %2464 = vmatpush1.bf16.msra.mxu1 %v8389_v37  ;;  %v8470_v33 = vld [vmem:[%s10172_s22 + $0x5ec] ss:$36 sps:$4 sm:$0xff]   ;;  %v8476_v37 = vld [vmem:[%s10172_s22 + $0x634] ss:$36 sps:$4 sm:$0xff]   ;;  %v8527_v53 = vld [vmem:[%s10172_s22 + $0x64] ss:$36 sps:$4 sm:$0xff]  }
 0x1be   : > { %2379 = vmatprep.subr.bf16.mxu0 %v8390_v38  ;;  %2465 = vmatprep.subr.bf16.mxu1 %v8392_v39  ;;  %v8468_v35 = vld [vmem:[%s10172_s22 + $0x5e8] ss:$36 sps:$4 sm:$0xff]   ;;  %v8471_v36 = vld [vmem:[%s10172_s22 + $0x5f0] ss:$36 sps:$4 sm:$0xff]   ;;  %v8479_v38 = vld [vmem:[%s10172_s22 + $0x63c] ss:$36 sps:$4 sm:$0xff]  }
 0x1bf   : > { %v8474_v39 = vld [vmem:[%s10172_s22 + $0x630] ss:$36 sps:$4 sm:$0xff]   ;;  %v8504_v11 = vld [vmem:[%s10172_s22 + $0x1c0] ss:$36 sps:$4 sm:$0xff]   ;;  %vm2858_vm2 = vcmask 130048   ;;  %s9623_s28 = smov 64  }
 0x1c0   : > { %v8557_v10 = vld [vmem:[%s10172_s22 + $0x1cc] ss:$36 sps:$4 sm:$0xff]   ;;  %vm3060_vm3 = vcmask 523520   ;;  %vm3192_vm4 = vcmask 785920   ;;  %vm3324_vm5 = vcmask 1048320   ;;  %s11611_s30 = scalar_lea.vmem [#allocation12], %s10192_s15 }
 0x1c1   : > { %2380 = vmatpush1.bf16.msra.mxu0 %v8394_v40  ;;  %2466 = vmatpush1.bf16.msra.mxu1 %v8395_v41  ;;  %v8477_v40 = vld [vmem:[%s10172_s22 + $0x638] ss:$36 sps:$4 sm:$0xff]  }
 0x1c2   : > { %2381 = vmatprep.subr.bf16.mxu0 %v8396_v42  ;;  %2467 = vmatprep.subr.bf16.mxu1 %v8398_v43  ;;  %v8482_v41 = vld [vmem:[%s10172_s22 + $0x67c] ss:$36 sps:$4 sm:$0xff]   ;;  %v8485_v42 = vld [vmem:[%s10172_s22 + $0x684] ss:$36 sps:$4 sm:$0xff]  }
 0x1c3   : > { %v8480_v43 = vld [vmem:[%s10172_s22 + $0x678] ss:$36 sps:$4 sm:$0xff]  }
 0x1c5   : > { %2382 = vmatpush1.bf16.msra.mxu0 %v8400_v44  ;;  %2468 = vmatpush1.bf16.msra.mxu1 %v8401_v45  ;;  %v8483_v44 = vld [vmem:[%s10172_s22 + $0x680] ss:$36 sps:$4 sm:$0xff]   ;;  %v962_v45 = vld [vmem:[#allocation2 + $0x10] sm:$0xff] }
 0x1c6   : > { %2383 = vmatprep.subr.bf16.mxu0 %v8402_v46  ;;  %2469 = vmatprep.subr.bf16.mxu1 %v8404_v47  ;;  %v965_v46 = vld [vmem:[#allocation2 + $0x28] sm:$0xff]  ;;  %v8488_v47 = vld [vmem:[%s10172_s22 + $0x14] ss:$36 sps:$4 sm:$0xff]  }
 0x1c9   : > { %2384 = vmatpush1.bf16.msra.mxu0 %v8406_v48  ;;  %2470 = vmatpush1.bf16.msra.mxu1 %v8407_v49  ;;  %v8521_v48 = vld [vmem:[%s10172_s22 + $0x1c] ss:$36 sps:$4 sm:$0xff]   ;;  %v10361_v49 = vpack.c.bf16 %v965_v46, %v962_v45  ;;  %v8600_v46 = vld [vmem:[%s10172_s22 + $0x408] ss:$36 sps:$4 sm:$0xff]  }
 0x1ca   : > { %2385 = vmatprep.subr.bf16.mxu0 %v8408_v50  ;;  %2471 = vmatprep.subr.bf16.mxu1 %v8410_v51  ;;  %v8486_v50 = vld [vmem:[%s10172_s22 + $0x10] ss:$36 sps:$4 sm:$0xff]   ;;  %v8519_v51 = vld [vmem:[%s10172_s22 + $0x18] ss:$36 sps:$4 sm:$0xff]   ;;  %v8540_v45 = vld [vmem:[%s10172_s22 + $0x400] ss:$36 sps:$4 sm:$0xff]  }
 0x1cd   : > { %2386 = vmatpush1.bf16.msra.mxu0 %v8412_v54  ;;  %2472 = vmatpush1.bf16.msra.mxu1 %v8413_v55  ;;  %v8489_v54 = vld [vmem:[%s10172_s22 + $0x58] ss:$36 sps:$4 sm:$0xff]   ;;  %v8525_v55 = vld [vmem:[%s10172_s22 + $0x60] ss:$36 sps:$4 sm:$0xff]  }
 0x1ce   : > { %2387 = vmatprep.subr.bf16.mxu0 %v8414_v57  ;;  %2473 = vmatprep.subr.bf16.mxu1 %v8416_v58  ;;  %v8494_v57 = vld [vmem:[%s10172_s22 + $0xa4] ss:$36 sps:$4 sm:$0xff]   ;;  %v8533_v58 = vld [vmem:[%s10172_s22 + $0xac] ss:$36 sps:$4 sm:$0xff]  }
 0x1d1   : > { %2388 = vmatpush1.bf16.msra.mxu0 %v8418_v59  ;;  %2474 = vmatpush1.bf16.msra.mxu1 %v8419_v60  ;;  %v8492_v59 = vld [vmem:[%s10172_s22 + $0xa0] ss:$36 sps:$4 sm:$0xff]   ;;  %v8531_v60 = vld [vmem:[%s10172_s22 + $0xa8] ss:$36 sps:$4 sm:$0xff]  }
 0x1d2   : > { %2389 = vmatprep.subr.bf16.mxu0 %v8420_v61  ;;  %2475 = vmatprep.subr.bf16.mxu1 %v8422_v62  ;;  %v8497_v61 = vld [vmem:[%s10172_s22 + $0xec] ss:$36 sps:$4 sm:$0xff]   ;;  %v8539_v62 = vld [vmem:[%s10172_s22 + $0xf4] ss:$36 sps:$4 sm:$0xff]  }
 0x1d5   : > { %2390 = vmatpush1.bf16.msra.mxu0 %v8424_v63  ;;  %2476 = vmatpush1.bf16.msra.mxu1 %v8425_v0  ;;  %v8495_v63 = vld [vmem:[%s10172_s22 + $0xe8] ss:$36 sps:$4 sm:$0xff]   ;;  %v8537_v0 = vld [vmem:[%s10172_s22 + $0xf0] ss:$36 sps:$4 sm:$0xff]  }
 0x1d6   : > { %2391 = vmatprep.subr.bf16.mxu0 %v8426_v1  ;;  %2477 = vmatprep.subr.bf16.mxu1 %v8428_v2  ;;  %v8500_v1 = vld [vmem:[%s10172_s22 + $0x134] ss:$36 sps:$4 sm:$0xff]   ;;  %v8545_v2 = vld [vmem:[%s10172_s22 + $0x13c] ss:$36 sps:$4 sm:$0xff]  }
 0x1d9   : > { %2392 = vmatpush1.bf16.msra.mxu0 %v8430_v3  ;;  %2478 = vmatpush1.bf16.msra.mxu1 %v8431_v4  ;;  %v8498_v3 = vld [vmem:[%s10172_s22 + $0x130] ss:$36 sps:$4 sm:$0xff]   ;;  %v8543_v4 = vld [vmem:[%s10172_s22 + $0x138] ss:$36 sps:$4 sm:$0xff]  }
 0x1da   : > { %2393 = vmatprep.subr.bf16.mxu0 %v8432_v5  ;;  %2479 = vmatprep.subr.bf16.mxu1 %v8434_v6  ;;  %v8503_v5 = vld [vmem:[%s10172_s22 + $0x17c] ss:$36 sps:$4 sm:$0xff]   ;;  %v8551_v6 = vld [vmem:[%s10172_s22 + $0x184] ss:$36 sps:$4 sm:$0xff]  }
 0x1dd   : > { %2394 = vmatpush1.bf16.msra.mxu0 %v8436_v7  ;;  %2480 = vmatpush1.bf16.msra.mxu1 %v8437_v8  ;;  %v8501_v7 = vld [vmem:[%s10172_s22 + $0x178] ss:$36 sps:$4 sm:$0xff]   ;;  %v8549_v8 = vld [vmem:[%s10172_s22 + $0x180] ss:$36 sps:$4 sm:$0xff]  }
 0x1de   : > { %2406 = vmatprep.subr.bf16.mxu0 %v8440_v9  ;;  %2492 = vmatprep.subr.bf16.mxu1 %v8443_v12  ;;  %v8506_v9 = vld [vmem:[%s10172_s22 + $0x1c4] ss:$36 sps:$4 sm:$0xff]  }
 0x1df   : > { %v8555_v12 = vld [vmem:[%s10172_s22 + $0x1c8] ss:$36 sps:$4 sm:$0xff]  }
 0x1e0   : > { %2396 = vmatmul.mubr.bf16.vlgmr.msra.gmra.mrb[0].mxu0 %v10324_v14  ;;  %2482 = vmatmul.mubr.bf16.vlgmr.msra.gmra.mrb[0].mxu1 %v10324_v14 }
 0x1e1   : > { %2407 = vmatpush1.bf16.msra.mxu0 %v8438_v13  ;;  %2493 = vmatpush1.bf16.msra.mxu1 %v8441_v15  ;;  %v8509_v13 = vld [vmem:[%s10172_s22 + $0x20c] ss:$36 sps:$4 sm:$0xff]   ;;  %v8563_v15 = vld [vmem:[%s10172_s22 + $0x214] ss:$36 sps:$4 sm:$0xff]  }
 0x1e2   : > { %2408 = vmatprep.subr.bf16.mxu0 %v8446_v16  ;;  %2494 = vmatprep.subr.bf16.mxu1 %v8449_v17  ;;  %v8507_v16 = vld [vmem:[%s10172_s22 + $0x208] ss:$36 sps:$4 sm:$0xff]   ;;  %v8561_v17 = vld [vmem:[%s10172_s22 + $0x210] ss:$36 sps:$4 sm:$0xff]  }
 0x1e3   : > { %2438 = vmatprep.mubr.bf16.mxu0 %v9618_v22  ;;  %2524 = vmatprep.mubr.bf16.mxu1 %v9618_v22 }
 0x1e5   : > { %2409 = vmatpush1.bf16.msra.mxu0 %v8444_v18  ;;  %2495 = vmatpush1.bf16.msra.mxu1 %v8447_v19  ;;  %v8512_v18 = vld [vmem:[%s10172_s22 + $0x254] ss:$36 sps:$4 sm:$0xff]   ;;  %v8569_v19 = vld [vmem:[%s10172_s22 + $0x25c] ss:$36 sps:$4 sm:$0xff]  }
 0x1e6   : > { %2410 = vmatprep.subr.bf16.mxu0 %v8452_v20  ;;  %2496 = vmatprep.subr.bf16.mxu1 %v8455_v21  ;;  %v8510_v20 = vld [vmem:[%s10172_s22 + $0x250] ss:$36 sps:$4 sm:$0xff]   ;;  %v8515_v21 = vld [vmem:[%s10172_s22 + $0x29c] ss:$36 sps:$4 sm:$0xff]  }
 0x1e9   : > { %2411 = vmatpush1.bf16.msra.mxu0 %v8450_v23  ;;  %2497 = vmatpush1.bf16.msra.mxu1 %v8453_v24  ;;  %v8567_v23 = vld [vmem:[%s10172_s22 + $0x258] ss:$36 sps:$4 sm:$0xff]   ;;  %v8575_v24 = vld [vmem:[%s10172_s22 + $0x2a4] ss:$36 sps:$4 sm:$0xff]  }
 0x1ea   : > { %2412 = vmatprep.subr.bf16.mxu0 %v8458_v25  ;;  %2498 = vmatprep.subr.bf16.mxu1 %v8461_v26  ;;  %v8513_v25 = vld [vmem:[%s10172_s22 + $0x298] ss:$36 sps:$4 sm:$0xff]   ;;  %v8518_v26 = vld [vmem:[%s10172_s22 + $0x2e4] ss:$36 sps:$4 sm:$0xff]  }
 0x1ed   : > { %2413 = vmatpush1.bf16.msra.mxu0 %v8456_v27  ;;  %2499 = vmatpush1.bf16.msra.mxu1 %v8459_v28  ;;  %v8573_v27 = vld [vmem:[%s10172_s22 + $0x2a0] ss:$36 sps:$4 sm:$0xff]   ;;  %v8581_v28 = vld [vmem:[%s10172_s22 + $0x2ec] ss:$36 sps:$4 sm:$0xff]  }
 0x1ee   : > { %2414 = vmatprep.subr.bf16.mxu0 %v8464_v29  ;;  %2500 = vmatprep.subr.bf16.mxu1 %v8467_v30  ;;  %v8516_v29 = vld [vmem:[%s10172_s22 + $0x2e0] ss:$36 sps:$4 sm:$0xff]   ;;  %v8524_v30 = vld [vmem:[%s10172_s22 + $0x32c] ss:$36 sps:$4 sm:$0xff]  }
 0x1f1   : > { %2415 = vmatpush1.bf16.msra.mxu0 %v8462_v31  ;;  %2501 = vmatpush1.bf16.msra.mxu1 %v8465_v32  ;;  %v8579_v31 = vld [vmem:[%s10172_s22 + $0x2e8] ss:$36 sps:$4 sm:$0xff]   ;;  %v8587_v32 = vld [vmem:[%s10172_s22 + $0x334] ss:$36 sps:$4 sm:$0xff]  }
 0x1f2   : > { %2416 = vmatprep.subr.bf16.mxu0 %v8470_v33  ;;  %2502 = vmatprep.subr.bf16.mxu1 %v8473_v34  ;;  %v8522_v33 = vld [vmem:[%s10172_s22 + $0x328] ss:$36 sps:$4 sm:$0xff]   ;;  %v8530_v34 = vld [vmem:[%s10172_s22 + $0x374] ss:$36 sps:$4 sm:$0xff]  }
 0x1f5   : > { %2417 = vmatpush1.bf16.msra.mxu0 %v8468_v35  ;;  %2503 = vmatpush1.bf16.msra.mxu1 %v8471_v36  ;;  %v8585_v35 = vld [vmem:[%s10172_s22 + $0x330] ss:$36 sps:$4 sm:$0xff]   ;;  %v8593_v36 = vld [vmem:[%s10172_s22 + $0x37c] ss:$36 sps:$4 sm:$0xff]  }
 0x1f6   : > { %2418 = vmatprep.subr.bf16.mxu0 %v8476_v37  ;;  %2504 = vmatprep.subr.bf16.mxu1 %v8479_v38  ;;  %v8528_v37 = vld [vmem:[%s10172_s22 + $0x370] ss:$36 sps:$4 sm:$0xff]   ;;  %v8536_v38 = vld [vmem:[%s10172_s22 + $0x3bc] ss:$36 sps:$4 sm:$0xff]  }
 0x1f9   : > { %2419 = vmatpush1.bf16.msra.mxu0 %v8474_v39  ;;  %2505 = vmatpush1.bf16.msra.mxu1 %v8477_v40  ;;  %v8591_v39 = vld [vmem:[%s10172_s22 + $0x378] ss:$36 sps:$4 sm:$0xff]   ;;  %v8599_v40 = vld [vmem:[%s10172_s22 + $0x3c4] ss:$36 sps:$4 sm:$0xff]  }
 0x1fa   : > { %2420 = vmatprep.subr.bf16.mxu0 %v8482_v41  ;;  %2506 = vmatprep.subr.bf16.mxu1 %v8485_v42  ;;  %v8534_v41 = vld [vmem:[%s10172_s22 + $0x3b8] ss:$36 sps:$4 sm:$0xff]   ;;  %v8542_v42 = vld [vmem:[%s10172_s22 + $0x404] ss:$36 sps:$4 sm:$0xff]  }
 0x1fd   : > { %2421 = vmatpush1.bf16.msra.mxu0 %v8480_v43  ;;  %2507 = vmatpush1.bf16.msra.mxu1 %v8483_v44  ;;  %v8597_v43 = vld [vmem:[%s10172_s22 + $0x3c0] ss:$36 sps:$4 sm:$0xff]   ;;  %v8602_v44 = vld [vmem:[%s10172_s22 + $0x40c] ss:$36 sps:$4 sm:$0xff]  }
 0x1fe   : > { %2535 = vmatprep.subr.bf16.mxu0 %v8488_v47  ;;  %2621 = vmatprep.subr.bf16.mxu1 %v8521_v48  ;;  %v8548_v47 = vld [vmem:[%s10172_s22 + $0x44c] ss:$36 sps:$4 sm:$0xff]   ;;  %v8605_v48 = vld [vmem:[%s10172_s22 + $0x454] ss:$36 sps:$4 sm:$0xff]  }
 0x200   : > { %2439 = vmatmul.mubr.bf16.vlgmr.msra.gmra.mrb[0].mxu0 %v10361_v49  ;;  %2525 = vmatmul.mubr.bf16.vlgmr.msra.gmra.mrb[0].mxu1 %v10361_v49 }
 0x201   : > { %2536 = vmatpush1.bf16.msra.mxu0 %v8486_v50  ;;  %2622 = vmatpush1.bf16.msra.mxu1 %v8519_v51  ;;  %v8546_v50 = vld [vmem:[%s10172_s22 + $0x448] ss:$36 sps:$4 sm:$0xff]   ;;  %v8603_v51 = vld [vmem:[%s10172_s22 + $0x450] ss:$36 sps:$4 sm:$0xff]  }
 0x202   : > { %2537 = vmatprep.subr.bf16.mxu0 %v8491_v52  ;;  %2623 = vmatprep.subr.bf16.mxu1 %v8527_v53  ;;  %v8554_v52 = vld [vmem:[%s10172_s22 + $0x494] ss:$36 sps:$4 sm:$0xff]   ;;  %v8608_v53 = vld [vmem:[%s10172_s22 + $0x49c] ss:$36 sps:$4 sm:$0xff]  }
 0x203   : > { %2567 = vmatprep.mubr.bf16.mxu0 %v10301_v56  ;;  %2653 = vmatprep.mubr.bf16.mxu1 %v10301_v56 }
 0x205   : > { %2538 = vmatpush1.bf16.msra.mxu0 %v8489_v54  ;;  %2624 = vmatpush1.bf16.msra.mxu1 %v8525_v55  ;;  %v8552_v54 = vld [vmem:[%s10172_s22 + $0x490] ss:$36 sps:$4 sm:$0xff]   ;;  %v8560_v55 = vld [vmem:[%s10172_s22 + $0x4dc] ss:$36 sps:$4 sm:$0xff]  }
 0x206   : > { %2539 = vmatprep.subr.bf16.mxu0 %v8494_v57  ;;  %2625 = vmatprep.subr.bf16.mxu1 %v8533_v58  ;;  %v8606_v57 = vld [vmem:[%s10172_s22 + $0x498] ss:$36 sps:$4 sm:$0xff]   ;;  %v8611_v58 = vld [vmem:[%s10172_s22 + $0x4e4] ss:$36 sps:$4 sm:$0xff]  }
 0x209   : > { %2540 = vmatpush1.bf16.msra.mxu0 %v8492_v59  ;;  %2626 = vmatpush1.bf16.msra.mxu1 %v8531_v60  ;;  %v8558_v59 = vld [vmem:[%s10172_s22 + $0x4d8] ss:$36 sps:$4 sm:$0xff]   ;;  %v8566_v60 = vld [vmem:[%s10172_s22 + $0x524] ss:$36 sps:$4 sm:$0xff]  }
 0x20a   : > { %2541 = vmatprep.subr.bf16.mxu0 %v8497_v61  ;;  %2627 = vmatprep.subr.bf16.mxu1 %v8539_v62  ;;  %v8609_v61 = vld [vmem:[%s10172_s22 + $0x4e0] ss:$36 sps:$4 sm:$0xff]   ;;  %v8614_v62 = vld [vmem:[%s10172_s22 + $0x52c] ss:$36 sps:$4 sm:$0xff]  }
 0x20d   : > { %2542 = vmatpush1.bf16.msra.mxu0 %v8495_v63  ;;  %2628 = vmatpush1.bf16.msra.mxu1 %v8537_v0  ;;  %v8564_v63 = vld [vmem:[%s10172_s22 + $0x520] ss:$36 sps:$4 sm:$0xff]   ;;  %v8572_v0 = vld [vmem:[%s10172_s22 + $0x56c] ss:$36 sps:$4 sm:$0xff]  }
 0x20e   : > { %2543 = vmatprep.subr.bf16.mxu0 %v8500_v1  ;;  %2629 = vmatprep.subr.bf16.mxu1 %v8545_v2  ;;  %v8612_v1 = vld [vmem:[%s10172_s22 + $0x528] ss:$36 sps:$4 sm:$0xff]   ;;  %v8617_v2 = vld [vmem:[%s10172_s22 + $0x574] ss:$36 sps:$4 sm:$0xff]  }
 0x211   : > { %2544 = vmatpush1.bf16.msra.mxu0 %v8498_v3  ;;  %2630 = vmatpush1.bf16.msra.mxu1 %v8543_v4  ;;  %v8570_v3 = vld [vmem:[%s10172_s22 + $0x568] ss:$36 sps:$4 sm:$0xff]   ;;  %v8578_v4 = vld [vmem:[%s10172_s22 + $0x5b4] ss:$36 sps:$4 sm:$0xff]  }
 0x212   : > { %2545 = vmatprep.subr.bf16.mxu0 %v8503_v5  ;;  %2631 = vmatprep.subr.bf16.mxu1 %v8551_v6  ;;  %v8615_v5 = vld [vmem:[%s10172_s22 + $0x570] ss:$36 sps:$4 sm:$0xff]   ;;  %v8620_v6 = vld [vmem:[%s10172_s22 + $0x5bc] ss:$36 sps:$4 sm:$0xff]  }
 0x215   : > { %2546 = vmatpush1.bf16.msra.mxu0 %v8501_v7  ;;  %2632 = vmatpush1.bf16.msra.mxu1 %v8549_v8  ;;  %v8576_v7 = vld [vmem:[%s10172_s22 + $0x5b0] ss:$36 sps:$4 sm:$0xff]   ;;  %v8584_v8 = vld [vmem:[%s10172_s22 + $0x5fc] ss:$36 sps:$4 sm:$0xff]  }
 0x216   : > { %2547 = vmatprep.subr.bf16.mxu0 %v8506_v9  ;;  %2633 = vmatprep.subr.bf16.mxu1 %v8557_v10  ;;  %v8618_v9 = vld [vmem:[%s10172_s22 + $0x5b8] ss:$36 sps:$4 sm:$0xff]   ;;  %v8623_v10 = vld [vmem:[%s10172_s22 + $0x604] ss:$36 sps:$4 sm:$0xff]  }
 0x219   : > { %2548 = vmatpush1.bf16.msra.mxu0 %v8504_v11  ;;  %2634 = vmatpush1.bf16.msra.mxu1 %v8555_v12  ;;  %v8582_v11 = vld [vmem:[%s10172_s22 + $0x5f8] ss:$36 sps:$4 sm:$0xff]   ;;  %v8590_v12 = vld [vmem:[%s10172_s22 + $0x644] ss:$36 sps:$4 sm:$0xff]  }
 0x21a   : > { %2549 = vmatprep.subr.bf16.mxu0 %v8509_v13  ;;  %2635 = vmatprep.subr.bf16.mxu1 %v8563_v15  ;;  %v8621_v13 = vld [vmem:[%s10172_s22 + $0x600] ss:$36 sps:$4 sm:$0xff]   ;;  %v8626_v15 = vld [vmem:[%s10172_s22 + $0x64c] ss:$36 sps:$4 sm:$0xff]  }
 0x21d   : > { %2550 = vmatpush1.bf16.msra.mxu0 %v8507_v16  ;;  %2636 = vmatpush1.bf16.msra.mxu1 %v8561_v17  ;;  %v8588_v16 = vld [vmem:[%s10172_s22 + $0x640] ss:$36 sps:$4 sm:$0xff]   ;;  %v8596_v17 = vld [vmem:[%s10172_s22 + $0x68c] ss:$36 sps:$4 sm:$0xff]  }
 0x21e   : > { %2551 = vmatprep.subr.bf16.mxu0 %v8512_v18  ;;  %2637 = vmatprep.subr.bf16.mxu1 %v8569_v19  ;;  %v8624_v18 = vld [vmem:[%s10172_s22 + $0x648] ss:$36 sps:$4 sm:$0xff]   ;;  %v8631_v19 = vld [vmem:[%s10172_s22 + $0x694] ss:$36 sps:$4 sm:$0xff]  }
 0x221   : > { %2552 = vmatpush1.bf16.msra.mxu0 %v8510_v20  ;;  %2638 = vmatpush1.bf16.msra.mxu1 %v8567_v23  ;;  %v8594_v20 = vld [vmem:[%s10172_s22 + $0x688] ss:$36 sps:$4 sm:$0xff]   ;;  %v8629_v23 = vld [vmem:[%s10172_s22 + $0x690] ss:$36 sps:$4 sm:$0xff]  }
 0x222   : > { %2553 = vmatprep.subr.bf16.mxu0 %v8515_v21  ;;  %2639 = vmatprep.subr.bf16.mxu1 %v8575_v24  ;;  %v8627_v21 = vld [vmem:[%s10172_s22 + $0x260] ss:$36 sps:$4 sm:$0xff]  }
 0x223   : > { %v8628_v24 = vld [vmem:[%s10172_s22 + $0x20] ss:$36 sps:$4 sm:$0xff]  }
 0x225   : > { %2554 = vmatpush1.bf16.msra.mxu0 %v8513_v25  ;;  %2640 = vmatpush1.bf16.msra.mxu1 %v8573_v27  ;;  %v8632_v25 = vld [vmem:[%s10172_s22 + $0x2a8] ss:$36 sps:$4 sm:$0xff]  }
 0x226   : > { %2555 = vmatprep.subr.bf16.mxu0 %v8518_v26  ;;  %2641 = vmatprep.subr.bf16.mxu1 %v8581_v28  ;;  %v8636_v26 = vld [vmem:[%s10172_s22 + $0x4a0] ss:$36 sps:$4 sm:$0xff]   ;;  %v8633_v27 = vld [vmem:[%s10172_s22 + $0x68] ss:$36 sps:$4 sm:$0xff]   ;;  %v9619_v28 = vmov 0.0  }
 0x229   : > { %2556 = vmatpush1.bf16.msra.mxu0 %v8516_v29  ;;  %2642 = vmatpush1.bf16.msra.mxu1 %v8579_v31  ;;  %v8634_v29 = vld [vmem:[%s10172_s22 + $0x2f0] ss:$36 sps:$4 sm:$0xff]  }
 0x22a   : > { %2557 = vmatprep.subr.bf16.mxu0 %v8524_v30  ;;  %2643 = vmatprep.subr.bf16.mxu1 %v8587_v32  ;;  %v8639_v30 = vld [vmem:[%s10172_s22 + $0x4e8] ss:$36 sps:$4 sm:$0xff]   ;;  %v8635_v31 = vld [vmem:[%s10172_s22 + $0xb0] ss:$36 sps:$4 sm:$0xff]   ;;  %v8637_v32 = vld [vmem:[%s10172_s22 + $0x338] ss:$36 sps:$4 sm:$0xff]  }
 0x22d   : > { %2558 = vmatpush1.bf16.msra.mxu0 %v8522_v33  ;;  %2644 = vmatpush1.bf16.msra.mxu1 %v8585_v35  ;;  %v8642_v33 = vld [vmem:[%s10172_s22 + $0x530] ss:$36 sps:$4 sm:$0xff]   ;;  %v8640_v35 = vld [vmem:[%s10172_s22 + $0x380] ss:$36 sps:$4 sm:$0xff]  }
 0x22e   : > { %2559 = vmatprep.subr.bf16.mxu0 %v8530_v34  ;;  %2645 = vmatprep.subr.bf16.mxu1 %v8593_v36  ;;  %v8638_v34 = vld [vmem:[%s10172_s22 + $0xf8] ss:$36 sps:$4 sm:$0xff]  }
 0x22f   : > { %v8645_v36 = vld [vmem:[%s10172_s22 + $0x578] ss:$36 sps:$4 sm:$0xff]  }
 0x231   : > { %2560 = vmatpush1.bf16.msra.mxu0 %v8528_v37  ;;  %2646 = vmatpush1.bf16.msra.mxu1 %v8591_v39  ;;  %v8643_v37 = vld [vmem:[%s10172_s22 + $0x3c8] ss:$36 sps:$4 sm:$0xff]  }
 0x232   : > { %2561 = vmatprep.subr.bf16.mxu0 %v8536_v38  ;;  %2647 = vmatprep.subr.bf16.mxu1 %v8599_v40  ;;  %v8648_v38 = vld [vmem:[%s10172_s22 + $0x5c0] ss:$36 sps:$4 sm:$0xff]   ;;  %v8644_v39 = vld [vmem:[%s10172_s22 + $0x188] ss:$36 sps:$4 sm:$0xff]   ;;  %v8646_v40 = vld [vmem:[%s10172_s22 + $0x410] ss:$36 sps:$4 sm:$0xff]  }
 0x235   : > { %2562 = vmatpush1.bf16.msra.mxu0 %v8534_v41  ;;  %2648 = vmatpush1.bf16.msra.mxu1 %v8597_v43  ;;  %v8651_v41 = vld [vmem:[%s10172_s22 + $0x608] ss:$36 sps:$4 sm:$0xff]   ;;  %v8649_v43 = vld [vmem:[%s10172_s22 + $0x458] ss:$36 sps:$4 sm:$0xff]  }
 0x236   : > { %2563 = vmatprep.subr.bf16.mxu0 %v8542_v42  ;;  %2649 = vmatprep.subr.bf16.mxu1 %v8602_v44  ;;  %v8647_v42 = vld [vmem:[%s10172_s22 + $0x1d0] ss:$36 sps:$4 sm:$0xff]  }
 0x237   : > { %v8652_v44 = vld [vmem:[%s10172_s22 + $0x650] ss:$36 sps:$4 sm:$0xff]  }
 0x239   : > { %2564 = vmatpush1.bf16.msra.mxu0 %v8540_v45  ;;  %2650 = vmatpush1.bf16.msra.mxu1 %v8600_v46  ;;  %v8650_v45 = vld [vmem:[%s10172_s22 + $0x218] ss:$36 sps:$4 sm:$0xff]  }
 0x23a   : > { %2565 = vmatprep.subr.bf16.mxu0 %v8548_v47  ;;  %2651 = vmatprep.subr.bf16.mxu1 %v8605_v48  ;;  %v8653_v46 = vld [vmem:[%s10172_s22 + $0x698] ss:$36 sps:$4 sm:$0xff]   ;;  %v1214_v47 = vlaneseq }
 0x23c   : > { %v10510_v48 = vshrl.u32 %v1214_v47, 7 }
 0x23d   : > { %2566 = vmatpush1.bf16.msra.mxu0 %v8546_v50  ;;  %2652 = vmatpush1.bf16.msra.mxu1 %v8603_v51 }
 0x23e   : > { %2578 = vmatprep.subr.bf16.mxu0 %v8554_v52  ;;  %2664 = vmatprep.subr.bf16.mxu1 %v8608_v53  ;;  %v10513_v50 = vsub.s32 0, %v10510_v48  ;;  %v10516_v51 = vsub.s32 2, %v10510_v48  ;;  %v1210_v52 = vld [vmem:[%s10184_s23] sm:$0xff] }
 0x240   : > { %2568 = vmatmul.mubr.bf16.vlgmr.msra.gmra.mrb[4].mxu0 %v10324_v14  ;;  %2654 = vmatmul.mubr.bf16.vlgmr.msra.gmra.mrb[4].mxu1 %v10324_v14  ;;  %v1217_v53 = vrot.slane %v1210_v52, %v10513_v50 }
 0x241   : > { %2579 = vmatpush1.bf16.msra.mxu0 %v8552_v54  ;;  %2610 = vmatprep.mubr.bf16.mxu0 %v9618_v22  ;;  %v1225_v54 = vrot.slane %v1210_v52, %v10516_v51 }
 0x242   : > { %2580 = vmatprep.subr.bf16.mxu0 %v8560_v55  ;;  %2665 = vmatpush1.bf16.msra.mxu1 %v8606_v57 }
 0x243   : > { %2666 = vmatprep.subr.bf16.mxu1 %v8611_v58  ;;  %2696 = vmatprep.mubr.bf16.mxu1 %v9618_v22 }
 0x245   : > { %2581 = vmatpush1.bf16.msra.mxu0 %v8558_v59 }
 0x246   : > { %2582 = vmatprep.subr.bf16.mxu0 %v8566_v60  ;;  %2667 = vmatpush1.bf16.msra.mxu1 %v8609_v61 }
 0x247   : > { %2668 = vmatprep.subr.bf16.mxu1 %v8614_v62 }
 0x249   : > { %2583 = vmatpush1.bf16.msra.mxu0 %v8564_v63 }
 0x24a   : > { %2584 = vmatprep.subr.bf16.mxu0 %v8572_v0  ;;  %2669 = vmatpush1.bf16.msra.mxu1 %v8612_v1 }
 0x24b   : > { %2670 = vmatprep.subr.bf16.mxu1 %v8617_v2 }
 0x24d   : > { %2585 = vmatpush1.bf16.msra.mxu0 %v8570_v3 }
 0x24e   : > { %2586 = vmatprep.subr.bf16.mxu0 %v8578_v4  ;;  %2671 = vmatpush1.bf16.msra.mxu1 %v8615_v5 }
 0x24f   : > { %2672 = vmatprep.subr.bf16.mxu1 %v8620_v6 }
 0x251   : > { %2587 = vmatpush1.bf16.msra.mxu0 %v8576_v7 }
 0x252   : > { %2588 = vmatprep.subr.bf16.mxu0 %v8584_v8  ;;  %2673 = vmatpush1.bf16.msra.mxu1 %v8618_v9 }
 0x253   : > { %2674 = vmatprep.subr.bf16.mxu1 %v8623_v10 }
 0x255   : > { %2589 = vmatpush1.bf16.msra.mxu0 %v8582_v11 }
 0x256   : > { %2590 = vmatprep.subr.bf16.mxu0 %v8590_v12  ;;  %2675 = vmatpush1.bf16.msra.mxu1 %v8621_v13 }
 0x257   : > { %2676 = vmatprep.subr.bf16.mxu1 %v8626_v15 }
 0x259   : > { %2591 = vmatpush1.bf16.msra.mxu0 %v8588_v16 }
 0x25a   : > { %2592 = vmatprep.subr.bf16.mxu0 %v8596_v17  ;;  %2677 = vmatpush1.bf16.msra.mxu1 %v8624_v18 }
 0x25b   : > { %2678 = vmatprep.subr.bf16.mxu1 %v8631_v19 }
 0x25d   : > { %2593 = vmatpush1.bf16.msra.mxu0 %v8594_v20 }
 0x25e   : > { %7774 = vmatprep.subr.bf16.mxu0 %v8627_v21  ;;  %2679 = vmatpush1.bf16.msra.mxu1 %v8629_v23  ;;  %v1232_v23 = vsub.s32 4, %v10510_v48 }
 0x25f   : > { %7928 = vmatprep.subr.bf16.mxu1 %v9619_v28 }
 0x260   : > { %2611 = vmatmul.mubr.bf16.vlgmr.msra.gmra.mrb[4].mxu0 %v10361_v49 }
 0x261   : > { %7775 = vmatpush3.bf16.msra.mxu0 %v8628_v24  ;;  %2697 = vmatmul.mubr.bf16.vlgmr.msra.gmra.mrb[4].mxu1 %v10361_v49  ;;  %v1236_v24 = vsub.s32 5, %v10510_v48 }
 0x262   : > { %7776 = vmatprep.subr.bf16.mxu0 %v8632_v25  ;;  %7929 = vmatpush3.bf16.msra.mxu1 %v8636_v26  ;;  %v1240_v25 = vsub.s32 6, %v10510_v48  ;;  %v1244_v26 = vsub.s32 7, %v10510_v48 }
 0x263   : > { %7930 = vmatprep.subr.bf16.mxu1 %v9619_v28  ;;  %2739 = vmatprep.mubr.bf16.mxu0 %v10301_v56  ;;  %v8641_v56 = vld [vmem:[%s10172_s22 + $0x140] ss:$36 sps:$4 sm:$0xff]  }
 0x264   : > { %7944 = vmatprep.mubr.msk.bf16.mxu1 %vm9620_vm0, %v9619_v28 }
 0x265   : > { %7777 = vmatpush3.bf16.msra.mxu0 %v8633_v27  ;;  %v1233_v27 = vrot.slane %v1210_v52, %v1232_v23 }
 0x266   : > { %7778 = vmatprep.subr.bf16.mxu0 %v8634_v29  ;;  %7931 = vmatpush3.bf16.msra.mxu1 %v8639_v30  ;;  %v1237_v29 = vrot.slane %v1210_v52, %v1236_v24  ;;  %v1241_v30 = vrot.slane %v1210_v52, %v1240_v25 }
 0x267   : > { %7932 = vmatprep.subr.bf16.mxu1 %v9619_v28 }
 0x269   : > { %7779 = vmatpush3.bf16.msra.mxu0 %v8635_v31  ;;  %v1245_v31 = vrot.slane %v1210_v52, %v1244_v26 }
 0x26a   : > { %7780 = vmatprep.subr.bf16.mxu0 %v8637_v32  ;;  %7933 = vmatpush3.bf16.msra.mxu1 %v8642_v33 }
 0x26b   : > { %7934 = vmatprep.subr.bf16.mxu1 %v9619_v28 }
 0x26d   : > { %7781 = vmatpush3.bf16.msra.mxu0 %v8638_v34 }
 0x26e   : > { %7782 = vmatprep.subr.bf16.mxu0 %v8640_v35  ;;  %7935 = vmatpush3.bf16.msra.mxu1 %v8645_v36 }
 0x26f   : > { %7936 = vmatprep.subr.bf16.mxu1 %v9619_v28 }
 0x271   : > { %7783 = vmatpush3.bf16.msra.mxu0 %v8641_v56 }
 0x272   : > { %7784 = vmatprep.subr.bf16.mxu0 %v8643_v37  ;;  %7937 = vmatpush3.bf16.msra.mxu1 %v8648_v38 }
 0x273   : > { %7938 = vmatprep.subr.bf16.mxu1 %v9619_v28 }
 0x275   : > { %7785 = vmatpush3.bf16.msra.mxu0 %v8644_v39 }
 0x276   : > { %7786 = vmatprep.subr.bf16.mxu0 %v8646_v40  ;;  %7939 = vmatpush3.bf16.msra.mxu1 %v8651_v41 }
 0x277   : > { %7940 = vmatprep.subr.bf16.mxu1 %v9619_v28 }
 0x279   : > { %7787 = vmatpush3.bf16.msra.mxu0 %v8647_v42 }
 0x27a   : > { %7788 = vmatprep.subr.bf16.mxu0 %v8649_v43  ;;  %7941 = vmatpush3.bf16.msra.mxu1 %v8652_v44 }
 0x27b   : > { %7942 = vmatprep.subr.bf16.mxu1 %v9619_v28 }
 0x27d   : > { %7789 = vmatpush3.bf16.msra.mxu0 %v8650_v45 }
 0x27e   : > { %7943 = vmatpush3.bf16.msra.mxu1 %v8653_v46  ;;  %7948 = vmatprep.subr.bf16.mxu0 %v9619_v28 }
 0x27f   : > { %7978 = vmatprep.subr.bf16.mxu1 %v9619_v28 }
 0x280   : > { %2740 = vmatmul.mubr.bf16.vlgmr.msra.gmra.mrb[8].mxu0 %v10324_v14  ;;  %v10520_v14 = vsub.s32 1, %v10510_v48 }
 0x281   : > { %7945 = vmatmul.mubr.bf16.vlgmr.msra.gmra.mrb[8].mxu1 %v10361_v49  ;;  %7950 = vmatprep.mubr.msk.bf16.mxu0 %vm9620_vm0, %v9619_v28  ;;  %v1228_v49 = vsub.s32 3, %v10510_v48 }
 0x282   : > { %7980 = vmatprep.mubr.msk.bf16.mxu1 %vm9620_vm0, %v9619_v28  ;;  %v1221_v55 = vrot.slane %v1210_v52, %v10520_v14 }
 0x283   : > { %v1229_v59 = vrot.slane %v1210_v52, %v1228_v49 }
 0x2d3   : > { %v2440_v57 = vpop.f32.mrb[0].mxu0  ;;  %v2526_v58 = vpop.f32.mrb[0].mxu1 }
 0x2d4   : > { %v8112_v60 = vadd.f32 %v2440_v57, %v1217_v53  ;;  %v8116_v61 = vadd.f32 %v2526_v58, %v1225_v54  ;;  %v2442_v62 = vpop.f32.mrb[1].mxu0  ;;  %v2528_v63 = vpop.f32.mrb[1].mxu1  ;;  %v7264_v58 = vld [vmem:[%s10184_s23 + $0x8] ss:$0 sm:$0xff]  ;;  %s9622_s23 = smov 32  }
 0x2d5   : > { %v8113_v0 = vadd.f32 %v2442_v62, %v1221_v55  ;;  %v2444_v1 = vpop.f32.mrb[2].mxu0  ;;  %v2530_v2 = vpop.f32.mrb[2].mxu1  ;;  %v8117_v8 = vadd.f32 %v2528_v63, %v1229_v59 }
 0x2d6   : > { %v8114_v3 = vadd.f32 %v2444_v1, %v1217_v53  ;;  %v8118_v4 = vadd.f32 %v2530_v2, %v1225_v54  ;;  %v2446_v5 = vpop.f32.mrb[3].mxu0  ;;  %v2532_v6 = vpop.f32.mrb[3].mxu1  ;;  %v2789_v7 = vmul.f32 0.17677669, %v8112_v60  ;;  %v2791_v11 = vmul.f32 0.17677669, %v8116_v61 }
 0x2d7   : > { %v8115_v9 = vadd.f32 %v2446_v5, %v1221_v55  ;;  %v8119_v10 = vadd.f32 %v2532_v6, %v1229_v59  ;;  %v2790_v15 = vmul.f32 0.17677669, %v8113_v0 }
 0x2d8   : > { %v2792_v12 = vmul.f32 0.17677669, %v8114_v3  ;;  %v2794_v13 = vmul.f32 0.17677669, %v8118_v4 }
 0x2d9   : > { %v2793_v16 = vmul.f32 0.17677669, %v8115_v9  ;;  %v10528_v17 = vpack.c.bf16 %v8119_v10, %v8117_v8  ;;  %v10569_v8 = vld [vmem:[%s937_s1] ss:$0 sm:$0xff]  ;;  %s11610_s1 = scalar_lea.vmem [#allocation11], %s10192_s15 }
 0x2da   : > { %v10530_v18 = vpack.c.bf16 %v2792_v12, %v2789_v7  ;;  %v10532_v19 = vpack.c.bf16 %v2794_v13, %v2791_v11 }
 0x2db   : > { %v10534_v20 = vpack.c.bf16 %v2793_v16, %v2790_v15  ;;  %2932 = vrot.lane.b32.xlu1 %v10528_v17, %s9621_s2  ;;  %v2815_v21 = vsel %vm2810_vm1, %v10528_v17, 0 }
 0x2dc   : > { %7949 = vmatpush3.bf16.xpose.msra.mxu0 %v2815_v21 }
 0x2dd   : > { %7954 = vmatprep.subr.bf16.mxu0 %v9619_v28 }
 0x2df   : > { %2929 = vrot.lane.b32.xlu1 %v10530_v18, %s9621_s2 }
 0x2e3   : > { %7951 = vmatmul.mubr.msk.bf16.vlgmr.msra.gmra.mrb[12].mxu0 %vm2810_vm1, %v10530_v18 }
 0x2e4   : > { %7956 = vmatprep.mubr.msk.bf16.mxu0 %vm9620_vm0, %v9619_v28 }
 0x333   : > { %v2612_v32 = vpop.f32.mrb[4].mxu0 }
 0x334   : > { %v8120_v33 = vadd.f32 %v2612_v32, %v1233_v27  ;;  %v2614_v34 = vpop.f32.mrb[5].mxu0  ;;  %v2698_v35 = vpop.f32.mrb[4].mxu1 }
 0x335   : > { %v8121_v36 = vadd.f32 %v2614_v34, %v1237_v29  ;;  %v2616_v56 = vpop.f32.mrb[6].mxu0  ;;  %v8124_v37 = vadd.f32 %v2698_v35, %v1241_v30  ;;  %v2700_v38 = vpop.f32.mrb[5].mxu1 }
 0x336   : > { %v8122_v39 = vadd.f32 %v2616_v56, %v1233_v27  ;;  %v2618_v40 = vpop.f32.mrb[7].mxu0  ;;  %v8125_v41 = vadd.f32 %v2700_v38, %v1245_v31  ;;  %v2702_v42 = vpop.f32.mrb[6].mxu1 }
 0x337   : > { %v8123_v43 = vadd.f32 %v2618_v40, %v1237_v29  ;;  %v8126_v44 = vadd.f32 %v2702_v42, %v1241_v30  ;;  %v2704_v45 = vpop.f32.mrb[7].mxu1 }
 0x338   : > { %v10551_v46 = vpack.c.bf16 %v8122_v39, %v8120_v33  ;;  %v8127_v47 = vadd.f32 %v2704_v45, %v1245_v31 }
 0x339   : > { %v10553_v52 = vpack.c.bf16 %v8123_v43, %v8121_v36  ;;  %v10555_v53 = vpack.c.bf16 %v8126_v44, %v8124_v37 }
 0x33a   : > { %v10557_v54 = vpack.c.bf16 %v8127_v47, %v8125_v41 }
 0x33b   : > { %7955 = vmatpush3.bf16.msra.mxu0 %v10555_v53 }
 0x33c   : > { %7960 = vmatprep.subr.bf16.mxu0 %v9619_v28 }
 0x34d   : > { %v2933_v32 = vpop.permute.xlu1 %2932 }
 0x34e   : > { %v2938_v34 = vsel %vm2810_vm1, %v2933_v32, 0 }
 0x351   : > { %v2930_v35 = vpop.permute.xlu1 %2929 }
 0x353   : > { %v7790_v55 = vpop.f32.mrb[8].mxu0 }
 0x354   : > { %v7791_v57 = vpop.f32.mrb[9].mxu0  ;;  %v2782_v59 = vpop.f32.mrb[8].mxu1 }
 0x355   : > { %v7792_v60 = vadd.f32 %v7791_v57, %v7790_v55  ;;  %v7793_v61 = vpop.f32.mrb[10].mxu0  ;;  %v7946_v62 = vpop.f32.mrb[9].mxu1 }
 0x356   : > { %v7794_v63 = vpop.f32.mrb[11].mxu0  ;;  %v2785_v0 = vpop.f32.mrb[10].mxu1 }
 0x357   : > { %v7795_v1 = vadd.f32 %v7794_v63, %v7793_v61  ;;  %v2742_v2 = vadd.f32 %v7792_v60, %v7264_v58  ;;  %v7947_v3 = vpop.f32.mrb[11].mxu1 }
 0x359   : > { %v2783_v4 = vadd.f32 %v2782_v59, %v2742_v2  ;;  %v2745_v5 = vadd.f32 %v7795_v1, %v7264_v58 }
 0x35b   : > { %v2786_v6 = vadd.f32 %v2785_v0, %v2745_v5 }
 0x35d   : > { %v10562_v7 = vpack.c.bf16 %v2786_v6, %v2783_v4 }
 0x3b6   : > { %v2851_v9 = vpop.f32.mrb[12].mxu0 }
 0x3b7   : > { %v2852_v10 = vadd.f32 %v10569_v8, %v2851_v9  ;;  %v7952_v11 = vpop.f32.mrb[13].mxu0 }
 0x3b8   : > { %v2854_v12 = vpop.f32.mrb[14].mxu0 }
 0x3b9   : > { %v2855_v13 = vadd.f32 %v10569_v8, %v2854_v12  ;;  %v7953_v15 = vpop.f32.mrb[15].mxu0  ;;  %v2859_v16 = vsel %vm2858_vm2, %v2852_v10, -inf  ;;  %v3331_v12 = vsel %vm2810_vm1, %v10551_v46, 0 }
 0x3ba   : > { %2860 = vmax.xlane.f32.xlu0 %v2859_v16 }
 0x3bb   : > { %v2862_v21 = vsel %vm2858_vm2, %v2855_v13, -inf }
 0x3be   : > { %2863 = vmax.xlane.f32.xlu0 %v2862_v21 }
 0x447   : > { %v2861_v23 = vpop.xlane.xlu0 %2860 }
 0x448   : > { %v2865_v24 = vsub.f32 %v2852_v10, %v2861_v23 }
 0x44a   : > { %v2867_v25 = vmul.f32 1.442695, %v2865_v24 }
 0x44b   : > { %v2864_v26 = vpop.xlane.xlu0 %2863 }
 0x44c   : > { %v2866_v27 = vsub.f32 %v2855_v13, %v2864_v26  ;;  %9022 = vpow2.f32 %v2867_v25  ;;  %v3843_v25 = vsel %vm2810_vm1, %v10553_v52, 0 }
 0x44e   : > { %v2869_v29 = vmul.f32 1.442695, %v2866_v27 }
 0x450   : > { %9024 = vpow2.f32 %v2869_v29 }
 0x456   : > { %v10575_v30 = vpop.eup %9022 }
 0x45a   : > { %v10577_v31 = vpop.eup %9024 }
 0x45b   : > { %v2877_v33 = vpack.c.bf16 %v10577_v31, %v10575_v30 }
 0x45d   : > { %7957 = vmatmul.mubr.msk.bf16.vlgmr.msra.gmra.mrb[16].mxu0 %vm2858_vm2, %v2877_v33 }
 0x45e   : > { %7961 = vmatpush3.bf16.xpose.msra.mxu0 %v2938_v34  ;;  %7962 = vmatprep.mubr.msk.bf16.mxu0 %vm9620_vm0, %v9619_v28 }
 0x45f   : > { %7966 = vmatprep.subr.bf16.mxu0 %v9619_v28 }
 0x465   : > { %7963 = vmatmul.mubr.msk.bf16.vlgmr.msra.gmra.mrb[20].mxu0 %vm2810_vm1, %v2930_v35 }
 0x466   : > { %7968 = vmatprep.mubr.msk.bf16.mxu0 %vm9620_vm0, %v9619_v28 }
 0x530   : > { %v10589_v36 = vpop.f32.mrb[16].mxu0 }
 0x531   : > { %v7958_v56 = vpop.f32.mrb[17].mxu0 }
 0x532   : > { %v10591_v37 = vpop.f32.mrb[18].mxu0 }
 0x533   : > { %v7959_v38 = vpop.f32.mrb[19].mxu0 }
 0x538   : > { %v2974_v39 = vpop.f32.mrb[20].mxu0 }
 0x539   : > { %v2975_v40 = vadd.f32 %v10569_v8, %v2974_v39  ;;  %v7964_v41 = vpop.f32.mrb[21].mxu0 }
 0x53a   : > { %v2977_v42 = vpop.f32.mrb[22].mxu0 }
 0x53b   : > { %v2978_v43 = vadd.f32 %v10569_v8, %v2977_v42  ;;  %v7965_v44 = vpop.f32.mrb[23].mxu0  ;;  %v2981_v45 = vsel %vm2858_vm2, %v2975_v40, -inf }
 0x53c   : > { %2982 = vmax.xlane.f32.xlu0 %v2981_v45 }
 0x53d   : > { %v2984_v47 = vsel %vm2858_vm2, %v2978_v43, -inf }
 0x53e   : > { %2985 = vmax.xlane.f32.xlu1 %v2984_v47 }
 0x54f   : > { %3195 = vrot.lane.b32.xlu1 %v10530_v18, %s9622_s23 }
 0x552   : > { %3001 = vrot.lane.b32.xlu0 %v10555_v53, %s9621_s2 }
 0x553   : > { %3710 = vrot.lane.b32.xlu1 %v10551_v46, %s9622_s23 }
 0x556   : > { %3065 = vrot.lane.b32.xlu0 %v10528_v17, %s9623_s28 }
 0x557   : > { %3959 = vrot.lane.b32.xlu1 %v10553_v52, %s9621_s2 }
 0x55a   : > { %3063 = vrot.lane.b32.xlu0 %v10530_v18, %s9623_s28 }
 0x55b   : > { %4091 = vrot.lane.b32.xlu1 %v10553_v52, %s9623_s28 }
 0x55e   : > { %3197 = vrot.lane.b32.xlu0 %v10528_v17, %s9622_s23 }
 0x55f   : > { %4222 = vrot.lane.b32.xlu1 %v10553_v52, %s9622_s23 }
 0x562   : > { %3447 = vrot.lane.b32.xlu0 %v10551_v46, %s9621_s2 }
 0x563   : > { %3133 = vrot.lane.b32.xlu1 %v10555_v53, %s9623_s28 }
 0x566   : > { %3444 = vrot.lane.b32.xlu0 %v10534_v20, %s9621_s2 }
 0x567   : > { %3516 = vrot.lane.b32.xlu1 %v10557_v54, %s9621_s2 }
 0x56a   : > { %3579 = vrot.lane.b32.xlu0 %v10551_v46, %s9623_s28 }
 0x56e   : > { %3577 = vrot.lane.b32.xlu0 %v10534_v20, %s9623_s28 }
 0x572   : > { %3708 = vrot.lane.b32.xlu0 %v10534_v20, %s9622_s23 }
 0x576   : > { %3956 = vrot.lane.b32.xlu0 %v10532_v19, %s9621_s2 }
 0x57a   : > { %4089 = vrot.lane.b32.xlu0 %v10532_v19, %s9623_s28 }
 0x57e   : > { %4220 = vrot.lane.b32.xlu0 %v10532_v19, %s9622_s23 }
 0x582   : > { %3265 = vrot.lane.b32.xlu0 %v10555_v53, %s9622_s23 }
 0x5c9   : > { %v2983_v17 = vpop.xlane.xlu0 %2982 }
 0x5ca   : > { %v2987_v18 = vsub.f32 %v2975_v40, %v2983_v17 }
 0x5cb   : > { %v2986_v55 = vpop.xlane.xlu1 %2985 }
 0x5cc   : > { %v2989_v57 = vmul.f32 1.442695, %v2987_v18  ;;  %v2988_v58 = vsub.f32 %v2978_v43, %v2986_v55 }
 0x5cd   : > { %v3002_v59 = vpop.permute.xlu0 %3001 }
 0x5ce   : > { %v2991_v60 = vmul.f32 1.442695, %v2988_v58  ;;  %7967 = vmatpush3.bf16.msra.mxu0 %v3002_v59  ;;  %9026 = vpow2.f32 %v2989_v57 }
 0x5cf   : > { %v3196_v61 = vpop.permute.xlu1 %3195  ;;  %7972 = vmatprep.subr.bf16.mxu0 %v9619_v28 }
 0x5d0   : > { %9028 = vpow2.f32 %v2991_v60 }
 0x5d1   : > { %v3066_v63 = vpop.permute.xlu0 %3065 }
 0x5d2   : > { %v3071_v5 = vsel %vm2810_vm1, %v3066_v63, 0 }
 0x5d3   : > { %v3711_v62 = vpop.permute.xlu1 %3710 }
 0x5d5   : > { %v3064_v4 = vpop.permute.xlu0 %3063 }
 0x5d7   : > { %v3960_v0 = vpop.permute.xlu1 %3959 }
 0x5d8   : > { %v10638_v1 = vpop.eup %9026  ;;  %v3965_v26 = vsel %vm2810_vm1, %v3960_v0, 0 }
 0x5d9   : > { %v3198_v9 = vpop.permute.xlu0 %3197 }
 0x5da   : > { %v10640_v2 = vpop.eup %9028  ;;  %v3203_v11 = vsel %vm2810_vm1, %v3198_v9, 0 }
 0x5db   : > { %v4092_v53 = vpop.permute.xlu1 %4091  ;;  %v2999_v3 = vpack.c.bf16 %v10640_v2, %v10638_v1 }
 0x5dc   : > { %v4097_v52 = vsel %vm2810_vm1, %v4092_v53, 0 }
 0x5dd   : > { %7969 = vmatmul.mubr.msk.bf16.vlgmr.msra.gmra.mrb[24].mxu0 %vm2858_vm2, %v2999_v3  ;;  %v3448_v13 = vpop.permute.xlu0 %3447 }
 0x5de   : > { %7973 = vmatpush3.bf16.xpose.msra.mxu0 %v3071_v5  ;;  %7974 = vmatprep.mubr.msk.bf16.mxu0 %vm9620_vm0, %v9619_v28  ;;  %v3453_v16 = vsel %vm2810_vm1, %v3448_v13, 0 }
 0x5df   : > { %v4223_v6 = vpop.permute.xlu1 %4222  ;;  %7984 = vmatprep.subr.bf16.mxu0 %v9619_v28 }
 0x5e1   : > { %v3445_v15 = vpop.permute.xlu0 %3444 }
 0x5e3   : > { %v3134_v10 = vpop.permute.xlu1 %3133 }
 0x5e4   : > { %7979 = vmatpush3.bf16.msra.mxu1 %v3134_v10 }
 0x5e5   : > { %7975 = vmatmul.mubr.msk.bf16.vlgmr.msra.gmra.mrb[28].mxu0 %vm2810_vm1, %v3064_v4  ;;  %7990 = vmatprep.subr.bf16.mxu1 %v9619_v28  ;;  %v3580_v46 = vpop.permute.xlu0 %3579 }
 0x5e6   : > { %7985 = vmatpush3.bf16.xpose.msra.mxu0 %v3203_v11  ;;  %7986 = vmatprep.mubr.msk.bf16.mxu0 %vm9620_vm0, %v9619_v28  ;;  %v3585_v21 = vsel %vm2810_vm1, %v3580_v46, 0 }
 0x5e7   : > { %7996 = vmatprep.subr.bf16.mxu0 %v9619_v28 }
 0x5e9   : > { %v3578_v23 = vpop.permute.xlu0 %3577 }
 0x5ed   : > { %7987 = vmatmul.mubr.msk.bf16.vlgmr.msra.gmra.mrb[32].mxu0 %vm2810_vm1, %v3196_v61  ;;  %v3709_v24 = vpop.permute.xlu0 %3708 }
 0x5ee   : > { %7997 = vmatpush3.bf16.xpose.msra.mxu0 %v3331_v12  ;;  %7998 = vmatprep.mubr.msk.bf16.mxu0 %vm9620_vm0, %v9619_v28 }
 0x5ef   : > { %8008 = vmatprep.subr.bf16.mxu0 %v9619_v28 }
 0x5f1   : > { %v3957_v27 = vpop.permute.xlu0 %3956 }
 0x5f5   : > { %7999 = vmatmul.mubr.msk.bf16.vlgmr.msra.gmra.mrb[36].mxu0 %vm2810_vm1, %v10534_v20  ;;  %v3716_v20 = vsel %vm2810_vm1, %v3711_v62, 0  ;;  %v4090_v29 = vpop.permute.xlu0 %4089 }
 0x5f6   : > { %8009 = vmatpush3.bf16.xpose.msra.mxu0 %v3453_v16  ;;  %8010 = vmatprep.mubr.msk.bf16.mxu0 %vm9620_vm0, %v9619_v28 }
 0x5f7   : > { %8020 = vmatprep.subr.bf16.mxu0 %v9619_v28 }
 0x5f9   : > { %v4221_v32 = vpop.permute.xlu0 %4220 }
 0x5fd   : > { %8011 = vmatmul.mubr.msk.bf16.vlgmr.msra.gmra.mrb[40].mxu0 %vm2810_vm1, %v3445_v15 }
 0x5fe   : > { %8021 = vmatpush3.bf16.xpose.msra.mxu0 %v3585_v21  ;;  %8022 = vmatprep.mubr.msk.bf16.mxu0 %vm9620_vm0, %v9619_v28 }
 0x5ff   : > { %8032 = vmatprep.subr.bf16.mxu0 %v9619_v28 }
 0x605   : > { %8023 = vmatmul.mubr.msk.bf16.vlgmr.msra.gmra.mrb[44].mxu0 %vm2810_vm1, %v3578_v23 }
 0x606   : > { %8033 = vmatpush3.bf16.xpose.msra.mxu0 %v3716_v20  ;;  %8034 = vmatprep.mubr.msk.bf16.mxu0 %vm9620_vm0, %v9619_v28 }
 0x607   : > { %8044 = vmatprep.subr.bf16.mxu0 %v9619_v28 }
 0x60d   : > { %8035 = vmatmul.mubr.msk.bf16.vlgmr.msra.gmra.mrb[48].mxu0 %vm2810_vm1, %v3709_v24 }
 0x60e   : > { %8045 = vmatpush3.bf16.xpose.msra.mxu0 %v3843_v25  ;;  %8046 = vmatprep.mubr.msk.bf16.mxu0 %vm9620_vm0, %v9619_v28 }
 0x60f   : > { %8056 = vmatprep.subr.bf16.mxu0 %v9619_v28 }
 0x615   : > { %8047 = vmatmul.mubr.msk.bf16.vlgmr.msra.gmra.mrb[52].mxu0 %vm2810_vm1, %v10532_v19  ;;  %v4228_v19 = vsel %vm2810_vm1, %v4223_v6, 0 }
 0x616   : > { %8057 = vmatpush3.bf16.xpose.msra.mxu0 %v3965_v26  ;;  %8058 = vmatprep.mubr.msk.bf16.mxu0 %vm9620_vm0, %v9619_v28 }
 0x617   : > { %8068 = vmatprep.subr.bf16.mxu0 %v9619_v28 }
 0x61d   : > { %8059 = vmatmul.mubr.msk.bf16.vlgmr.msra.gmra.mrb[56].mxu0 %vm2810_vm1, %v3957_v27 }
 0x61e   : > { %8069 = vmatpush3.bf16.xpose.msra.mxu0 %v4097_v52  ;;  %8070 = vmatprep.mubr.msk.bf16.mxu0 %vm9620_vm0, %v9619_v28 }
 0x61f   : > { %8080 = vmatprep.subr.bf16.mxu0 %v9619_v28 }
 0x625   : > { %8071 = vmatmul.mubr.msk.bf16.vlgmr.msra.gmra.mrb[60].mxu0 %vm2810_vm1, %v4090_v29 }
 0x626   : > { %8081 = vmatpush3.bf16.xpose.msra.mxu0 %v4228_v19  ;;  %8082 = vmatprep.mubr.msk.bf16.mxu0 %vm9620_vm0, %v9619_v28 }
 0x62d   : > { %8083 = vmatmul.mubr.msk.bf16.vlgmr.msra.gmra.mrb[64].mxu0 %vm2810_vm1, %v4221_v32 }
 0x6b0   : > { %v10699_v33 = vpop.f32.mrb[24].mxu0 }
 0x6b1   : > { %v7970_v34 = vpop.f32.mrb[25].mxu0 }
 0x6b2   : > { %v10701_v35 = vpop.f32.mrb[26].mxu0 }
 0x6b3   : > { %v7971_v56 = vpop.f32.mrb[27].mxu0 }
 0x6b8   : > { %v3107_v38 = vpop.f32.mrb[28].mxu0 }
 0x6b9   : > { %v10704_v39 = vadd.f32 %v10569_v8, %v3107_v38  ;;  %v7976_v40 = vpop.f32.mrb[29].mxu0 }
 0x6ba   : > { %v3110_v41 = vpop.f32.mrb[30].mxu0 }
 0x6bb   : > { %v10707_v42 = vadd.f32 %v10569_v8, %v3110_v41  ;;  %v7977_v43 = vpop.f32.mrb[31].mxu0  ;;  %v3114_v44 = vsel %vm2858_vm2, %v10704_v39, -inf }
 0x6bc   : > { %3115 = vmax.xlane.f32.xlu1 %v3114_v44 }
 0x6bd   : > { %v3117_v45 = vsel %vm2858_vm2, %v10707_v42, -inf }
 0x6be   : > { %3118 = vmax.xlane.f32.xlu0 %v3117_v45 }
 0x6c0   : > { %v3239_v47 = vpop.f32.mrb[32].mxu0 }
 0x6c1   : > { %v10714_v17 = vadd.f32 %v10569_v8, %v3239_v47  ;;  %v7988_v18 = vpop.f32.mrb[33].mxu0 }
 0x6c2   : > { %v3242_v55 = vpop.f32.mrb[34].mxu0 }
 0x6c3   : > { %v10717_v57 = vadd.f32 %v10569_v8, %v3242_v55  ;;  %v7989_v58 = vpop.f32.mrb[35].mxu0  ;;  %v3246_v59 = vsel %vm2858_vm2, %v10714_v17, -inf }
 0x6c4   : > { %3247 = vmax.xlane.f32.xlu0 %v3246_v59 }
 0x6c5   : > { %v3249_v60 = vsel %vm2858_vm2, %v10717_v57, -inf }
 0x6c8   : > { %3250 = vmax.xlane.f32.xlu0 %v3249_v60  ;;  %v3367_v61 = vpop.f32.mrb[36].mxu0 }
 0x6c9   : > { %v10724_v62 = vadd.f32 %v10569_v8, %v3367_v61  ;;  %v8000_v63 = vpop.f32.mrb[37].mxu0 }
 0x6ca   : > { %v3370_v0 = vpop.f32.mrb[38].mxu0 }
 0x6cb   : > { %v10727_v53 = vadd.f32 %v10569_v8, %v3370_v0  ;;  %v8001_v3 = vpop.f32.mrb[39].mxu0  ;;  %v3374_v4 = vsel %vm2858_vm2, %v10724_v62, -inf }
 0x6cc   : > { %3375 = vmax.xlane.f32.xlu1 %v3374_v4 }
 0x6cd   : > { %v3377_v5 = vsel %vm2858_vm2, %v10727_v53, -inf }
 0x6ce   : > { %3378 = vmax.xlane.f32.xlu0 %v3377_v5 }
 0x6d0   : > { %v3489_v6 = vpop.f32.mrb[40].mxu0 }
 0x6d1   : > { %v10734_v9 = vadd.f32 %v10569_v8, %v3489_v6  ;;  %v8012_v10 = vpop.f32.mrb[41].mxu0 }
 0x6d2   : > { %v3492_v11 = vpop.f32.mrb[42].mxu0 }
 0x6d3   : > { %v10737_v12 = vadd.f32 %v10569_v8, %v3492_v11  ;;  %v8013_v13 = vpop.f32.mrb[43].mxu0  ;;  %v3496_v15 = vsel %vm2858_vm2, %v10734_v9, -inf }
 0x6d4   : > { %3497 = vmax.xlane.f32.xlu1 %v3496_v15 }
 0x6d5   : > { %v3499_v16 = vsel %vm2858_vm2, %v10737_v12, -inf }
 0x6d6   : > { %3500 = vmax.xlane.f32.xlu0 %v3499_v16 }
 0x6d8   : > { %v3621_v46 = vpop.f32.mrb[44].mxu0 }
 0x6d9   : > { %v10744_v21 = vadd.f32 %v10569_v8, %v3621_v46  ;;  %v8024_v23 = vpop.f32.mrb[45].mxu0 }
 0x6da   : > { %v3624_v20 = vpop.f32.mrb[46].mxu0 }
 0x6db   : > { %v10747_v24 = vadd.f32 %v10569_v8, %v3624_v20  ;;  %v8025_v25 = vpop.f32.mrb[47].mxu0  ;;  %v3628_v26 = vsel %vm2858_vm2, %v10744_v21, -inf }
 0x6dc   : > { %3629 = vmax.xlane.f32.xlu0 %v3628_v26 }
 0x6dd   : > { %v3631_v27 = vsel %vm2858_vm2, %v10747_v24, -inf }
 0x6e0   : > { %3632 = vmax.xlane.f32.xlu0 %v3631_v27  ;;  %v3752_v52 = vpop.f32.mrb[48].mxu0 }
 0x6e1   : > { %v10754_v29 = vadd.f32 %v10569_v8, %v3752_v52  ;;  %v8036_v19 = vpop.f32.mrb[49].mxu0 }
 0x6e2   : > { %v3755_v32 = vpop.f32.mrb[50].mxu0 }
 0x6e3   : > { %v10757_v34 = vadd.f32 %v10569_v8, %v3755_v32  ;;  %v8037_v56 = vpop.f32.mrb[51].mxu0  ;;  %v3759_v38 = vsel %vm2858_vm2, %v10754_v29, -inf  ;;  %v10806_v32 = vpop.permute.xlu1 %3516 }
 0x6e4   : > { %3760 = vmax.xlane.f32.xlu1 %v3759_v38  ;;  %v3266_v56 = vpop.permute.xlu0 %3265 }
 0x6e5   : > { %v3762_v40 = vsel %vm2858_vm2, %v10757_v34, -inf }
 0x6e6   : > { %3763 = vmax.xlane.f32.xlu0 %v3762_v40 }
 0x6e8   : > { %v3879_v41 = vpop.f32.mrb[52].mxu0 }
 0x6e9   : > { %v8048_v43 = vpop.f32.mrb[53].mxu0  ;;  %v10768_v6 = vadd.f32 %v10569_v8, %v3879_v41 }
 0x6ea   : > { %v3882_v44 = vpop.f32.mrb[54].mxu0 }
 0x6eb   : > { %v8049_v45 = vpop.f32.mrb[55].mxu0  ;;  %v10774_v11 = vadd.f32 %v10569_v8, %v3882_v44  ;;  %v3886_v13 = vsel %vm2858_vm2, %v10768_v6, -inf }
 0x6ed   : > { %v3889_v46 = vsel %vm2858_vm2, %v10774_v11, -inf }
 0x6f0   : > { %v4001_v47 = vpop.f32.mrb[56].mxu0 }
 0x6f1   : > { %v8060_v18 = vpop.f32.mrb[57].mxu0  ;;  %v10771_v10 = vadd.f32 %v10569_v8, %v4001_v47 }
 0x6f2   : > { %v4004_v55 = vpop.f32.mrb[58].mxu0 }
 0x6f3   : > { %v8061_v58 = vpop.f32.mrb[59].mxu0  ;;  %v10779_v15 = vadd.f32 %v10569_v8, %v4004_v55  ;;  %v4008_v16 = vsel %vm2858_vm2, %v10771_v10, -inf }
 0x6f5   : > { %3778 = vrot.lane.b32.xlu1 %v10557_v54, %s9622_s23  ;;  %v4011_v20 = vsel %vm2858_vm2, %v10779_v15, -inf }
 0x6f8   : > { %v4133_v59 = vpop.f32.mrb[60].mxu0 }
 0x6f9   : > { %v8072_v60 = vpop.f32.mrb[61].mxu0  ;;  %v10811_v45 = vadd.f32 %v10569_v8, %v4133_v59 }
 0x6fa   : > { %v4136_v61 = vpop.f32.mrb[62].mxu0 }
 0x6fb   : > { %v8073_v63 = vpop.f32.mrb[63].mxu0  ;;  %v10786_v23 = vadd.f32 %v10569_v8, %v4136_v61  ;;  %v4140_v55 = vsel %vm2858_vm2, %v10811_v45, -inf }
 0x6fc   : > { %3647 = vrot.lane.b32.xlu0 %v10557_v54, %s9623_s28 }
 0x6fd   : > { %v4143_v26 = vsel %vm2858_vm2, %v10786_v23, -inf }
 0x700   : > { %v4264_v0 = vpop.f32.mrb[64].mxu0 }
 0x701   : > { %v8084_v3 = vpop.f32.mrb[65].mxu0  ;;  %v10791_v25 = vadd.f32 %v10569_v8, %v4264_v0 }
 0x702   : > { %v4267_v4 = vpop.f32.mrb[66].mxu0 }
 0x703   : > { %v8085_v5 = vpop.f32.mrb[67].mxu0  ;;  %v10796_v27 = vadd.f32 %v10569_v8, %v4267_v4  ;;  %v4271_v52 = vsel %vm2858_vm2, %v10791_v25, -inf }
 0x705   : > { %v4274_v19 = vsel %vm2858_vm2, %v10796_v27, -inf }
 0x719   : > { %3887 = vmax.xlane.f32.xlu1 %v3886_v13 }
 0x71b   : > { %4009 = vmax.xlane.f32.xlu0 %v4008_v16 }
 0x71d   : > { %3890 = vmax.xlane.f32.xlu1 %v3889_v46 }
 0x71f   : > { %4012 = vmax.xlane.f32.xlu0 %v4011_v20 }
 0x723   : > { %4144 = vmax.xlane.f32.xlu0 %v4143_v26 }
 0x727   : > { %4272 = vmax.xlane.f32.xlu0 %v4271_v52 }
 0x72b   : > { %4275 = vmax.xlane.f32.xlu0 %v4274_v19 }
 0x72e   : > { %4028 = vrot.lane.b32.xlu1 %v10562_v7, %s9621_s2 }
 0x741   : > { %4159 = vrot.lane.b32.xlu0 %v10562_v7, %s9623_s28 }
 0x749   : > { %v3116_v38 = vpop.xlane.xlu1 %3115 }
 0x74a   : > { %v3120_v40 = vsub.f32 %v10704_v39, %v3116_v38 }
 0x74b   : > { %v3119_v41 = vpop.xlane.xlu0 %3118 }
 0x74c   : > { %v3122_v43 = vmul.f32 1.442695, %v3120_v40  ;;  %v3121_v44 = vsub.f32 %v10707_v42, %v3119_v41 }
 0x74e   : > { %v3124_v47 = vmul.f32 1.442695, %v3121_v44  ;;  %9030 = vpow2.f32 %v3122_v43 }
 0x750   : > { %9032 = vpow2.f32 %v3124_v47 }
 0x751   : > { %v3248_v18 = vpop.xlane.xlu0 %3247 }
 0x752   : > { %v3252_v58 = vsub.f32 %v10714_v17, %v3248_v18  ;;  %4141 = vmax.xlane.f32.xlu1 %v4140_v55 }
 0x754   : > { %v3254_v60 = vmul.f32 1.442695, %v3252_v58 }
 0x755   : > { %v3251_v61 = vpop.xlane.xlu0 %3250 }
 0x756   : > { %v3253_v39 = vsub.f32 %v10717_v57, %v3251_v61  ;;  %9034 = vpow2.f32 %v3254_v60  ;;  %v2874_v57 = vsel %vm2858_vm2, %v10577_v31, 0.0 }
 0x758   : > { %v3256_v63 = vmul.f32 1.442695, %v3253_v39  ;;  %v10817_v0 = vpop.eup %9030 }
 0x759   : > { %v3376_v8 = vpop.xlane.xlu1 %3375 }
 0x75a   : > { %v9033_v42 = vpop.eup %9032  ;;  %9036 = vpow2.f32 %v3256_v63  ;;  %v3380_v59 = vsub.f32 %v10724_v62, %v3376_v8 }
 0x75b   : > { %v3379_v3 = vpop.xlane.xlu0 %3378  ;;  %v3132_v4 = vpack.c.bf16 %v9033_v42, %v10817_v0  ;;  %v3129_v20 = vsel %vm2858_vm2, %v9033_v42, 0.0 }
 0x75c   : > { %v3381_v5 = vsub.f32 %v10727_v53, %v3379_v3  ;;  %v3382_v17 = vmul.f32 1.442695, %v3380_v59 }
 0x75d   : > { %7981 = vmatmul.mubr.msk.bf16.vlgmr.msra.gmra.mrb[12].mxu1 %vm2858_vm2, %v3132_v4 }
 0x75e   : > { %v3384_v13 = vmul.f32 1.442695, %v3381_v5  ;;  %7991 = vmatpush3.bf16.msra.mxu1 %v3266_v56  ;;  %7992 = vmatprep.mubr.msk.bf16.mxu1 %vm9620_vm0, %v9619_v28 }
 0x75f   : > { %8002 = vmatprep.subr.bf16.mxu1 %v9619_v28 }
 0x760   : > { %9038 = vpow2.f32 %v3384_v13  ;;  %2875 = vadd.xlane.f32.xlu0 %v2874_v57  ;;  %v10829_v53 = vpop.eup %9034 }
 0x761   : > { %v3498_v62 = vpop.xlane.xlu1 %3497  ;;  %9040 = vpow2.f32 %v3382_v17 }
 0x762   : > { %v3502_v16 = vsub.f32 %v10734_v9, %v3498_v62 }
 0x763   : > { %v3501_v46 = vpop.xlane.xlu0 %3500  ;;  %4290 = vrot.lane.b32.xlu1 %v10562_v7, %s9622_s23 }
 0x764   : > { %v9037_v26 = vpop.eup %9036  ;;  %v3503_v52 = vsub.f32 %v10737_v12, %v3501_v46  ;;  %3130 = vadd.xlane.f32.xlu0 %v3129_v20  ;;  %v3504_v19 = vmul.f32 1.442695, %v3502_v16  ;;  %v2993_v16 = vsel %vm2858_vm2, %v10638_v1, 0.0  ;;  %v2996_v46 = vsel %vm2858_vm2, %v10640_v2, 0.0 }
 0x765   : > { %v3264_v31 = vpack.c.bf16 %v9037_v26, %v10829_v53  ;;  %v3261_v9 = vsel %vm2858_vm2, %v9037_v26, 0.0  ;;  %v2871_v20 = vsel %vm2858_vm2, %v10575_v30, 0.0 }
 0x766   : > { %v3506_v56 = vmul.f32 1.442695, %v3503_v52 }
 0x767   : > { %7993 = vmatmul.mubr.msk.bf16.vlgmr.msra.gmra.mrb[16].mxu1 %vm2858_vm2, %v3264_v31 }
 0x768   : > { %9042 = vpow2.f32 %v3506_v56  ;;  %8003 = vmatpush3.bf16.msra.mxu1 %v10557_v54  ;;  %3262 = vadd.xlane.f32.xlu0 %v3261_v9 }
 0x769   : > { %v3630_v38 = vpop.xlane.xlu0 %3629  ;;  %8004 = vmatprep.mubr.msk.bf16.mxu1 %vm9620_vm0, %v9619_v28  ;;  %8014 = vmatprep.subr.bf16.mxu1 %v9619_v28  ;;  %9044 = vpow2.f32 %v3504_v19 }
 0x76a   : > { %v9039_v12 = vpop.eup %9038  ;;  %v3634_v40 = vsub.f32 %v10744_v21, %v3630_v38 }
 0x76b   : > { %v3389_v41 = vsel %vm2858_vm2, %v9039_v12, 0.0  ;;  %v10844_v43 = vpop.eup %9040 }
 0x76c   : > { %3390 = vadd.xlane.f32.xlu0 %v3389_v41  ;;  %v3636_v44 = vmul.f32 1.442695, %v3634_v40  ;;  %v3392_v54 = vpack.c.bf16 %v9039_v12, %v10844_v43 }
 0x76d   : > { %v3633_v47 = vpop.xlane.xlu0 %3632 }
 0x76e   : > { %v3635_v18 = vsub.f32 %v10747_v24, %v3633_v47  ;;  %9046 = vpow2.f32 %v3636_v44 }
 0x76f   : > { %8005 = vmatmul.mubr.msk.bf16.vlgmr.msra.gmra.mrb[20].mxu1 %vm2858_vm2, %v3392_v54 }
 0x770   : > { %v3638_v55 = vmul.f32 1.442695, %v3635_v18  ;;  %8015 = vmatpush3.bf16.msra.mxu1 %v10806_v32  ;;  %8016 = vmatprep.mubr.msk.bf16.mxu1 %vm9620_vm0, %v9619_v28 }
 0x771   : > { %v3761_v21 = vpop.xlane.xlu1 %3760  ;;  %8026 = vmatprep.subr.bf16.mxu1 %v9619_v28 }
 0x772   : > { %v9043_v58 = vpop.eup %9042  ;;  %9048 = vpow2.f32 %v3638_v55  ;;  %v3765_v60 = vsub.f32 %v10754_v29, %v3761_v21 }
 0x773   : > { %v3764_v61 = vpop.xlane.xlu0 %3763  ;;  %v3511_v39 = vsel %vm2858_vm2, %v9043_v58, 0.0  ;;  %v10855_v24 = vpop.eup %9044 }
 0x774   : > { %v3766_v63 = vsub.f32 %v10757_v34, %v3764_v61  ;;  %3512 = vadd.xlane.f32.xlu0 %v3511_v39  ;;  %v3514_v32 = vpack.c.bf16 %v9043_v58, %v10855_v24  ;;  %v3767_v8 = vmul.f32 1.442695, %v3765_v60 }
 0x775   : > { %v3779_v5 = vpop.permute.xlu1 %3778 }
 0x776   : > { %v3769_v42 = vmul.f32 1.442695, %v3766_v63 }
 0x777   : > { %8017 = vmatmul.mubr.msk.bf16.vlgmr.msra.gmra.mrb[24].mxu1 %vm2858_vm2, %v3514_v32  ;;  %v3648_v59 = vpop.permute.xlu0 %3647 }
 0x778   : > { %9050 = vpow2.f32 %v3769_v42  ;;  %8027 = vmatpush3.bf16.msra.mxu1 %v3648_v59  ;;  %8028 = vmatprep.mubr.msk.bf16.mxu1 %vm9620_vm0, %v9619_v28  ;;  %v10863_v29 = vpop.eup %9046 }
 0x779   : > { %8038 = vmatprep.subr.bf16.mxu1 %v9619_v28  ;;  %9052 = vpow2.f32 %v3767_v8 }
 0x77c   : > { %v9049_v3 = vpop.eup %9048 }
 0x77d   : > { %v3643_v34 = vsel %vm2858_vm2, %v9049_v3, 0.0  ;;  %v3646_v4 = vpack.c.bf16 %v9049_v3, %v10863_v29 }
 0x77e   : > { %3644 = vadd.xlane.f32.xlu0 %v3643_v34 }
 0x77f   : > { %8029 = vmatmul.mubr.msk.bf16.vlgmr.msra.gmra.mrb[28].mxu1 %vm2858_vm2, %v3646_v4 }
 0x780   : > { %8039 = vmatpush3.bf16.msra.mxu1 %v3779_v5  ;;  %8040 = vmatprep.mubr.msk.bf16.mxu1 %vm9620_vm0, %v9619_v28 }
 0x781   : > { %8050 = vmatprep.subr.bf16.mxu1 %v9619_v28 }
 0x782   : > { %v9051_v17 = vpop.eup %9050 }
 0x783   : > { %v3774_v13 = vsel %vm2858_vm2, %v9051_v17, 0.0  ;;  %v10872_v57 = vpop.eup %9052 }
 0x784   : > { %3775 = vadd.xlane.f32.xlu0 %v3774_v13  ;;  %v3777_v62 = vpack.c.bf16 %v9051_v17, %v10872_v57 }
 0x787   : > { %8041 = vmatmul.mubr.msk.bf16.vlgmr.msra.gmra.mrb[32].mxu1 %vm2858_vm2, %v3777_v62  ;;  %2994 = vadd.xlane.f32.xlu1 %v2993_v16 }
 0x788   : > { %8051 = vmatpush3.bf16.msra.mxu1 %v10562_v7  ;;  %8052 = vmatprep.mubr.msk.bf16.mxu1 %vm9620_vm0, %v9619_v28 }
 0x789   : > { %8062 = vmatprep.subr.bf16.mxu1 %v9619_v28 }
 0x78b   : > { %2997 = vadd.xlane.f32.xlu1 %v2996_v46 }
 0x78f   : > { %2872 = vadd.xlane.f32.xlu1 %v2871_v20 }
 0x7a6   : > { %v3888_v26 = vpop.xlane.xlu1 %3887 }
 0x7a7   : > { %v3892_v1 = vsub.f32 %v10768_v6, %v3888_v26 }
 0x7a8   : > { %v4010_v52 = vpop.xlane.xlu0 %4009 }
 0x7a9   : > { %v3894_v31 = vmul.f32 1.442695, %v3892_v1  ;;  %v4014_v2 = vsub.f32 %v10771_v10, %v4010_v52 }
 0x7aa   : > { %v3891_v19 = vpop.xlane.xlu1 %3890 }
 0x7ab   : > { %v3893_v7 = vsub.f32 %v10774_v11, %v3891_v19  ;;  %9054 = vpow2.f32 %v3894_v31  ;;  %v4016_v41 = vmul.f32 1.442695, %v4014_v2 }
 0x7ac   : > { %v4013_v56 = vpop.xlane.xlu0 %4012 }
 0x7ad   : > { %v3896_v9 = vmul.f32 1.442695, %v3893_v7  ;;  %v4015_v38 = vsub.f32 %v10779_v15, %v4013_v56 }
 0x7ae   : > { %v4029_v21 = vpop.permute.xlu1 %4028 }
 0x7af   : > { %9056 = vpow2.f32 %v3896_v9  ;;  %v4018_v12 = vmul.f32 1.442695, %v4015_v38 }
 0x7b0   : > { %v4145_v40 = vpop.xlane.xlu0 %4144 }
 0x7b1   : > { %9058 = vpow2.f32 %v4018_v12  ;;  %v4147_v30 = vsub.f32 %v10786_v23, %v4145_v40 }
 0x7b3   : > { %v4150_v6 = vmul.f32 1.442695, %v4147_v30 }
 0x7b4   : > { %v4273_v44 = vpop.xlane.xlu0 %4272 }
 0x7b5   : > { %9060 = vpow2.f32 %v4150_v6  ;;  %v10891_v47 = vpop.eup %9054  ;;  %v4277_v3 = vsub.f32 %v10791_v25, %v4273_v44 }
 0x7b6   : > { %9062 = vpow2.f32 %v4016_v41 }
 0x7b7   : > { %v4279_v34 = vmul.f32 1.442695, %v4277_v3 }
 0x7b8   : > { %v4276_v11 = vpop.xlane.xlu0 %4275 }
 0x7b9   : > { %v10893_v54 = vpop.eup %9056  ;;  %v4278_v15 = vsub.f32 %v10796_v27, %v4276_v11 }
 0x7ba   : > { %v3904_v10 = vpack.c.bf16 %v10893_v54, %v10891_v47 }
 0x7bb   : > { %v9059_v18 = vpop.eup %9058  ;;  %v4281_v55 = vmul.f32 1.442695, %v4278_v15 }
 0x7bc   : > { %8053 = vmatmul.mubr.msk.bf16.vlgmr.msra.gmra.mrb[36].mxu1 %vm2858_vm2, %v3904_v10  ;;  %v4023_v23 = vsel %vm2858_vm2, %v9059_v18, 0.0  ;;  %v4160_v39 = vpop.permute.xlu0 %4159 }
 0x7bd   : > { %9064 = vpow2.f32 %v4281_v55  ;;  %8063 = vmatpush3.bf16.msra.mxu1 %v4029_v21  ;;  %4024 = vadd.xlane.f32.xlu0 %v4023_v23 }
 0x7be   : > { %8064 = vmatprep.mubr.msk.bf16.mxu1 %vm9620_vm0, %v9619_v28  ;;  %8074 = vmatprep.subr.bf16.mxu1 %v9619_v28 }
 0x7bf   : > { %v9061_v58 = vpop.eup %9060 }
 0x7c0   : > { %v4155_v27 = vsel %vm2858_vm2, %v9061_v58, 0.0  ;;  %v10904_v60 = vpop.eup %9062 }
 0x7c1   : > { %4156 = vadd.xlane.f32.xlu0 %v4155_v27  ;;  %v4026_v61 = vpack.c.bf16 %v9059_v18, %v10904_v60 }
 0x7c4   : > { %8065 = vmatmul.mubr.msk.bf16.vlgmr.msra.gmra.mrb[40].mxu1 %vm2858_vm2, %v4026_v61 }
 0x7c5   : > { %8075 = vmatpush3.bf16.msra.mxu1 %v4160_v39  ;;  %8076 = vmatprep.mubr.msk.bf16.mxu1 %vm9620_vm0, %v9619_v28  ;;  %v3126_v39 = vsel %vm2858_vm2, %v10817_v0, 0.0 }
 0x7c6   : > { %8086 = vmatprep.subr.bf16.mxu1 %v9619_v28 }
 0x7c7   : > { %v9065_v63 = vpop.eup %9064 }
 0x7c8   : > { %v4286_v32 = vsel %vm2858_vm2, %v9065_v63, 0.0 }
 0x7c9   : > { %4287 = vadd.xlane.f32.xlu0 %v4286_v32 }
 0x7df   : > { %v4142_v8 = vpop.xlane.xlu1 %4141 }
 0x7e0   : > { %v4146_v42 = vsub.f32 %v10811_v45, %v4142_v8 }
 0x7e2   : > { %v4148_v59 = vmul.f32 1.442695, %v4146_v42 }
 0x7e3   : > { %v4291_v13 = vpop.permute.xlu1 %4290 }
 0x7e4   : > { %9066 = vpow2.f32 %v4148_v59 }
 0x7e5   : > { %9068 = vpow2.f32 %v4279_v34  ;;  %v3258_v34 = vsel %vm2858_vm2, %v10829_v53, 0.0  ;;  %v3640_v53 = vsel %vm2858_vm2, %v10863_v29, 0.0 }
 0x7ed   : > { %v2876_v4 = vpop.xlane.xlu0 %2875 }
 0x7ee   : > { %v10914_v5 = vpop.eup %9066  ;;  %9070 = vrcp.f32 %v2876_v4 }
 0x7ef   : > { %v4158_v17 = vpack.c.bf16 %v9061_v58, %v10914_v5  ;;  %v10920_v45 = vpop.eup %9068  ;;  %v4152_v29 = vsel %vm2858_vm2, %v10914_v5, 0.0 }
 0x7f0   : > { %v4289_v25 = vpack.c.bf16 %v9065_v63, %v10920_v45 }
 0x7f1   : > { %8077 = vmatmul.mubr.msk.bf16.vlgmr.msra.gmra.mrb[44].mxu1 %vm2858_vm2, %v4158_v17  ;;  %v3131_v7 = vpop.xlane.xlu0 %3130  ;;  %v3386_v17 = vsel %vm2858_vm2, %v10844_v43, 0.0 }
 0x7f2   : > { %8087 = vmatpush3.bf16.msra.mxu1 %v4291_v13  ;;  %8088 = vmatprep.mubr.msk.bf16.mxu1 %vm9620_vm0, %v9619_v28 }
 0x7f5   : > { %v3263_v9 = vpop.xlane.xlu0 %3262 }
 0x7f8   : > { %v9071_v62 = vpop.eup %9070 }
 0x7f9   : > { %8089 = vmatmul.mubr.msk.bf16.vlgmr.msra.gmra.mrb[48].mxu1 %vm2858_vm2, %v4289_v25  ;;  %v2925_v16 = vmul.f32 %v9071_v62, %v10591_v37 }
 0x7fb   : > { %2927 = vst.msk [vmem:[#allocation3 + $0x18] sm:$0xff] %vm2810_vm1, %v2925_v16 }
 0x814   : > { %v2995_v46 = vpop.xlane.xlu1 %2994 }
 0x815   : > { %9072 = vrcp.f32 %v2995_v46 }
 0x818   : > { %v2998_v20 = vpop.xlane.xlu1 %2997 }
 0x819   : > { %9074 = vrcp.f32 %v2998_v20  ;;  %v3508_v20 = vsel %vm2858_vm2, %v10855_v24, 0.0  ;;  %v4020_v24 = vsel %vm2858_vm2, %v10904_v60, 0.0 }
 0x81c   : > { %v2873_v26 = vpop.xlane.xlu1 %2872 }
 0x81d   : > { %9076 = vrcp.f32 %v2873_v26 }
 0x81e   : > { %9078 = vrcp.f32 %v3131_v7  ;;  %v3771_v7 = vsel %vm2858_vm2, %v10872_v57, 0.0 }
 0x81f   : > { %v9073_v1 = vpop.eup %9072  ;;  %9080 = vrcp.f32 %v3263_v9 }
 0x820   : > { %v3050_v52 = vmul.f32 %v9073_v1, %v10699_v33 }
 0x822   : > { %3054 = vrot.lane.b32.xlu1 %v3050_v52, %s9622_s23 }
 0x823   : > { %v9075_v31 = vpop.eup %9074 }
 0x824   : > { %v3051_v19 = vmul.f32 %v9075_v31, %v10701_v35  ;;  %v3391_v35 = vpop.xlane.xlu0 %3390 }
 0x825   : > { %9082 = vrcp.f32 %v3391_v35 }
 0x826   : > { %3056 = vrot.lane.b32.xlu1 %v3051_v19, %s9622_s23 }
 0x827   : > { %v9077_v37 = vpop.eup %9076 }
 0x828   : > { %v2924_v56 = vmul.f32 %v9077_v37, %v10589_v36  ;;  %v9079_v12 = vpop.eup %9078  ;;  %v3513_v10 = vpop.xlane.xlu0 %3512  ;;  %v4283_v37 = vsel %vm2858_vm2, %v10920_v45, 0.0 }
 0x829   : > { %v9081_v44 = vpop.eup %9080  ;;  %9084 = vrcp.f32 %v3513_v10  ;;  %v8654_v10 = vld [vmem:[%s10194_s24] ss:$12 sps:$4 sm:$0xff]  }
 0x82a   : > { %2926 = vst.msk [vmem:[#allocation3] sm:$0xff] %vm2810_vm1, %v2924_v56  ;;  %v3901_v56 = vsel %vm2858_vm2, %v10893_v54, 0.0 }
 0x82c   : > { %v3645_v61 = vpop.xlane.xlu0 %3644 }
 0x82d   : > { %9086 = vrcp.f32 %v3645_v61  ;;  %v8665_v61 = vld [vmem:[%s10194_s24 + $0x4c] ss:$12 sps:$4 sm:$0xff]  }
 0x82f   : > { %v9083_v21 = vpop.eup %9082 }
 0x830   : > { %v10932_v38 = vpop.f32.mrb[12].mxu1  ;;  %v3776_v4 = vpop.xlane.xlu0 %3775 }
 0x831   : > { %v7982_v2 = vpop.f32.mrb[13].mxu1  ;;  %9088 = vrcp.f32 %v3776_v4 }
 0x832   : > { %v3176_v33 = vpop.f32.mrb[14].mxu1 }
 0x833   : > { %v3183_v40 = vmul.f32 %v9079_v12, %v3176_v33  ;;  %v7983_v30 = vpop.f32.mrb[15].mxu1  ;;  %v9085_v8 = vpop.eup %9084 }
 0x835   : > { %3188 = vrot.lane.b32.xlu0 %v3183_v40, %s9623_s28 }
 0x837   : > { %v9087_v25 = vpop.eup %9086 }
 0x83a   : > { %v10935_v41 = vpop.f32.mrb[16].mxu1 }
 0x83b   : > { %v7994_v6 = vpop.f32.mrb[17].mxu1  ;;  %v9089_v1 = vpop.eup %9088 }
 0x83c   : > { %v3308_v36 = vpop.f32.mrb[18].mxu1 }
 0x83d   : > { %v3315_v11 = vmul.f32 %v9081_v44, %v3308_v36  ;;  %v7995_v15 = vpop.f32.mrb[19].mxu1 }
 0x83f   : > { %3320 = vrot.lane.b32.xlu0 %v3315_v11, %s9621_s2 }
 0x842   : > { %v10938_v18 = vpop.f32.mrb[20].mxu1 }
 0x843   : > { %v8006_v55 = vpop.f32.mrb[21].mxu1 }
 0x844   : > { %v3433_v23 = vpop.f32.mrb[22].mxu1  ;;  %v8656_v55 = vld [vmem:[%s10194_s24 + $0x4] ss:$12 sps:$4 sm:$0xff]  }
 0x845   : > { %v3440_v58 = vmul.f32 %v9083_v21, %v3433_v23  ;;  %v8007_v27 = vpop.f32.mrb[23].mxu1  ;;  %v8659_v21 = vld [vmem:[%s10194_s24 + $0x1c] ss:$12 sps:$4 sm:$0xff]   ;;  %4857 = vmatprep.subr.bf16.mxu0 %v8656_v55  ;;  %v8657_v23 = vld [vmem:[%s10194_s24 + $0x18] ss:$12 sps:$4 sm:$0xff]  }
 0x846   : > { %4858 = vmatpush1.bf16.msra.mxu0 %v8654_v10  ;;  %v8660_v27 = vld [vmem:[%s10194_s24 + $0x30] ss:$12 sps:$4 sm:$0xff]   ;;  %v8693_v10 = vld [vmem:[%s10194_s24 + $0x108] ss:$12 sps:$4 sm:$0xff]  }
 0x847   : > { %3442 = vst.msk [vmem:[#allocation3 + $0x20] sm:$0xff] %vm2810_vm1, %v3440_v58  ;;  %4859 = vmatprep.subr.bf16.mxu0 %v8659_v21  ;;  %v8662_v58 = vld [vmem:[%s10194_s24 + $0x34] ss:$12 sps:$4 sm:$0xff]   ;;  %v8696_v21 = vld [vmem:[%s10194_s24 + $0x110] ss:$12 sps:$4 sm:$0xff]  }
 0x84a   : > { %v10943_v63 = vpop.f32.mrb[24].mxu1  ;;  %3127 = vadd.xlane.f32.xlu1 %v3126_v39  ;;  %v4025_v57 = vpop.xlane.xlu0 %4024  ;;  %4860 = vmatpush1.bf16.msra.mxu0 %v8657_v23 }
 0x84b   : > { %v8018_v32 = vpop.f32.mrb[25].mxu1  ;;  %9090 = vrcp.f32 %v4025_v57  ;;  %4861 = vmatprep.subr.bf16.mxu0 %v8662_v58  ;;  %v8682_v57 = vld [vmem:[%s10194_s24 + $0x8] ss:$12 sps:$4 sm:$0xff]  }
 0x84c   : > { %v3559_v42 = vpop.f32.mrb[26].mxu1  ;;  %v8663_v32 = vld [vmem:[%s10194_s24 + $0x48] ss:$12 sps:$4 sm:$0xff]  }
 0x84d   : > { %v3566_v59 = vmul.f32 %v9085_v8, %v3559_v42  ;;  %v8019_v3 = vpop.f32.mrb[27].mxu1  ;;  %v8668_v8 = vld [vmem:[%s10194_s24 + $0x64] ss:$12 sps:$4 sm:$0xff]  }
 0x84e   : > { %3259 = vadd.xlane.f32.xlu1 %v3258_v34  ;;  %v4157_v44 = vpop.xlane.xlu0 %4156  ;;  %4862 = vmatpush1.bf16.msra.mxu0 %v8660_v27  ;;  %v8666_v3 = vld [vmem:[%s10194_s24 + $0x60] ss:$12 sps:$4 sm:$0xff]   ;;  %v8697_v27 = vld [vmem:[%s10194_s24 + $0x50] ss:$12 sps:$4 sm:$0xff]  }
 0x84f   : > { %3571 = vrot.lane.b32.xlu0 %v3566_v59, %s9622_s23  ;;  %9092 = vrcp.f32 %v4157_v44  ;;  %4863 = vmatprep.subr.bf16.mxu0 %v8665_v61  ;;  %v8692_v44 = vld [vmem:[%s10194_s24 + $0x38] ss:$12 sps:$4 sm:$0xff]  }
 0x850   : > { %v8700_v61 = vld [vmem:[%s10194_s24 + $0x124] ss:$12 sps:$4 sm:$0xff]  }
 0x852   : > { %v10950_v0 = vpop.f32.mrb[28].mxu1  ;;  %3387 = vadd.xlane.f32.xlu1 %v3386_v17  ;;  %4864 = vmatpush1.bf16.msra.mxu0 %v8663_v32  ;;  %v8671_v17 = vld [vmem:[%s10194_s24 + $0x7c] ss:$12 sps:$4 sm:$0xff]  }
 0x853   : > { %v8030_v13 = vpop.f32.mrb[29].mxu1  ;;  %4865 = vmatprep.subr.bf16.mxu0 %v8668_v8  ;;  %v8701_v8 = vld [vmem:[%s10194_s24 + $0x128] ss:$12 sps:$4 sm:$0xff]  }
 0x854   : > { %v3690_v62 = vpop.f32.mrb[30].mxu1 }
 0x855   : > { %v3697_v16 = vmul.f32 %v9087_v25, %v3690_v62  ;;  %v8031_v46 = vpop.f32.mrb[31].mxu1  ;;  %v9091_v54 = vpop.eup %9090 }
 0x856   : > { %3509 = vadd.xlane.f32.xlu1 %v3508_v20  ;;  %v10980_v36 = vpop.xlane.xlu0 %4287  ;;  %4866 = vmatpush1.bf16.msra.mxu0 %v8666_v3  ;;  %v8674_v46 = vld [vmem:[%s10194_s24 + $0x94] ss:$12 sps:$4 sm:$0xff]  }
 0x857   : > { %3702 = vrot.lane.b32.xlu0 %v3697_v16, %s9623_s28  ;;  %v8669_v16 = vld [vmem:[%s10194_s24 + $0x78] ss:$12 sps:$4 sm:$0xff]   ;;  %4867 = vmatprep.subr.bf16.mxu0 %v8671_v17 }
 0x859   : > { %v9093_v34 = vpop.eup %9092 }
 0x85a   : > { %v10957_v26 = vpop.f32.mrb[32].mxu1  ;;  %3641 = vadd.xlane.f32.xlu1 %v3640_v53  ;;  %4868 = vmatpush1.bf16.msra.mxu0 %v8669_v16 }
 0x85b   : > { %v8042_v43 = vpop.f32.mrb[33].mxu1  ;;  %4869 = vmatprep.subr.bf16.mxu0 %v8674_v46  ;;  %v8710_v46 = vld [vmem:[%s10194_s24 + $0x154] ss:$12 sps:$4 sm:$0xff]  }
 0x85c   : > { %v3821_v52 = vpop.f32.mrb[34].mxu1  ;;  %v8672_v43 = vld [vmem:[%s10194_s24 + $0x90] ss:$12 sps:$4 sm:$0xff]  }
 0x85d   : > { %v3828_v31 = vmul.f32 %v9089_v1, %v3821_v52  ;;  %v8043_v19 = vpop.f32.mrb[35].mxu1  ;;  %v8677_v52 = vld [vmem:[%s10194_s24 + $0xac] ss:$12 sps:$4 sm:$0xff]  }
 0x85e   : > { %3772 = vadd.xlane.f32.xlu1 %v3771_v7  ;;  %4870 = vmatpush1.bf16.msra.mxu0 %v8672_v43  ;;  %v8675_v7 = vld [vmem:[%s10194_s24 + $0xa8] ss:$12 sps:$4 sm:$0xff]   ;;  %v8708_v43 = vld [vmem:[%s10194_s24 + $0x150] ss:$12 sps:$4 sm:$0xff]  }
 0x85f   : > { %3833 = vrot.lane.b32.xlu0 %v3828_v31, %s9621_s2  ;;  %4871 = vmatprep.subr.bf16.mxu0 %v8677_v52 }
 0x862   : > { %4021 = vadd.xlane.f32.xlu1 %v4020_v24  ;;  %v8680_v24 = vld [vmem:[%s10194_s24 + $0xc4] ss:$12 sps:$4 sm:$0xff]   ;;  %4872 = vmatpush1.bf16.msra.mxu0 %v8675_v7  ;;  %v8715_v7 = vld [vmem:[%s10194_s24 + $0x16c] ss:$12 sps:$4 sm:$0xff]  }
 0x863   : > { %4873 = vmatprep.subr.bf16.mxu0 %v8680_v24  ;;  %v8716_v24 = vld [vmem:[%s10194_s24 + $0x170] ss:$12 sps:$4 sm:$0xff]  }
 0x866   : > { %4153 = vadd.xlane.f32.xlu1 %v4152_v29  ;;  %v8678_v29 = vld [vmem:[%s10194_s24 + $0xc0] ss:$12 sps:$4 sm:$0xff]  }
 0x867   : > { %4874 = vmatpush1.bf16.msra.mxu0 %v8678_v29  ;;  %v8713_v29 = vld [vmem:[%s10194_s24 + $0x168] ss:$12 sps:$4 sm:$0xff]  }
 0x86a   : > { %4284 = vadd.xlane.f32.xlu1 %v4283_v37  ;;  %v8681_v37 = vld [vmem:[%s10194_s24 + $0xc8] ss:$12 sps:$4 sm:$0xff]  }
 0x86b   : > { %7853 = vmatprep.subr.bf16.mxu1 %v8681_v37 }
 0x86c   : > { %7854 = vmatpush3.bf16.msra.mxu1 %v8682_v57  ;;  %v8717_v57 = vld [vmem:[%s10194_s24 + $0xb0] ss:$12 sps:$4 sm:$0xff]  }
 0x87e   : > { %3902 = vadd.xlane.f32.xlu0 %v3901_v56 }
 0x88f   : > { %v10970_v9 = vpop.f32.mrb[36].mxu1 }
 0x890   : > { %v8054_v2 = vpop.f32.mrb[37].mxu1 }
 0x891   : > { %v10972_v12 = vpop.f32.mrb[38].mxu1  ;;  %v8685_v2 = vld [vmem:[%s10194_s24 + $0xdc] ss:$12 sps:$4 sm:$0xff]  }
 0x892   : > { %v8055_v60 = vpop.f32.mrb[39].mxu1  ;;  %4875 = vmatprep.subr.bf16.mxu0 %v8685_v2 }
 0x893   : > { %v8683_v60 = vld [vmem:[%s10194_s24 + $0xd8] ss:$12 sps:$4 sm:$0xff]  }
 0x894   : > { %v3055_v33 = vpop.permute.xlu1 %3054  ;;  %4876 = vmatpush1.bf16.msra.mxu0 %v8683_v60  ;;  %v8720_v60 = vld [vmem:[%s10194_s24 + $0x184] ss:$12 sps:$4 sm:$0xff]  }
 0x895   : > { %3061 = vst.msk [vmem:[#allocation3] sm:$0xff] %vm3060_vm3, %v3055_v33  ;;  %v8686_v33 = vld [vmem:[%s10194_s24 + $0xe0] ss:$12 sps:$4 sm:$0xff]  }
 0x896   : > { %7855 = vmatprep.subr.bf16.mxu1 %v8686_v33 }
 0x897   : > { %v10975_v5 = vpop.f32.mrb[40].mxu1 }
 0x898   : > { %v8066_v45 = vpop.f32.mrb[41].mxu1  ;;  %v3057_v40 = vpop.permute.xlu1 %3056 }
 0x899   : > { %3062 = vst.msk [vmem:[#allocation3 + $0x18] sm:$0xff] %vm3060_vm3, %v3057_v40  ;;  %v4071_v30 = vpop.f32.mrb[42].mxu1  ;;  %v8687_v40 = vld [vmem:[%s10194_s24 + $0x20] ss:$12 sps:$4 sm:$0xff]  }
 0x89a   : > { %v10978_v35 = vmul.f32 %v9091_v54, %v4071_v30  ;;  %v8067_v6 = vpop.f32.mrb[43].mxu1  ;;  %v8690_v54 = vld [vmem:[%s10194_s24 + $0xf4] ss:$12 sps:$4 sm:$0xff]   ;;  %v8691_v30 = vld [vmem:[%s10194_s24 + $0xf8] ss:$12 sps:$4 sm:$0xff]   ;;  %7856 = vmatpush3.bf16.msra.mxu1 %v8687_v40 }
 0x89b   : > { %v8688_v6 = vld [vmem:[%s10194_s24 + $0xf0] ss:$12 sps:$4 sm:$0xff]   ;;  %4877 = vmatprep.subr.bf16.mxu0 %v8690_v54  ;;  %7857 = vmatprep.subr.bf16.mxu1 %v8691_v30 }
 0x89c   : > { %4878 = vmatpush1.bf16.msra.mxu0 %v8688_v6 }
 0x89e   : > { %7858 = vmatpush3.bf16.msra.mxu1 %v8692_v44 }
 0x89f   : > { %7859 = vmatprep.subr.bf16.mxu1 %v8696_v21 }
 0x8a2   : > { %7860 = vmatpush3.bf16.msra.mxu1 %v8697_v27  ;;  %v8721_v27 = vld [vmem:[%s10194_s24 + $0x188] ss:$12 sps:$4 sm:$0xff]  }
 0x8a3   : > { %7861 = vmatprep.subr.bf16.mxu1 %v8701_v8  ;;  %v8725_v8 = vld [vmem:[%s10194_s24 + $0x1a0] ss:$12 sps:$4 sm:$0xff]  }
 0x8a7   : > { %v3189_v11 = vpop.permute.xlu0 %3188 }
 0x8a8   : > { %3194 = vst.msk [vmem:[#allocation3 + $0x18] sm:$0xff] %vm3192_vm4, %v3189_v11  ;;  %v8695_v11 = vld [vmem:[%s10194_s24 + $0x10c] ss:$12 sps:$4 sm:$0xff]  }
 0x8a9   : > { %4879 = vmatprep.subr.bf16.mxu0 %v8695_v11 }
 0x8aa   : > { %4880 = vmatpush1.bf16.msra.mxu0 %v8693_v10 }
 0x8ab   : > { %4881 = vmatprep.subr.bf16.mxu0 %v8700_v61 }
 0x8b1   : > { %v3321_v15 = vpop.permute.xlu0 %3320 }
 0x8b2   : > { %3326 = vst.msk [vmem:[#allocation3 + $0x18] sm:$0xff] %vm3324_vm5, %v3321_v15 }
 0x8c1   : > { %v3572_v39 = vpop.permute.xlu0 %3571 }
 0x8c2   : > { %3576 = vst.msk [vmem:[#allocation3 + $0x20] sm:$0xff] %vm3060_vm3, %v3572_v39  ;;  %v8698_v39 = vld [vmem:[%s10194_s24 + $0x120] ss:$12 sps:$4 sm:$0xff]  }
 0x8c3   : > { %4882 = vmatpush1.bf16.msra.mxu0 %v8698_v39  ;;  %v8724_v39 = vld [vmem:[%s10194_s24 + $0x19c] ss:$12 sps:$4 sm:$0xff]  }
 0x8c4   : > { %v10994_v42 = vpop.f32.mrb[44].mxu1 }
 0x8c5   : > { %v8078_v59 = vpop.f32.mrb[45].mxu1 }
 0x8c6   : > { %v4202_v4 = vpop.f32.mrb[46].mxu1 }
 0x8c7   : > { %v10998_v13 = vmul.f32 %v9093_v34, %v4202_v4  ;;  %v8079_v25 = vpop.f32.mrb[47].mxu1  ;;  %v8705_v34 = vld [vmem:[%s10194_s24 + $0x13c] ss:$12 sps:$4 sm:$0xff]   ;;  %v8703_v4 = vld [vmem:[%s10194_s24 + $0x138] ss:$12 sps:$4 sm:$0xff]  }
 0x8c8   : > { %4883 = vmatprep.subr.bf16.mxu0 %v8705_v34  ;;  %v8706_v25 = vld [vmem:[%s10194_s24 + $0x140] ss:$12 sps:$4 sm:$0xff]  }
 0x8c9   : > { %v3703_v62 = vpop.permute.xlu0 %3702  ;;  %4884 = vmatpush1.bf16.msra.mxu0 %v8703_v4  ;;  %v8732_v34 = vld [vmem:[%s10194_s24 + $0x1cc] ss:$12 sps:$4 sm:$0xff]   ;;  %v8730_v4 = vld [vmem:[%s10194_s24 + $0x1c8] ss:$12 sps:$4 sm:$0xff]  }
 0x8ca   : > { %3707 = vst.msk [vmem:[#allocation3 + $0x20] sm:$0xff] %vm3192_vm4, %v3703_v62  ;;  %4885 = vmatprep.subr.bf16.mxu0 %v8710_v46  ;;  %v8738_v46 = vld [vmem:[%s10194_s24 + $0x1f8] ss:$12 sps:$4 sm:$0xff]  }
 0x8cc   : > { %v11003_v20 = vpop.f32.mrb[48].mxu1 }
 0x8cd   : > { %v8090_v53 = vpop.f32.mrb[49].mxu1  ;;  %4886 = vmatpush1.bf16.msra.mxu0 %v8708_v43  ;;  %v8744_v43 = vld [vmem:[%s10194_s24 + $0x214] ss:$12 sps:$4 sm:$0xff]  }
 0x8ce   : > { %v11006_v1 = vpop.f32.mrb[50].mxu1  ;;  %v8711_v53 = vld [vmem:[%s10194_s24 + $0x158] ss:$12 sps:$4 sm:$0xff]   ;;  %4887 = vmatprep.subr.bf16.mxu0 %v8715_v7  ;;  %v8749_v7 = vld [vmem:[%s10194_s24 + $0x230] ss:$12 sps:$4 sm:$0xff]  }
 0x8cf   : > { %v8091_v31 = vpop.f32.mrb[51].mxu1 }
 0x8d1   : > { %v3834_v19 = vpop.permute.xlu0 %3833  ;;  %4888 = vmatpush1.bf16.msra.mxu0 %v8713_v29 }
 0x8d2   : > { %3838 = vst.msk [vmem:[#allocation3 + $0x20] sm:$0xff] %vm3324_vm5, %v3834_v19  ;;  %4900 = vmatprep.subr.bf16.mxu0 %v8720_v60 }
 0x8d7   : > { %v3128_v56 = vpop.xlane.xlu1 %3127 }
 0x8d8   : > { %9094 = vrcp.f32 %v3128_v56 }
 0x8db   : > { %v3260_v45 = vpop.xlane.xlu1 %3259 }
 0x8dc   : > { %9096 = vrcp.f32 %v3260_v45 }
 0x8df   : > { %v3388_v15 = vpop.xlane.xlu1 %3387 }
 0x8e0   : > { %9098 = vrcp.f32 %v3388_v15 }
 0x8e2   : > { %v9095_v55 = vpop.eup %9094 }
 0x8e3   : > { %v3510_v23 = vpop.xlane.xlu1 %3509  ;;  %v3182_v58 = vmul.f32 %v9095_v55, %v10932_v38  ;;  %v8702_v38 = vld [vmem:[%s10194_s24 + $0x68] ss:$12 sps:$4 sm:$0xff]   ;;  %v4355_v55 = vld [vmem:[#allocation3 + $0x20] sm:$0xff] }
 0x8e4   : > { %9100 = vrcp.f32 %v3510_v23  ;;  %7862 = vmatpush3.bf16.msra.mxu1 %v8702_v38  ;;  %v4354_v23 = vld [vmem:[#allocation3 + $0x18] sm:$0xff] }
 0x8e5   : > { %3186 = vrot.lane.b32.xlu1 %v3182_v58, %s9623_s28  ;;  %7863 = vmatprep.subr.bf16.mxu1 %v8706_v25  ;;  %v8718_v58 = vld [vmem:[%s10194_s24 + $0x180] ss:$12 sps:$4 sm:$0xff]   ;;  %v8729_v38 = vld [vmem:[%s10194_s24 + $0x1b8] ss:$12 sps:$4 sm:$0xff]  }
 0x8e6   : > { %v9097_v32 = vpop.eup %9096  ;;  %v8736_v25 = vld [vmem:[%s10194_s24 + $0x1e4] ss:$12 sps:$4 sm:$0xff]  }
 0x8e7   : > { %v3642_v59 = vpop.xlane.xlu1 %3641  ;;  %v3314_v3 = vmul.f32 %v9097_v32, %v10935_v41  ;;  %v8707_v41 = vld [vmem:[%s10194_s24 + $0x80] ss:$12 sps:$4 sm:$0xff]   ;;  %v8722_v32 = vld [vmem:[%s10194_s24 + $0x198] ss:$12 sps:$4 sm:$0xff]  }
 0x8e8   : > { %9102 = vrcp.f32 %v3642_v59  ;;  %7864 = vmatpush3.bf16.msra.mxu1 %v8707_v41  ;;  %v8728_v59 = vld [vmem:[%s10194_s24 + $0x1b4] ss:$12 sps:$4 sm:$0xff]   ;;  %v8740_v41 = vld [vmem:[%s10194_s24 + $0x1fc] ss:$12 sps:$4 sm:$0xff]  }
 0x8e9   : > { %3318 = vrot.lane.b32.xlu1 %v3314_v3, %s9621_s2  ;;  %7865 = vmatprep.subr.bf16.mxu1 %v8711_v53  ;;  %v8726_v3 = vld [vmem:[%s10194_s24 + $0x1b0] ss:$12 sps:$4 sm:$0xff]   ;;  %v8741_v53 = vld [vmem:[%s10194_s24 + $0x200] ss:$12 sps:$4 sm:$0xff]  }
 0x8ea   : > { %v9099_v17 = vpop.eup %9098 }
 0x8eb   : > { %v3773_v62 = vpop.xlane.xlu1 %3772  ;;  %v3439_v16 = vmul.f32 %v9099_v17, %v10938_v18  ;;  %v8712_v18 = vld [vmem:[%s10194_s24 + $0x98] ss:$12 sps:$4 sm:$0xff]   ;;  %v8733_v17 = vld [vmem:[%s10194_s24 + $0x1d0] ss:$12 sps:$4 sm:$0xff]  }
 0x8ec   : > { %9104 = vrcp.f32 %v3773_v62  ;;  %7866 = vmatpush3.bf16.msra.mxu1 %v8712_v18  ;;  %v8734_v62 = vld [vmem:[%s10194_s24 + $0x1e0] ss:$12 sps:$4 sm:$0xff]   ;;  %v8746_v18 = vld [vmem:[%s10194_s24 + $0x228] ss:$12 sps:$4 sm:$0xff]  }
 0x8ed   : > { %3441 = vst.msk [vmem:[#allocation3 + $0x8] sm:$0xff] %vm2810_vm1, %v3439_v16  ;;  %7867 = vmatprep.subr.bf16.mxu1 %v8716_v24  ;;  %v8737_v16 = vld [vmem:[%s10194_s24 + $0x1e8] ss:$12 sps:$4 sm:$0xff]  }
 0x8ee   : > { %v9101_v52 = vpop.eup %9100 }
 0x8ef   : > { %v4022_v31 = vpop.xlane.xlu1 %4021  ;;  %v3565_v19 = vmul.f32 %v9101_v52, %v10943_v63  ;;  %v8742_v52 = vld [vmem:[%s10194_s24 + $0x210] ss:$12 sps:$4 sm:$0xff]  }
 0x8f0   : > { %9106 = vrcp.f32 %v4022_v31  ;;  %7868 = vmatpush3.bf16.msra.mxu1 %v8717_v57  ;;  %v8745_v31 = vld [vmem:[%s10194_s24 + $0x218] ss:$12 sps:$4 sm:$0xff]  }
 0x8f1   : > { %3569 = vrot.lane.b32.xlu1 %v3565_v19, %s9622_s23  ;;  %8092 = vmatprep.subr.bf16.mxu1 %v9619_v28  ;;  %9108 = vrcp.f32 %v10980_v36  ;;  %v8748_v19 = vld [vmem:[%s10194_s24 + $0x22c] ss:$12 sps:$4 sm:$0xff]   ;;  %s11609_s24 = scalar_lea.vmem [#allocation9], %s10192_s15 }
 0x8f2   : > { %v9103_v37 = vpop.eup %9102 }
 0x8f3   : > { %v3696_v56 = vmul.f32 %v9103_v37, %v10950_v0  ;;  %v4154_v30 = vpop.xlane.xlu1 %4153 }
 0x8f5   : > { %3700 = vrot.lane.b32.xlu1 %v3696_v56, %s9623_s28 }
 0x8f6   : > { %v9105_v63 = vpop.eup %9104 }
 0x8f7   : > { %v3827_v2 = vmul.f32 %v9105_v63, %v10957_v26  ;;  %v4285_v6 = vpop.xlane.xlu1 %4284 }
 0x8f9   : > { %3831 = vrot.lane.b32.xlu1 %v3827_v2, %s9621_s2 }
 0x8fa   : > { %v9107_v33 = vpop.eup %9106 }
 0x8fb   : > { %v4077_v0 = vmul.f32 %v9107_v33, %v10975_v5  ;;  %v9109_v45 = vpop.eup %9108  ;;  %v3898_v5 = vsel %vm2858_vm2, %v10891_v47, 0.0 }
 0x8fc   : > { %v4340_v40 = vmul.f32 %v9109_v45, %v11006_v1 }
 0x8fd   : > { %4081 = vrot.lane.b32.xlu0 %v4077_v0, %s9622_s23 }
 0x901   : > { %4214 = vrot.lane.b32.xlu0 %v10998_v13, %s9623_s28 }
 0x905   : > { %4345 = vrot.lane.b32.xlu0 %v4340_v40, %s9621_s2 }
 0x90b   : > { %v3903_v26 = vpop.xlane.xlu0 %3902 }
 0x90c   : > { %9110 = vrcp.f32 %v3903_v26 }
 0x90d   : > { %9112 = vrcp.f32 %v4154_v30  ;;  %v4456_v30 = vld [vmem:[%s11609_s24] sm:$0x7] }
 0x90e   : > { %9114 = vrcp.f32 %v4285_v6  ;;  %v4469_v6 = vrot.slane %v4456_v30, %v10516_v51 }
 0x916   : > { %v9111_v54 = vpop.eup %9110 }
 0x917   : > { %v3952_v36 = vmul.f32 %v9111_v54, %v10972_v12  ;;  %v9113_v13 = vpop.eup %9112 }
 0x918   : > { %v4208_v1 = vmul.f32 %v9113_v13, %v10994_v42  ;;  %v9115_v44 = vpop.eup %9114  ;;  %v4461_v13 = vrot.slane %v4456_v30, %v10513_v50 }
 0x919   : > { %3954 = vst.msk [vmem:[#allocation3 + $0x28] sm:$0xff] %vm2810_vm1, %v3952_v36  ;;  %v4339_v12 = vmul.f32 %v9115_v44, %v11003_v20 }
 0x91d   : > { %3899 = vadd.xlane.f32.xlu1 %v3898_v5 }
 0x92e   : > { %4083 = vrot.lane.b32.xlu1 %v10978_v35, %s9622_s23 }
 0x932   : > { %4212 = vrot.lane.b32.xlu1 %v4208_v1, %s9623_s28  ;;  %v4465_v1 = vrot.slane %v4456_v30, %v10520_v14  ;;  %v8780_v30 = vld [vmem:[%s10211_s14 + $0xa0] ss:$16 sps:$4 sm:$0xff]  }
 0x936   : > { %4343 = vrot.lane.b32.xlu1 %v4339_v12, %s9621_s2 }
 0x957   : > { %v3187_v47 = vpop.permute.xlu1 %3186 }
 0x958   : > { %3193 = vst.msk [vmem:[#allocation3] sm:$0xff] %vm3192_vm4, %v3187_v47 }
 0x95b   : > { %v3319_v11 = vpop.permute.xlu1 %3318 }
 0x95c   : > { %3325 = vst.msk [vmem:[#allocation3] sm:$0xff] %vm3324_vm5, %v3319_v11 }
 0x963   : > { %v3570_v15 = vpop.permute.xlu1 %3569  ;;  %v4351_v20 = vld [vmem:[#allocation3] sm:$0xff] }
 0x964   : > { %3575 = vst.msk [vmem:[#allocation3 + $0x8] sm:$0xff] %vm3060_vm3, %v3570_v15  ;;  %v4357_v61 = vpack.c.bf16 %v4354_v23, %v4351_v20  ;;  %v9142_v23 = vld [vmem:[#allocation2] sm:$0xff] }
 0x967   : > { %v3701_v35 = vpop.permute.xlu1 %3700 }
 0x968   : > { %3706 = vst.msk [vmem:[#allocation3 + $0x8] sm:$0xff] %vm3192_vm4, %v3701_v35 }
 0x96b   : > { %v3832_v42 = vpop.permute.xlu1 %3831 }
 0x96c   : > { %3837 = vst.msk [vmem:[#allocation3 + $0x8] sm:$0xff] %vm3324_vm5, %v3832_v42 }
 0x96f   : > { %v4082_v24 = vpop.permute.xlu0 %4081 }
 0x973   : > { %v4352_v10 = vld [vmem:[#allocation3 + $0x8] sm:$0xff]  ;;  %v4215_v29 = vpop.permute.xlu0 %4214 }
 0x974   : > { %v4358_v21 = vpack.c.bf16 %v4355_v55, %v4352_v10 }
 0x976   : > { %4889 = vmatprep.mubr.bf16.mxu0 %v4358_v21  ;;  %4975 = vmatprep.mubr.bf16.mxu1 %v4358_v21 }
 0x977   : > { %4890 = vmatmul.mubr.bf16.vlgmr.msra.gmra.mrb[68].mxu0 %v4357_v61  ;;  %4976 = vmatmul.mubr.bf16.vlgmr.msra.gmra.mrb[52].mxu1 %v4357_v61  ;;  %v4346_v57 = vpop.permute.xlu0 %4345 }
 0x978   : > { %4901 = vmatpush1.bf16.msra.mxu0 %v8718_v58  ;;  %8093 = vmatpush3.bf16.msra.mxu1 %v8721_v27 }
 0x979   : > { %4902 = vmatprep.subr.bf16.mxu0 %v8724_v39  ;;  %8094 = vmatprep.subr.bf16.mxu1 %v9619_v28 }
 0x97a   : > { %4932 = vmatprep.mubr.bf16.mxu0 %v9618_v22  ;;  %8108 = vmatprep.mubr.msk.bf16.mxu1 %vm9620_vm0, %v9619_v28 }
 0x97c   : > { %4903 = vmatpush1.bf16.msra.mxu0 %v8722_v32  ;;  %8095 = vmatpush3.bf16.msra.mxu1 %v8725_v8  ;;  %v9143_v8 = vld [vmem:[#allocation2 + $0x8] sm:$0xff] }
 0x97d   : > { %4904 = vmatprep.subr.bf16.mxu0 %v8728_v59  ;;  %8096 = vmatprep.subr.bf16.mxu1 %v9619_v28 }
 0x980   : > { %4905 = vmatpush1.bf16.msra.mxu0 %v8726_v3  ;;  %8097 = vmatpush3.bf16.msra.mxu1 %v8729_v38  ;;  %v9144_v38 = vld [vmem:[#allocation2 + $0x18] sm:$0xff] }
 0x981   : > { %4906 = vmatprep.subr.bf16.mxu0 %v8732_v34  ;;  %8098 = vmatprep.subr.bf16.mxu1 %v9619_v28 }
 0x984   : > { %4907 = vmatpush1.bf16.msra.mxu0 %v8730_v4  ;;  %8099 = vmatpush3.bf16.msra.mxu1 %v8733_v17  ;;  %v9145_v4 = vld [vmem:[#allocation2 + $0x10] sm:$0xff] }
 0x985   : > { %4908 = vmatprep.subr.bf16.mxu0 %v8736_v25  ;;  %8100 = vmatprep.subr.bf16.mxu1 %v9619_v28  ;;  %v9146_v25 = vld [vmem:[#allocation2 + $0x20] sm:$0xff] }
 0x988   : > { %4909 = vmatpush1.bf16.msra.mxu0 %v8734_v62  ;;  %8101 = vmatpush3.bf16.msra.mxu1 %v8737_v16 }
 0x989   : > { %4910 = vmatprep.subr.bf16.mxu0 %v8740_v41  ;;  %8102 = vmatprep.subr.bf16.mxu1 %v9619_v28  ;;  %v9147_v41 = vld [vmem:[#allocation2 + $0x28] sm:$0xff] }
 0x98c   : > { %4911 = vmatpush1.bf16.msra.mxu0 %v8738_v46  ;;  %8103 = vmatpush3.bf16.msra.mxu1 %v8741_v53 }
 0x98d   : > { %4912 = vmatprep.subr.bf16.mxu0 %v8744_v43  ;;  %8104 = vmatprep.subr.bf16.mxu1 %v9619_v28 }
 0x990   : > { %4913 = vmatpush1.bf16.msra.mxu0 %v8742_v52  ;;  %8105 = vmatpush3.bf16.msra.mxu1 %v8745_v31  ;;  %v8750_v31 = vld [vmem:[%s10211_s14] ss:$16 sps:$4 sm:$0xff]  }
 0x991   : > { %4914 = vmatprep.subr.bf16.mxu0 %v8748_v19  ;;  %8106 = vmatprep.subr.bf16.mxu1 %v9619_v28  ;;  %v8752_v19 = vld [vmem:[%s10211_s14 + $0x4] ss:$16 sps:$4 sm:$0xff]  }
 0x994   : > { %4915 = vmatpush1.bf16.msra.mxu0 %v8746_v18  ;;  %8107 = vmatpush3.bf16.msra.mxu1 %v8749_v7  ;;  %v8753_v18 = vld [vmem:[%s10211_s14 + $0x8] ss:$16 sps:$4 sm:$0xff]   ;;  %v8755_v7 = vld [vmem:[%s10211_s14 + $0xc] ss:$16 sps:$4 sm:$0xff]  }
 0x995   : > { %5721 = vmatprep.subr.bf16.mxu1 %v8752_v19  ;;  %5807 = vmatprep.subr.bf16.mxu0 %v8755_v7  ;;  %v8812_v7 = vld [vmem:[%s10211_s14 + $0x144] ss:$16 sps:$4 sm:$0xff]  }
 0x9aa   : > { %v3900_v37 = vpop.xlane.xlu1 %3899 }
 0x9ab   : > { %9116 = vrcp.f32 %v3900_v37  ;;  %v8756_v37 = vld [vmem:[%s10211_s14 + $0x20] ss:$16 sps:$4 sm:$0xff]  }
 0x9ae   : > { %v4084_v56 = vpop.permute.xlu1 %4083 }
 0x9af   : > { %4088 = vst.msk [vmem:[#allocation3 + $0x28] sm:$0xff] %vm3060_vm3, %v4084_v56  ;;  %v8759_v56 = vld [vmem:[%s10211_s14 + $0x28] ss:$16 sps:$4 sm:$0xff]  }
 0x9b0   : > { %4219 = vst.msk [vmem:[#allocation3 + $0x28] sm:$0xff] %vm3192_vm4, %v4215_v29  ;;  %v8761_v29 = vld [vmem:[%s10211_s14 + $0x2c] ss:$16 sps:$4 sm:$0xff]  }
 0x9b1   : > { %4350 = vst.msk [vmem:[#allocation3 + $0x28] sm:$0xff] %vm3324_vm5, %v4346_v57  ;;  %v8764_v57 = vld [vmem:[%s10211_s14 + $0x44] ss:$16 sps:$4 sm:$0xff]  }
 0x9b2   : > { %v4213_v63 = vpop.permute.xlu1 %4212 }
 0x9b5   : > { %v9117_v2 = vpop.eup %9116 }
 0x9b6   : > { %v3951_v60 = vmul.f32 %v9117_v2, %v10970_v9  ;;  %v4344_v28 = vpop.permute.xlu1 %4343  ;;  %v8762_v2 = vld [vmem:[%s10211_s14 + $0x40] ss:$16 sps:$4 sm:$0xff]  }
 0x9b8   : > { %3953 = vst.msk [vmem:[#allocation3 + $0x10] sm:$0xff] %vm2810_vm1, %v3951_v60  ;;  %v4356_v0 = vld [vmem:[#allocation3 + $0x28] sm:$0xff] }
 0x9b9   : > { %4087 = vst.msk [vmem:[#allocation3 + $0x10] sm:$0xff] %vm3060_vm3, %v4082_v24  ;;  %v8758_v24 = vld [vmem:[%s10211_s14 + $0x24] ss:$16 sps:$4 sm:$0xff]   ;;  %v8765_v60 = vld [vmem:[%s10211_s14 + $0x48] ss:$16 sps:$4 sm:$0xff]  }
 0x9ba   : > { %4218 = vst.msk [vmem:[#allocation3 + $0x10] sm:$0xff] %vm3192_vm4, %v4213_v63  ;;  %v8767_v63 = vld [vmem:[%s10211_s14 + $0x4c] ss:$16 sps:$4 sm:$0xff]  }
 0x9bb   : > { %4349 = vst.msk [vmem:[#allocation3 + $0x10] sm:$0xff] %vm3324_vm5, %v4344_v28  ;;  %v8770_v28 = vld [vmem:[%s10211_s14 + $0x64] ss:$16 sps:$4 sm:$0xff]  }
 0x9c2   : > { %v4353_v33 = vld [vmem:[#allocation3 + $0x10] sm:$0xff] }
 0x9c3   : > { %v4359_v45 = vpack.c.bf16 %v4356_v0, %v4353_v33  ;;  %v8773_v33 = vld [vmem:[%s10211_s14 + $0x6c] ss:$16 sps:$4 sm:$0xff]   ;;  %v8768_v0 = vld [vmem:[%s10211_s14 + $0x60] ss:$16 sps:$4 sm:$0xff]  }
 0x9c5   : > { %4933 = vmatmul.mubr.bf16.vlgmr.msra.gmra.mrb[68].mxu0 %v4359_v45  ;;  %8109 = vmatmul.mubr.bf16.vlgmr.msra.gmra.mrb[56].mxu1 %v4359_v45  ;;  %v8771_v45 = vld [vmem:[%s10211_s14 + $0x68] ss:$16 sps:$4 sm:$0xff]  }
 0x9c6   : > { %5722 = vmatpush1.bf16.msra.mxu1 %v8750_v31  ;;  %5808 = vmatpush1.bf16.msra.mxu0 %v8753_v18  ;;  %v8810_v18 = vld [vmem:[%s10211_s14 + $0x140] ss:$16 sps:$4 sm:$0xff]  }
 0x9c7   : > { %5723 = vmatprep.subr.bf16.mxu1 %v8758_v24  ;;  %5809 = vmatprep.subr.bf16.mxu0 %v8761_v29  ;;  %v8813_v24 = vld [vmem:[%s10211_s14 + $0x148] ss:$16 sps:$4 sm:$0xff]   ;;  %v8815_v29 = vld [vmem:[%s10211_s14 + $0x14c] ss:$16 sps:$4 sm:$0xff]  }
 0x9ca   : > { %5724 = vmatpush1.bf16.msra.mxu1 %v8756_v37  ;;  %5810 = vmatpush1.bf16.msra.mxu0 %v8759_v56  ;;  %v8816_v37 = vld [vmem:[%s10211_s14 + $0x160] ss:$16 sps:$4 sm:$0xff]   ;;  %v8818_v56 = vld [vmem:[%s10211_s14 + $0x164] ss:$16 sps:$4 sm:$0xff]  }
 0x9cb   : > { %5725 = vmatprep.subr.bf16.mxu1 %v8764_v57  ;;  %5811 = vmatprep.subr.bf16.mxu0 %v8767_v63  ;;  %v8819_v57 = vld [vmem:[%s10211_s14 + $0x168] ss:$16 sps:$4 sm:$0xff]   ;;  %v8821_v63 = vld [vmem:[%s10211_s14 + $0x16c] ss:$16 sps:$4 sm:$0xff]  }
 0x9ce   : > { %5726 = vmatpush1.bf16.msra.mxu1 %v8762_v2  ;;  %5812 = vmatpush1.bf16.msra.mxu0 %v8765_v60  ;;  %v8824_v2 = vld [vmem:[%s10211_s14 + $0x184] ss:$16 sps:$4 sm:$0xff]   ;;  %v8827_v60 = vld [vmem:[%s10211_s14 + $0x18c] ss:$16 sps:$4 sm:$0xff]  }
 0x9cf   : > { %5727 = vmatprep.subr.bf16.mxu1 %v8770_v28  ;;  %5813 = vmatprep.subr.bf16.mxu0 %v8773_v33  ;;  %v8822_v28 = vld [vmem:[%s10211_s14 + $0x180] ss:$16 sps:$4 sm:$0xff]   ;;  %v8825_v33 = vld [vmem:[%s10211_s14 + $0x188] ss:$16 sps:$4 sm:$0xff]  }
 0x9d2   : > { %5728 = vmatpush1.bf16.msra.mxu1 %v8768_v0  ;;  %5814 = vmatpush1.bf16.msra.mxu0 %v8771_v45  ;;  %v8830_v0 = vld [vmem:[%s10211_s14 + $0x1a4] ss:$16 sps:$4 sm:$0xff]   ;;  %v8833_v45 = vld [vmem:[%s10211_s14 + $0x1ac] ss:$16 sps:$4 sm:$0xff]  }
 0xa4a   : > { %v7869_v40 = vpop.f32.mrb[52].mxu1 }
 0xa4b   : > { %v7870_v26 = vpop.f32.mrb[53].mxu1 }
 0xa4c   : > { %v7871_v54 = vadd.f32 %v7870_v26, %v7869_v40  ;;  %v7872_v36 = vpop.f32.mrb[54].mxu1  ;;  %v8776_v40 = vld [vmem:[%s10211_s14 + $0x84] ss:$16 sps:$4 sm:$0xff]   ;;  %v8779_v26 = vld [vmem:[%s10211_s14 + $0x8c] ss:$16 sps:$4 sm:$0xff]  }
 0xa4d   : > { %v7873_v9 = vpop.f32.mrb[55].mxu1  ;;  %5729 = vmatprep.subr.bf16.mxu1 %v8776_v40  ;;  %5815 = vmatprep.subr.bf16.mxu0 %v8779_v26  ;;  %v8828_v40 = vld [vmem:[%s10211_s14 + $0x1a0] ss:$16 sps:$4 sm:$0xff]   ;;  %v8831_v26 = vld [vmem:[%s10211_s14 + $0x1a8] ss:$16 sps:$4 sm:$0xff]  }
 0xa4e   : > { %v7874_v5 = vadd.f32 %v7873_v9, %v7872_v36  ;;  %v4978_v44 = vadd.f32 %v7871_v54, %v4469_v6  ;;  %v8774_v54 = vld [vmem:[%s10211_s14 + $0x80] ss:$16 sps:$4 sm:$0xff]   ;;  %v8777_v36 = vld [vmem:[%s10211_s14 + $0x88] ss:$16 sps:$4 sm:$0xff]   ;;  %v8782_v9 = vld [vmem:[%s10211_s14 + $0xa4] ss:$16 sps:$4 sm:$0xff]  }
 0xa4f   : > { %5730 = vmatpush1.bf16.msra.mxu1 %v8774_v54  ;;  %5816 = vmatpush1.bf16.msra.mxu0 %v8777_v36  ;;  %v8836_v54 = vld [vmem:[%s10211_s14 + $0x1c4] ss:$16 sps:$4 sm:$0xff]   ;;  %v8839_v36 = vld [vmem:[%s10211_s14 + $0x1cc] ss:$16 sps:$4 sm:$0xff]  }
 0xa50   : > { %v4981_v20 = vadd.f32 %v7874_v5, %v4469_v6  ;;  %v8785_v5 = vld [vmem:[%s10211_s14 + $0xac] ss:$16 sps:$4 sm:$0xff]   ;;  %5731 = vmatprep.subr.bf16.mxu1 %v8782_v9  ;;  %v8783_v6 = vld [vmem:[%s10211_s14 + $0xa8] ss:$16 sps:$4 sm:$0xff]   ;;  %v8834_v9 = vld [vmem:[%s10211_s14 + $0x1c0] ss:$16 sps:$4 sm:$0xff]  }
 0xa51   : > { %5817 = vmatprep.subr.bf16.mxu0 %v8785_v5  ;;  %v8837_v5 = vld [vmem:[%s10211_s14 + $0x1c8] ss:$16 sps:$4 sm:$0xff]  }
 0xa53   : > { %5732 = vmatpush1.bf16.msra.mxu1 %v8780_v30  ;;  %5818 = vmatpush1.bf16.msra.mxu0 %v8783_v6  ;;  %v8842_v30 = vld [vmem:[%s10211_s14 + $0x1e4] ss:$16 sps:$4 sm:$0xff]   ;;  %v8845_v6 = vld [vmem:[%s10211_s14 + $0x1ec] ss:$16 sps:$4 sm:$0xff]  }
 0xa98   : > { %v4934_v12 = vpop.f32.mrb[68].mxu0  ;;  %v5018_v47 = vpop.f32.mrb[56].mxu1 }
 0xa99   : > { %v8128_v11 = vadd.f32 %v4934_v12, %v4461_v13  ;;  %v5019_v15 = vadd.f32 %v5018_v47, %v4978_v44  ;;  %v4936_v35 = vpop.f32.mrb[69].mxu0  ;;  %v8110_v42 = vpop.f32.mrb[57].mxu1  ;;  %v8786_v44 = vld [vmem:[%s10211_s14 + $0xc0] ss:$16 sps:$4 sm:$0xff]   ;;  %v8789_v12 = vld [vmem:[%s10211_s14 + $0xc8] ss:$16 sps:$4 sm:$0xff]  }
 0xa9a   : > { %v8129_v10 = vadd.f32 %v4936_v35, %v4465_v1  ;;  %v4938_v55 = vpop.f32.mrb[70].mxu0  ;;  %v5021_v21 = vpop.f32.mrb[58].mxu1  ;;  %v8794_v47 = vld [vmem:[%s10211_s14 + $0xe4] ss:$16 sps:$4 sm:$0xff]   ;;  %v8795_v35 = vld [vmem:[%s10211_s14 + $0xe8] ss:$16 sps:$4 sm:$0xff]  }
 0xa9b   : > { %v11125_v58 = vadd.f32 %v9142_v23, %v8128_v11  ;;  %v8130_v27 = vadd.f32 %v4938_v55, %v4461_v13  ;;  %v5022_v61 = vadd.f32 %v5021_v21, %v4981_v20  ;;  %v4940_v39 = vpop.f32.mrb[71].mxu0  ;;  %v8111_v32 = vpop.f32.mrb[59].mxu1  ;;  %v11131_v17 = vadd.f32 %v9145_v4, %v5019_v15  ;;  %v8788_v13 = vld [vmem:[%s10211_s14 + $0xc4] ss:$16 sps:$4 sm:$0xff]   ;;  %v8797_v11 = vld [vmem:[%s10211_s14 + $0xec] ss:$16 sps:$4 sm:$0xff]  }
 0xa9c   : > { %v11127_v59 = vadd.f32 %v9143_v8, %v8129_v10  ;;  %v8131_v3 = vadd.f32 %v4940_v39, %v4465_v1  ;;  %v8791_v1 = vld [vmem:[%s10211_s14 + $0xcc] ss:$16 sps:$4 sm:$0xff]   ;;  %5733 = vmatprep.subr.bf16.mxu1 %v8788_v13  ;;  %v8792_v15 = vld [vmem:[%s10211_s14 + $0xe0] ss:$16 sps:$4 sm:$0xff]   ;;  %v8800_v42 = vld [vmem:[%s10211_s14 + $0x104] ss:$16 sps:$4 sm:$0xff]  }
 0xa9d   : > { %v11129_v34 = vadd.f32 %v9144_v38, %v8130_v27  ;;  %v11137_v46 = vadd.f32 %v9147_v41, %v5022_v61  ;;  %5819 = vmatprep.subr.bf16.mxu0 %v8791_v1  ;;  %5734 = vmatpush1.bf16.msra.mxu1 %v8786_v44  ;;  %v8803_v20 = vld [vmem:[%s10211_s14 + $0x10c] ss:$16 sps:$4 sm:$0xff]   ;;  %v8798_v10 = vld [vmem:[%s10211_s14 + $0x100] ss:$16 sps:$4 sm:$0xff]   ;;  %v8801_v55 = vld [vmem:[%s10211_s14 + $0x108] ss:$16 sps:$4 sm:$0xff]  }
 0xa9e   : > { %v11133_v62 = vadd.f32 %v9146_v25, %v8131_v3  ;;  %v5033_v16 = vadd.f32 %v11127_v59, %v11125_v58  ;;  %5820 = vmatpush1.bf16.msra.mxu0 %v8789_v12  ;;  %5735 = vmatprep.subr.bf16.mxu1 %v8794_v47  ;;  %v8806_v21 = vld [vmem:[%s10211_s14 + $0x124] ss:$16 sps:$4 sm:$0xff]   ;;  %v8809_v23 = vld [vmem:[%s10211_s14 + $0x12c] ss:$16 sps:$4 sm:$0xff]   ;;  %v8804_v27 = vld [vmem:[%s10211_s14 + $0x120] ss:$16 sps:$4 sm:$0xff]  }
 0xa9f   : > { %5821 = vmatprep.subr.bf16.mxu0 %v8797_v11  ;;  %v8807_v61 = vld [vmem:[%s10211_s14 + $0x128] ss:$16 sps:$4 sm:$0xff]   ;;  %v8840_v13 = vld [vmem:[%s10211_s14 + $0x1e0] ss:$16 sps:$4 sm:$0xff]   ;;  %v8848_v44 = vld [vmem:[%s10211_s14 + $0x204] ss:$16 sps:$4 sm:$0xff]  }
 0xaa0   : > { %v5037_v53 = vadd.f32 %v11133_v62, %v11129_v34  ;;  %v5034_v43 = vadd.f32 %v5033_v16, %v11131_v17  ;;  %v8843_v1 = vld [vmem:[%s10211_s14 + $0x1e8] ss:$16 sps:$4 sm:$0xff]   ;;  %v8851_v12 = vld [vmem:[%s10211_s14 + $0x20c] ss:$16 sps:$4 sm:$0xff]  }
 0xaa1   : > { %5736 = vmatpush1.bf16.msra.mxu1 %v8792_v15 }
 0xaa2   : > { %5035 = vadd.xlane.f32.xlu1 %v5034_v43  ;;  %v5038_v52 = vadd.f32 %v5037_v53, %v11137_v46  ;;  %5822 = vmatpush1.bf16.msra.mxu0 %v8795_v35 }
 0xaa3   : > { %5737 = vmatprep.subr.bf16.mxu1 %v8800_v42  ;;  %5823 = vmatprep.subr.bf16.mxu0 %v8803_v20 }
 0xaa4   : > { %5039 = vadd.xlane.f32.xlu0 %v5038_v52 }
 0xaa5   : > { %5738 = vmatpush1.bf16.msra.mxu1 %v8798_v10  ;;  %v11241_v10 = vld [vmem:[%s11610_s1] sm:$0x7] }
 0xaa6   : > { %5824 = vmatpush1.bf16.msra.mxu0 %v8801_v55  ;;  %5739 = vmatprep.subr.bf16.mxu1 %v8806_v21  ;;  %v11247_v21 = vld [vmem:[%s11611_s30] sm:$0x7] }
 0xaa7   : > { %5825 = vmatprep.subr.bf16.mxu0 %v8809_v23 }
 0xaa9   : > { %5740 = vmatpush1.bf16.msra.mxu1 %v8804_v27  ;;  %v5084_v27 = vrot.slane %v11241_v10, %v10520_v14 }
 0xaaa   : > { %5826 = vmatpush1.bf16.msra.mxu0 %v8807_v61  ;;  %5741 = vmatprep.subr.bf16.mxu1 %v8812_v7  ;;  %v8857_v7 = vld [vmem:[%s10211_s14 + $0x22c] ss:$16 sps:$4 sm:$0xff]  }
 0xaab   : > { %5827 = vmatprep.subr.bf16.mxu0 %v8815_v29  ;;  %v8855_v29 = vld [vmem:[%s10211_s14 + $0x228] ss:$16 sps:$4 sm:$0xff]  }
 0xaad   : > { %5742 = vmatpush1.bf16.msra.mxu1 %v8810_v18  ;;  %v8854_v18 = vld [vmem:[%s10211_s14 + $0x224] ss:$16 sps:$4 sm:$0xff]  }
 0xaae   : > { %5828 = vmatpush1.bf16.msra.mxu0 %v8813_v24  ;;  %5743 = vmatprep.subr.bf16.mxu1 %v8818_v56  ;;  %v8852_v24 = vld [vmem:[%s10211_s14 + $0x220] ss:$16 sps:$4 sm:$0xff]   ;;  %v8863_v56 = vld [vmem:[%s10211_s14 + $0x24c] ss:$16 sps:$4 sm:$0xff]  }
 0xaaf   : > { %5829 = vmatprep.subr.bf16.mxu0 %v8821_v63  ;;  %v8861_v63 = vld [vmem:[%s10211_s14 + $0x248] ss:$16 sps:$4 sm:$0xff]  }
 0xab1   : > { %5744 = vmatpush1.bf16.msra.mxu1 %v8816_v37  ;;  %v8860_v37 = vld [vmem:[%s10211_s14 + $0x244] ss:$16 sps:$4 sm:$0xff]  }
 0xab2   : > { %5830 = vmatpush1.bf16.msra.mxu0 %v8819_v57  ;;  %5745 = vmatprep.subr.bf16.mxu1 %v8824_v2  ;;  %v8858_v57 = vld [vmem:[%s10211_s14 + $0x240] ss:$16 sps:$4 sm:$0xff]   ;;  %v8866_v2 = vld [vmem:[%s10211_s14 + $0x264] ss:$16 sps:$4 sm:$0xff]  }
 0xab3   : > { %5831 = vmatprep.subr.bf16.mxu0 %v8827_v60  ;;  %v8869_v60 = vld [vmem:[%s10211_s14 + $0x26c] ss:$16 sps:$4 sm:$0xff]  }
 0xab5   : > { %5746 = vmatpush1.bf16.msra.mxu1 %v8822_v28  ;;  %v8864_v28 = vld [vmem:[%s10211_s14 + $0x260] ss:$16 sps:$4 sm:$0xff]  }
 0xab6   : > { %5832 = vmatpush1.bf16.msra.mxu0 %v8825_v33  ;;  %5747 = vmatprep.subr.bf16.mxu1 %v8830_v0  ;;  %v8867_v33 = vld [vmem:[%s10211_s14 + $0x268] ss:$16 sps:$4 sm:$0xff]   ;;  %v8875_v0 = vld [vmem:[%s10211_s14 + $0x28c] ss:$16 sps:$4 sm:$0xff]  }
 0xab7   : > { %5833 = vmatprep.subr.bf16.mxu0 %v8833_v45  ;;  %v8870_v45 = vld [vmem:[%s10211_s14 + $0x280] ss:$16 sps:$4 sm:$0xff]  }
 0xab9   : > { %5748 = vmatpush1.bf16.msra.mxu1 %v8828_v40  ;;  %v8873_v40 = vld [vmem:[%s10211_s14 + $0x288] ss:$16 sps:$4 sm:$0xff]  }
 0xaba   : > { %5834 = vmatpush1.bf16.msra.mxu0 %v8831_v26  ;;  %5749 = vmatprep.subr.bf16.mxu1 %v8836_v54  ;;  %v8878_v26 = vld [vmem:[%s10211_s14 + $0x2a4] ss:$16 sps:$4 sm:$0xff]   ;;  %v8881_v54 = vld [vmem:[%s10211_s14 + $0x2ac] ss:$16 sps:$4 sm:$0xff]  }
 0xabb   : > { %5835 = vmatprep.subr.bf16.mxu0 %v8839_v36  ;;  %v8876_v36 = vld [vmem:[%s10211_s14 + $0x2a0] ss:$16 sps:$4 sm:$0xff]  }
 0xabd   : > { %5750 = vmatpush1.bf16.msra.mxu1 %v8834_v9  ;;  %v8879_v9 = vld [vmem:[%s10211_s14 + $0x2a8] ss:$16 sps:$4 sm:$0xff]  }
 0xabe   : > { %5836 = vmatpush1.bf16.msra.mxu0 %v8837_v5  ;;  %5751 = vmatprep.subr.bf16.mxu1 %v8842_v30  ;;  %v8884_v5 = vld [vmem:[%s10211_s14 + $0x2c4] ss:$16 sps:$4 sm:$0xff]   ;;  %v8887_v30 = vld [vmem:[%s10211_s14 + $0x2cc] ss:$16 sps:$4 sm:$0xff]  }
 0xabf   : > { %5837 = vmatprep.subr.bf16.mxu0 %v8845_v6 }
 0xac1   : > { %5752 = vmatpush1.bf16.msra.mxu1 %v8840_v13 }
 0xac2   : > { %5838 = vmatpush1.bf16.msra.mxu0 %v8843_v1  ;;  %5764 = vmatprep.subr.bf16.mxu1 %v8848_v44  ;;  %v5088_v1 = vrot.slane %v11241_v10, %v10516_v51  ;;  %v8882_v44 = vld [vmem:[%s10211_s14 + $0x2c0] ss:$16 sps:$4 sm:$0xff]  }
 0xac3   : > { %5850 = vmatprep.subr.bf16.mxu0 %v8851_v12  ;;  %v8885_v12 = vld [vmem:[%s10211_s14 + $0x2c8] ss:$16 sps:$4 sm:$0xff]  }
 0xb2f   : > { %v5036_v39 = vpop.xlane.xlu1 %5035 }
 0xb30   : > { %v5042_v32 = vmul.f32 0.0026041667, %v5036_v39  ;;  %v5080_v39 = vrot.slane %v11241_v10, %v10513_v50  ;;  %v8896_v10 = vld [vmem:[%s10220_s16 + $0x4] ss:$12 sps:$4 sm:$0xff]  }
 0xb31   : > { %v5040_v8 = vpop.xlane.xlu0 %5039 }
 0xb32   : > { %v11184_v3 = vsub.f32 %v11125_v58, %v5042_v32  ;;  %v11187_v38 = vsub.f32 %v11127_v59, %v5042_v32  ;;  %v11190_v4 = vsub.f32 %v11131_v17, %v5042_v32  ;;  %v5043_v25 = vmul.f32 0.0026041667, %v5040_v8 }
 0xb33   : > { %v5106_v8 = vrot.slane %v11247_v21, %v10520_v14 }
 0xb34   : > { %v5050_v16 = vmul.f32 %v11184_v3, %v11184_v3  ;;  %v5051_v41 = vmul.f32 %v11187_v38, %v11187_v38  ;;  %v11197_v53 = vsub.f32 %v11129_v34, %v5043_v25  ;;  %v11200_v58 = vsub.f32 %v11133_v62, %v5043_v25 }
 0xb35   : > { %v11203_v59 = vsub.f32 %v11137_v46, %v5043_v25  ;;  %v5052_v52 = vmul.f32 %v11190_v4, %v11190_v4 }
 0xb36   : > { %v5053_v17 = vmul.f32 %v11197_v53, %v11197_v53  ;;  %v5054_v43 = vmul.f32 %v11200_v58, %v11200_v58  ;;  %v5056_v31 = vadd.f32 %v5051_v41, %v5050_v16 }
 0xb37   : > { %v5055_v62 = vmul.f32 %v11203_v59, %v11203_v59 }
 0xb38   : > { %v5057_v34 = vadd.f32 %v5056_v31, %v5052_v52  ;;  %v5060_v19 = vadd.f32 %v5054_v43, %v5053_v17 }
 0xb3a   : > { %5058 = vadd.xlane.f32.xlu0 %v5057_v34  ;;  %v5061_v46 = vadd.f32 %v5060_v19, %v5055_v62  ;;  %v8846_v62 = vld [vmem:[%s10211_s14 + $0x200] ss:$16 sps:$4 sm:$0xff]  }
 0xb3e   : > { %5062 = vadd.xlane.f32.xlu0 %v5061_v46 }
 0xbc7   : > { %v5059_v47 = vpop.xlane.xlu0 %5058 }
 0xbc8   : > { %v5064_v11 = vmul.f32 0.0026041667, %v5059_v47  ;;  %v8890_v47 = vld [vmem:[%s10211_s14 + $0x2e4] ss:$16 sps:$4 sm:$0xff]  }
 0xbca   : > { %v5066_v15 = vadd.f32 1e-05, %v5064_v11  ;;  %v8893_v11 = vld [vmem:[%s10211_s14 + $0x2ec] ss:$16 sps:$4 sm:$0xff]  }
 0xbcb   : > { %v5063_v35 = vpop.xlane.xlu0 %5062 }
 0xbcc   : > { %9118 = vrsqrt.f32 %v5066_v15  ;;  %v5065_v42 = vmul.f32 0.0026041667, %v5063_v35  ;;  %v8888_v35 = vld [vmem:[%s10211_s14 + $0x2e0] ss:$16 sps:$4 sm:$0xff]  }
 0xbce   : > { %v5067_v20 = vadd.f32 1e-05, %v5065_v42  ;;  %v8891_v42 = vld [vmem:[%s10211_s14 + $0x2e8] ss:$16 sps:$4 sm:$0xff]  }
 0xbd0   : > { %9120 = vrsqrt.f32 %v5067_v20 }
 0xbd6   : > { %v11243_v55 = vpop.eup %9118 }
 0xbd7   : > { %v5071_v23 = vmul.f32 %v11243_v55, %v11187_v38  ;;  %v5070_v61 = vmul.f32 %v11243_v55, %v11184_v3  ;;  %v5102_v38 = vrot.slane %v11247_v21, %v10513_v50  ;;  %v5072_v13 = vmul.f32 %v11243_v55, %v11190_v4 }
 0xbd8   : > { %v5110_v4 = vrot.slane %v11247_v21, %v10516_v51 }
 0xbd9   : > { %v5093_v16 = vmul.f32 %v5084_v27, %v5071_v23  ;;  %v5092_v41 = vmul.f32 %v5080_v39, %v5070_v61  ;;  %v8894_v23 = vld [vmem:[%s10220_s16] ss:$12 sps:$4 sm:$0xff]   ;;  %v8897_v61 = vld [vmem:[%s10220_s16 + $0x18] ss:$12 sps:$4 sm:$0xff]  }
 0xbda   : > { %v11257_v32 = vpop.eup %9120 }
 0xbdb   : > { %v5074_v25 = vmul.f32 %v11257_v32, %v11200_v58  ;;  %v5073_v3 = vmul.f32 %v11257_v32, %v11197_v53  ;;  %v11267_v52 = vadd.f32 %v5106_v8, %v5093_v16  ;;  %v11271_v34 = vadd.f32 %v5102_v38, %v5092_v41  ;;  %v8849_v53 = vld [vmem:[%s10211_s14 + $0x208] ss:$16 sps:$4 sm:$0xff]   ;;  %v8909_v41 = vld [vmem:[%s10220_s16 + $0x78] ss:$12 sps:$4 sm:$0xff]  }
 0xbdc   : > { %v5075_v6 = vmul.f32 %v11257_v32, %v11203_v59  ;;  %v5094_v59 = vmul.f32 %v5088_v1, %v5072_v13  ;;  %v8900_v32 = vld [vmem:[%s10220_s16 + $0x30] ss:$12 sps:$4 sm:$0xff]   ;;  %v8906_v16 = vld [vmem:[%s10220_s16 + $0x60] ss:$12 sps:$4 sm:$0xff]   ;;  %v8951_v13 = vld [vmem:[%s10220_s16 + $0x158] ss:$12 sps:$4 sm:$0xff]  }
 0xbdd   : > { %v5096_v17 = vmul.f32 %v5084_v27, %v5074_v25  ;;  %v5095_v43 = vmul.f32 %v5080_v39, %v5073_v3  ;;  %v8899_v27 = vld [vmem:[%s10220_s16 + $0x1c] ss:$12 sps:$4 sm:$0xff]   ;;  %v8902_v39 = vld [vmem:[%s10220_s16 + $0x34] ss:$12 sps:$4 sm:$0xff]   ;;  %v8908_v25 = vld [vmem:[%s10220_s16 + $0x64] ss:$12 sps:$4 sm:$0xff]  }
 0xbde   : > { %v5097_v15 = vmul.f32 %v5088_v1, %v5075_v6  ;;  %v11322_v55 = vadd.f32 %v5110_v4, %v5094_v59  ;;  %v8911_v3 = vld [vmem:[%s10220_s16 + $0x7c] ss:$12 sps:$4 sm:$0xff]   ;;  %v8950_v6 = vld [vmem:[%s10220_s16 + $0x154] ss:$12 sps:$4 sm:$0xff]   ;;  %v8960_v59 = vld [vmem:[%s10220_s16 + $0x184] ss:$12 sps:$4 sm:$0xff]  }
 0xbdf   : > { %v11269_v31 = vadd.f32 %v5106_v8, %v5096_v17  ;;  %v11273_v19 = vadd.f32 %v5102_v38, %v5095_v43  ;;  %v8905_v8 = vld [vmem:[%s10220_s16 + $0x4c] ss:$12 sps:$4 sm:$0xff]   ;;  %v8903_v38 = vld [vmem:[%s10220_s16 + $0x48] ss:$12 sps:$4 sm:$0xff]   ;;  %v8912_v43 = vld [vmem:[%s10220_s16 + $0x90] ss:$12 sps:$4 sm:$0xff]  }
 0xbe0   : > { %v11319_v20 = vadd.f32 %v5110_v4, %v5097_v15  ;;  %v8914_v17 = vld [vmem:[%s10220_s16 + $0x94] ss:$12 sps:$4 sm:$0xff]   ;;  %v8948_v1 = vld [vmem:[%s10220_s16 + $0x150] ss:$12 sps:$4 sm:$0xff]  }
 0xbe1   : > { %v5121_v58 = vpack.c.bf16 %v11269_v31, %v11267_v52  ;;  %v5120_v46 = vpack.c.bf16 %v11273_v19, %v11271_v34  ;;  %v8957_v15 = vld [vmem:[%s10220_s16 + $0xb0] ss:$12 sps:$4 sm:$0xff]   ;;  %v8961_v4 = vld [vmem:[%s10220_s16 + $0x248] ss:$12 sps:$4 sm:$0xff]  }
 0xbe2   : > { %v5122_v21 = vpack.c.bf16 %v11319_v20, %v11322_v55 }
 0xbe3   : > { %5753 = vmatprep.mubr.bf16.mxu1 %v5121_v58  ;;  %5839 = vmatprep.mubr.bf16.mxu0 %v5121_v58  ;;  %v8917_v58 = vld [vmem:[%s10220_s16 + $0xac] ss:$12 sps:$4 sm:$0xff]  }
 0xbe4   : > { %5754 = vmatmul.mubr.bf16.vlgmr.msra.gmra.mrb[60].mxu1 %v5120_v46  ;;  %5840 = vmatmul.mubr.bf16.vlgmr.msra.gmra.mrb[72].mxu0 %v5120_v46  ;;  %v8921_v46 = vld [vmem:[%s10220_s16 + $0xc8] ss:$12 sps:$4 sm:$0xff]  }
 0xbe5   : > { %5765 = vmatpush1.bf16.msra.mxu1 %v8846_v62  ;;  %5851 = vmatpush1.bf16.msra.mxu0 %v8849_v53  ;;  %v8915_v62 = vld [vmem:[%s10220_s16 + $0xa8] ss:$12 sps:$4 sm:$0xff]   ;;  %v8920_v53 = vld [vmem:[%s10220_s16 + $0xc4] ss:$12 sps:$4 sm:$0xff]  }
 0xbe6   : > { %5766 = vmatprep.subr.bf16.mxu1 %v8854_v18  ;;  %5852 = vmatprep.subr.bf16.mxu0 %v8857_v7  ;;  %v8918_v18 = vld [vmem:[%s10220_s16 + $0xc0] ss:$12 sps:$4 sm:$0xff]   ;;  %v8922_v7 = vld [vmem:[%s10220_s16 + $0x8] ss:$12 sps:$4 sm:$0xff]  }
 0xbe7   : > { %5796 = vmatprep.mubr.bf16.mxu1 %v9618_v22  ;;  %5882 = vmatprep.mubr.bf16.mxu0 %v9618_v22  ;;  %v8872_v22 = vld [vmem:[%s10211_s14 + $0x284] ss:$16 sps:$4 sm:$0xff]   ;;  %s11612_s14 = scalar_lea.vmem [#allocation18], %s10192_s15 }
 0xbe9   : > { %5767 = vmatpush1.bf16.msra.mxu1 %v8852_v24  ;;  %5853 = vmatpush1.bf16.msra.mxu0 %v8855_v29  ;;  %v8925_v24 = vld [vmem:[%s10220_s16 + $0xdc] ss:$12 sps:$4 sm:$0xff]   ;;  %v8926_v29 = vld [vmem:[%s10220_s16 + $0xe0] ss:$12 sps:$4 sm:$0xff]  }
 0xbea   : > { %5768 = vmatprep.subr.bf16.mxu1 %v8860_v37  ;;  %5854 = vmatprep.subr.bf16.mxu0 %v8863_v56  ;;  %v8923_v37 = vld [vmem:[%s10220_s16 + $0xd8] ss:$12 sps:$4 sm:$0xff]   ;;  %v8927_v56 = vld [vmem:[%s10220_s16 + $0x20] ss:$12 sps:$4 sm:$0xff]  }
 0xbed   : > { %5769 = vmatpush1.bf16.msra.mxu1 %v8858_v57  ;;  %5855 = vmatpush1.bf16.msra.mxu0 %v8861_v63  ;;  %v8930_v57 = vld [vmem:[%s10220_s16 + $0xf4] ss:$12 sps:$4 sm:$0xff]   ;;  %v8931_v63 = vld [vmem:[%s10220_s16 + $0xf8] ss:$12 sps:$4 sm:$0xff]  }
 0xbee   : > { %5770 = vmatprep.subr.bf16.mxu1 %v8866_v2  ;;  %5856 = vmatprep.subr.bf16.mxu0 %v8869_v60  ;;  %v8928_v2 = vld [vmem:[%s10220_s16 + $0xf0] ss:$12 sps:$4 sm:$0xff]   ;;  %v8932_v60 = vld [vmem:[%s10220_s16 + $0x38] ss:$12 sps:$4 sm:$0xff]  }
 0xbf1   : > { %5771 = vmatpush1.bf16.msra.mxu1 %v8864_v28  ;;  %5857 = vmatpush1.bf16.msra.mxu0 %v8867_v33  ;;  %v8935_v28 = vld [vmem:[%s10220_s16 + $0x10c] ss:$12 sps:$4 sm:$0xff]   ;;  %v8936_v33 = vld [vmem:[%s10220_s16 + $0x110] ss:$12 sps:$4 sm:$0xff]  }
 0xbf2   : > { %5772 = vmatprep.subr.bf16.mxu1 %v8872_v22  ;;  %5858 = vmatprep.subr.bf16.mxu0 %v8875_v0  ;;  %v8933_v22 = vld [vmem:[%s10220_s16 + $0x108] ss:$12 sps:$4 sm:$0xff]   ;;  %v8937_v0 = vld [vmem:[%s10220_s16 + $0x50] ss:$12 sps:$4 sm:$0xff]  }
 0xbf5   : > { %5773 = vmatpush1.bf16.msra.mxu1 %v8870_v45  ;;  %5859 = vmatpush1.bf16.msra.mxu0 %v8873_v40  ;;  %v8938_v45 = vld [vmem:[%s10220_s16 + $0x120] ss:$12 sps:$4 sm:$0xff]   ;;  %v8940_v40 = vld [vmem:[%s10220_s16 + $0x124] ss:$12 sps:$4 sm:$0xff]  }
 0xbf6   : > { %5774 = vmatprep.subr.bf16.mxu1 %v8878_v26  ;;  %5860 = vmatprep.subr.bf16.mxu0 %v8881_v54  ;;  %v8941_v26 = vld [vmem:[%s10220_s16 + $0x128] ss:$12 sps:$4 sm:$0xff]  }
 0xbf7   : > { %v8942_v54 = vld [vmem:[%s10220_s16 + $0x68] ss:$12 sps:$4 sm:$0xff]  }
 0xbf9   : > { %5775 = vmatpush1.bf16.msra.mxu1 %v8876_v36  ;;  %5861 = vmatpush1.bf16.msra.mxu0 %v8879_v9  ;;  %v8945_v36 = vld [vmem:[%s10220_s16 + $0x13c] ss:$12 sps:$4 sm:$0xff]   ;;  %v8946_v9 = vld [vmem:[%s10220_s16 + $0x140] ss:$12 sps:$4 sm:$0xff]  }
 0xbfa   : > { %5776 = vmatprep.subr.bf16.mxu1 %v8884_v5  ;;  %5862 = vmatprep.subr.bf16.mxu0 %v8887_v30  ;;  %v8943_v5 = vld [vmem:[%s10220_s16 + $0x138] ss:$12 sps:$4 sm:$0xff]   ;;  %v8947_v30 = vld [vmem:[%s10220_s16 + $0x80] ss:$12 sps:$4 sm:$0xff]  }
 0xbfd   : > { %5777 = vmatpush1.bf16.msra.mxu1 %v8882_v44  ;;  %5863 = vmatpush1.bf16.msra.mxu0 %v8885_v12  ;;  %v8952_v44 = vld [vmem:[%s10220_s16 + $0x98] ss:$12 sps:$4 sm:$0xff]  }
 0xbfe   : > { %5778 = vmatprep.subr.bf16.mxu1 %v8890_v47  ;;  %5864 = vmatprep.subr.bf16.mxu0 %v8893_v11  ;;  %v8955_v12 = vld [vmem:[%s10220_s16 + $0x16c] ss:$12 sps:$4 sm:$0xff]   ;;  %v8956_v47 = vld [vmem:[%s10220_s16 + $0x170] ss:$12 sps:$4 sm:$0xff]   ;;  %v8953_v11 = vld [vmem:[%s10220_s16 + $0x168] ss:$12 sps:$4 sm:$0xff]  }
 0xc01   : > { %5779 = vmatpush1.bf16.msra.mxu1 %v8888_v35  ;;  %5865 = vmatpush1.bf16.msra.mxu0 %v8891_v42  ;;  %v5219_v35 = vld [vmem:[%s10214_s19] sm:$0xf]  ;;  %s11613_s19 = scalar_lea.vmem [#allocation20], %s10192_s15 }
 0xc02   : > { %6626 = vmatprep.subr.bf16.mxu1 %v8896_v10  ;;  %7884 = vmatprep.subr.bf16.mxu0 %v8921_v46  ;;  %v5224_v42 = vrot.slane %v5219_v35, %v10513_v50  ;;  %v5232_v10 = vrot.slane %v5219_v35, %v10516_v51 }
 0xc04   : > { %5797 = vmatmul.mubr.bf16.vlgmr.msra.gmra.mrb[60].mxu1 %v5122_v21  ;;  %5883 = vmatmul.mubr.bf16.vlgmr.msra.gmra.mrb[72].mxu0 %v5122_v21  ;;  %v5236_v21 = vrot.slane %v5219_v35, %v1228_v49 }
 0xc05   : > { %6627 = vmatpush1.bf16.msra.mxu1 %v8894_v23  ;;  %7885 = vmatpush3.bf16.msra.mxu0 %v8922_v7  ;;  %v5228_v23 = vrot.slane %v5219_v35, %v10520_v14 }
 0xc06   : > { %6628 = vmatprep.subr.bf16.mxu1 %v8899_v27  ;;  %7886 = vmatprep.subr.bf16.mxu0 %v8926_v29 }
 0xc09   : > { %6629 = vmatpush1.bf16.msra.mxu1 %v8897_v61  ;;  %7887 = vmatpush3.bf16.msra.mxu0 %v8927_v56 }
 0xc0a   : > { %6630 = vmatprep.subr.bf16.mxu1 %v8902_v39  ;;  %7888 = vmatprep.subr.bf16.mxu0 %v8931_v63 }
 0xc0d   : > { %6631 = vmatpush1.bf16.msra.mxu1 %v8900_v32  ;;  %7889 = vmatpush3.bf16.msra.mxu0 %v8932_v60 }
 0xc0e   : > { %6632 = vmatprep.subr.bf16.mxu1 %v8905_v8  ;;  %7890 = vmatprep.subr.bf16.mxu0 %v8936_v33 }
 0xc11   : > { %6633 = vmatpush1.bf16.msra.mxu1 %v8903_v38  ;;  %7891 = vmatpush3.bf16.msra.mxu0 %v8937_v0 }
 0xc12   : > { %6634 = vmatprep.subr.bf16.mxu1 %v8908_v25  ;;  %7892 = vmatprep.subr.bf16.mxu0 %v8941_v26 }
 0xc15   : > { %6635 = vmatpush1.bf16.msra.mxu1 %v8906_v16  ;;  %7893 = vmatpush3.bf16.msra.mxu0 %v8942_v54 }
 0xc16   : > { %6636 = vmatprep.subr.bf16.mxu1 %v8911_v3  ;;  %7894 = vmatprep.subr.bf16.mxu0 %v8946_v9 }
 0xc19   : > { %6637 = vmatpush1.bf16.msra.mxu1 %v8909_v41  ;;  %7895 = vmatpush3.bf16.msra.mxu0 %v8947_v30 }
 0xc1a   : > { %6638 = vmatprep.subr.bf16.mxu1 %v8914_v17  ;;  %7896 = vmatprep.subr.bf16.mxu0 %v8951_v13 }
 0xc1d   : > { %6639 = vmatpush1.bf16.msra.mxu1 %v8912_v43  ;;  %7897 = vmatpush3.bf16.msra.mxu0 %v8952_v44 }
 0xc1e   : > { %6640 = vmatprep.subr.bf16.mxu1 %v8917_v58  ;;  %7898 = vmatprep.subr.bf16.mxu0 %v8956_v47 }
 0xc21   : > { %6641 = vmatpush1.bf16.msra.mxu1 %v8915_v62  ;;  %7899 = vmatpush3.bf16.msra.mxu0 %v8957_v15 }
 0xc22   : > { %6642 = vmatprep.subr.bf16.mxu1 %v8920_v53  ;;  %7906 = vmatprep.subr.bf16.mxu0 %v8961_v4 }
 0xc25   : > { %6643 = vmatpush1.bf16.msra.mxu1 %v8918_v18 }
 0xc26   : > { %6644 = vmatprep.subr.bf16.mxu1 %v8925_v24 }
 0xc29   : > { %6645 = vmatpush1.bf16.msra.mxu1 %v8923_v37 }
 0xc2a   : > { %6646 = vmatprep.subr.bf16.mxu1 %v8930_v57 }
 0xc2d   : > { %6647 = vmatpush1.bf16.msra.mxu1 %v8928_v2 }
 0xc2e   : > { %6648 = vmatprep.subr.bf16.mxu1 %v8935_v28 }
 0xc31   : > { %6649 = vmatpush1.bf16.msra.mxu1 %v8933_v22 }
 0xc32   : > { %6650 = vmatprep.subr.bf16.mxu1 %v8940_v40 }
 0xc35   : > { %6651 = vmatpush1.bf16.msra.mxu1 %v8938_v45 }
 0xc36   : > { %6652 = vmatprep.subr.bf16.mxu1 %v8945_v36 }
 0xc39   : > { %6653 = vmatpush1.bf16.msra.mxu1 %v8943_v5 }
 0xc3a   : > { %6654 = vmatprep.subr.bf16.mxu1 %v8950_v6 }
 0xc3d   : > { %6655 = vmatpush1.bf16.msra.mxu1 %v8948_v1 }
 0xc3e   : > { %6656 = vmatprep.subr.bf16.mxu1 %v8955_v12 }
 0xc41   : > { %6657 = vmatpush1.bf16.msra.mxu1 %v8953_v11 }
 0xc42   : > { %6669 = vmatprep.subr.bf16.mxu1 %v8960_v59 }
 0xcd7   : > { %v5798_v27 = vpop.f32.mrb[60].mxu1  ;;  %v5884_v61 = vpop.f32.mrb[72].mxu0 }
 0xcd8   : > { %v11381_v39 = vadd.f32 %v5798_v27, %v5224_v42  ;;  %v11383_v32 = vadd.f32 %v5884_v61, %v5232_v10  ;;  %v5800_v8 = vpop.f32.mrb[61].mxu1  ;;  %v5886_v38 = vpop.f32.mrb[73].mxu0 }
 0xcd9   : > { %v11385_v25 = vadd.f32 %v5800_v8, %v5228_v23  ;;  %v11387_v16 = vadd.f32 %v5886_v38, %v5236_v21  ;;  %v5802_v3 = vpop.f32.mrb[62].mxu1  ;;  %v5888_v41 = vpop.f32.mrb[74].mxu0 }
 0xcda   : > { %v5901_v17 = vmul.f32 0.044715, %v11381_v39  ;;  %v5903_v43 = vmul.f32 0.044715, %v11383_v32  ;;  %v8134_v48 = vadd.f32 %v5802_v3, %v5224_v42  ;;  %v8138_v49 = vadd.f32 %v5888_v41, %v5232_v10  ;;  %v5804_v58 = vpop.f32.mrb[63].mxu1  ;;  %v5890_v62 = vpop.f32.mrb[75].mxu0 }
 0xcdb   : > { %v5902_v53 = vmul.f32 0.044715, %v11385_v25  ;;  %v5904_v46 = vmul.f32 0.044715, %v11387_v16  ;;  %v11393_v18 = vadd.f32 %v5804_v58, %v5228_v23  ;;  %v11395_v7 = vadd.f32 %v5890_v62, %v5236_v21 }
 0xcdc   : > { %v5909_v24 = vmul.f32 %v11381_v39, %v5901_v17  ;;  %v5911_v29 = vmul.f32 %v11383_v32, %v5903_v43  ;;  %v5905_v37 = vmul.f32 0.044715, %v8134_v48  ;;  %v5907_v56 = vmul.f32 0.044715, %v8138_v49 }
 0xcdd   : > { %v5910_v57 = vmul.f32 %v11385_v25, %v5902_v53  ;;  %v5912_v63 = vmul.f32 %v11387_v16, %v5904_v46  ;;  %v5906_v2 = vmul.f32 0.044715, %v11393_v18  ;;  %v5908_v60 = vmul.f32 0.044715, %v11395_v7 }
 0xcde   : > { %v5917_v28 = vmul.f32 %v11381_v39, %v5909_v24  ;;  %v5919_v33 = vmul.f32 %v11383_v32, %v5911_v29  ;;  %v5913_v22 = vmul.f32 %v8134_v48, %v5905_v37  ;;  %v5915_v0 = vmul.f32 %v8138_v49, %v5907_v56 }
 0xcdf   : > { %v5918_v45 = vmul.f32 %v11385_v25, %v5910_v57  ;;  %v5914_v40 = vmul.f32 %v11393_v18, %v5906_v2  ;;  %v5916_v26 = vmul.f32 %v11395_v7, %v5908_v60  ;;  %v5920_v30 = vmul.f32 %v11387_v16, %v5912_v63 }
 0xce0   : > { %v5925_v54 = vadd.f32 %v11381_v39, %v5917_v28  ;;  %v5927_v36 = vadd.f32 %v11383_v32, %v5919_v33  ;;  %v5921_v9 = vmul.f32 %v8134_v48, %v5913_v22  ;;  %v5923_v5 = vmul.f32 %v8138_v49, %v5915_v0 }
 0xce1   : > { %v5922_v6 = vmul.f32 %v11393_v18, %v5914_v40  ;;  %v5924_v13 = vmul.f32 %v11395_v7, %v5916_v26  ;;  %v5926_v11 = vadd.f32 %v11385_v25, %v5918_v45  ;;  %v5928_v10 = vadd.f32 %v11387_v16, %v5920_v30 }
 0xce2   : > { %v5933_v1 = vmul.f32 0.7978846, %v5925_v54  ;;  %v5935_v44 = vmul.f32 0.7978846, %v5927_v36  ;;  %v5929_v12 = vadd.f32 %v8134_v48, %v5921_v9  ;;  %v5931_v47 = vadd.f32 %v8138_v49, %v5923_v5  ;;  %v8958_v36 = vld [vmem:[%s10220_s16 + $0x180] ss:$12 sps:$4 sm:$0xff]  }
 0xce3   : > { %v5930_v15 = vadd.f32 %v11393_v18, %v5922_v6  ;;  %v5934_v35 = vmul.f32 0.7978846, %v5926_v11  ;;  %v5932_v23 = vadd.f32 %v11395_v7, %v5924_v13  ;;  %v5936_v21 = vmul.f32 0.7978846, %v5928_v10  ;;  %v8962_v9 = vld [vmem:[%s10220_s16 + $0x188] ss:$12 sps:$4 sm:$0xff]  }
 0xce4   : > { %9122 = vtanh.f32 %v5933_v1  ;;  %v5937_v59 = vmul.f32 0.7978846, %v5929_v12  ;;  %v5939_v4 = vmul.f32 0.7978846, %v5931_v47  ;;  %v5893_v43 = vmul.f32 0.5, %v11381_v39 }
 0xce5   : > { %9124 = vtanh.f32 %v5935_v44  ;;  %v5938_v42 = vmul.f32 0.7978846, %v5930_v15  ;;  %v5940_v27 = vmul.f32 0.7978846, %v5932_v23  ;;  %v5897_v58 = vmul.f32 0.5, %v8134_v48 }
 0xce6   : > { %9126 = vtanh.f32 %v5937_v59  ;;  %v5895_v46 = vmul.f32 0.5, %v11383_v32  ;;  %v5899_v24 = vmul.f32 0.5, %v8138_v49  ;;  %v5894_v56 = vmul.f32 0.5, %v11385_v25  ;;  %v8965_v6 = vld [vmem:[%s10220_s16 + $0x19c] ss:$12 sps:$4 sm:$0xff]  }
 0xce7   : > { %9128 = vtanh.f32 %v5939_v4  ;;  %v5898_v28 = vmul.f32 0.5, %v11393_v18  ;;  %v5896_v32 = vmul.f32 0.5, %v11387_v16  ;;  %v5900_v49 = vmul.f32 0.5, %v11395_v7  ;;  %v8966_v7 = vld [vmem:[%s10220_s16 + $0x260] ss:$12 sps:$4 sm:$0xff]  }
 0xce8   : > { %9130 = vtanh.f32 %v5934_v35  ;;  %v8963_v13 = vld [vmem:[%s10220_s16 + $0x198] ss:$12 sps:$4 sm:$0xff]   ;;  %v8967_v1 = vld [vmem:[%s10220_s16 + $0x1a0] ss:$12 sps:$4 sm:$0xff]   ;;  %v8968_v47 = vld [vmem:[%s10220_s16 + $0x1b0] ss:$12 sps:$4 sm:$0xff]  }
 0xce9   : > { %9132 = vtanh.f32 %v5938_v42  ;;  %v8970_v44 = vld [vmem:[%s10220_s16 + $0x1b4] ss:$12 sps:$4 sm:$0xff]   ;;  %v8971_v12 = vld [vmem:[%s10220_s16 + $0x278] ss:$12 sps:$4 sm:$0xff]   ;;  %v8976_v59 = vld [vmem:[%s10220_s16 + $0x290] ss:$12 sps:$4 sm:$0xff]  }
 0xcea   : > { %9134 = vtanh.f32 %v5936_v21  ;;  %v8972_v11 = vld [vmem:[%s10220_s16 + $0x1b8] ss:$12 sps:$4 sm:$0xff]   ;;  %v8973_v4 = vld [vmem:[%s10220_s16 + $0x1c8] ss:$12 sps:$4 sm:$0xff]   ;;  %v8977_v35 = vld [vmem:[%s10220_s16 + $0x1d0] ss:$12 sps:$4 sm:$0xff]  }
 0xceb   : > { %9136 = vtanh.f32 %v5940_v27  ;;  %v8975_v15 = vld [vmem:[%s10220_s16 + $0x1cc] ss:$12 sps:$4 sm:$0xff]   ;;  %v8980_v42 = vld [vmem:[%s10220_s16 + $0x1e4] ss:$12 sps:$4 sm:$0xff]   ;;  %v8981_v10 = vld [vmem:[%s10220_s16 + $0x2a8] ss:$12 sps:$4 sm:$0xff]  }
 0xcec   : > { %v8978_v23 = vld [vmem:[%s10220_s16 + $0x1e0] ss:$12 sps:$4 sm:$0xff]   ;;  %v8982_v21 = vld [vmem:[%s10220_s16 + $0x1e8] ss:$12 sps:$4 sm:$0xff]  }
 0xced   : > { %v8985_v27 = vld [vmem:[%s10220_s16 + $0x1fc] ss:$12 sps:$4 sm:$0xff]  }
 0xcee   : > { %v9123_v61 = vpop.eup %9122 }
 0xcef   : > { %v9125_v8 = vpop.eup %9124  ;;  %v5949_v38 = vadd.f32 1.0, %v9123_v61  ;;  %v8986_v61 = vld [vmem:[%s10220_s16 + $0x2c0] ss:$12 sps:$4 sm:$0xff]  }
 0xcf0   : > { %v9127_v3 = vpop.eup %9126  ;;  %v5951_v41 = vadd.f32 1.0, %v9125_v8  ;;  %v8983_v8 = vld [vmem:[%s10220_s16 + $0x1f8] ss:$12 sps:$4 sm:$0xff]  }
 0xcf1   : > { %v9129_v17 = vpop.eup %9128  ;;  %v5953_v62 = vadd.f32 1.0, %v9127_v3  ;;  %v5957_v63 = vmul.f32 %v5949_v38, %v5893_v43  ;;  %v8987_v38 = vld [vmem:[%s10220_s16 + $0x200] ss:$12 sps:$4 sm:$0xff]   ;;  %v8992_v43 = vld [vmem:[%s10220_s16 + $0x218] ss:$12 sps:$4 sm:$0xff]  }
 0xcf2   : > { %v9131_v53 = vpop.eup %9130  ;;  %v5955_v29 = vadd.f32 1.0, %v9129_v17  ;;  %v5959_v39 = vmul.f32 %v5951_v41, %v5895_v46  ;;  %v8990_v3 = vld [vmem:[%s10220_s16 + $0x214] ss:$12 sps:$4 sm:$0xff]   ;;  %v8991_v41 = vld [vmem:[%s10220_s16 + $0x2d8] ss:$12 sps:$4 sm:$0xff]  }
 0xcf3   : > { %v9133_v37 = vpop.eup %9132  ;;  %v5950_v57 = vadd.f32 1.0, %v9131_v53  ;;  %v5961_v2 = vmul.f32 %v5953_v62, %v5897_v58  ;;  %v8988_v17 = vld [vmem:[%s10220_s16 + $0x210] ss:$12 sps:$4 sm:$0xff]   ;;  %v8995_v58 = vld [vmem:[%s10220_s16 + $0x22c] ss:$12 sps:$4 sm:$0xff]  }
 0xcf4   : > { %v9135_v60 = vpop.eup %9134  ;;  %v5954_v33 = vadd.f32 1.0, %v9133_v37  ;;  %v5963_v48 = vmul.f32 %v5955_v29, %v5899_v24  ;;  %v8996_v62 = vld [vmem:[%s10220_s16 + $0x2f0] ss:$12 sps:$4 sm:$0xff]   ;;  %v8993_v53 = vld [vmem:[%s10220_s16 + $0x228] ss:$12 sps:$4 sm:$0xff]  }
 0xcf5   : > { %v9137_v22 = vpop.eup %9136  ;;  %v5965_v0 = vpack.c.bf16 %v5961_v2, %v5957_v63  ;;  %v5952_v25 = vadd.f32 1.0, %v9135_v60  ;;  %v5958_v45 = vmul.f32 %v5950_v57, %v5894_v56  ;;  %v8997_v46 = vld [vmem:[%s10220_s16 + $0x230] ss:$12 sps:$4 sm:$0xff]   ;;  %v8998_v29 = vld [vmem:[%s10220_s16 + $0x240] ss:$12 sps:$4 sm:$0xff]  }
 0xcf6   : > { %v5962_v40 = vmul.f32 %v5954_v33, %v5898_v28  ;;  %v5956_v26 = vadd.f32 1.0, %v9137_v22  ;;  %v11423_v54 = vpack.c.bf16 %v5963_v48, %v5959_v39  ;;  %v9000_v24 = vld [vmem:[%s10220_s16 + $0x244] ss:$12 sps:$4 sm:$0xff]   ;;  %v9003_v37 = vld [vmem:[%s10220_s16 + $0x25c] ss:$12 sps:$4 sm:$0xff]  }
 0xcf7   : > { %v5960_v5 = vmul.f32 %v5952_v25, %v5896_v32  ;;  %v9001_v56 = vld [vmem:[%s10220_s16 + $0x258] ss:$12 sps:$4 sm:$0xff]   ;;  %v9006_v57 = vld [vmem:[%s10220_s16 + $0x274] ss:$12 sps:$4 sm:$0xff]   ;;  %v9004_v63 = vld [vmem:[%s10220_s16 + $0x270] ss:$12 sps:$4 sm:$0xff]  }
 0xcf8   : > { %v5966_v18 = vpack.c.bf16 %v5962_v40, %v5958_v45  ;;  %v5964_v30 = vmul.f32 %v5956_v26, %v5900_v49  ;;  %v9009_v2 = vld [vmem:[%s10220_s16 + $0x28c] ss:$12 sps:$4 sm:$0xff]   ;;  %v9007_v60 = vld [vmem:[%s10220_s16 + $0x288] ss:$12 sps:$4 sm:$0xff]   ;;  %v9012_v28 = vld [vmem:[%s10220_s16 + $0x2a4] ss:$12 sps:$4 sm:$0xff]  }
 0xcf9   : > { %v9010_v33 = vld [vmem:[%s10220_s16 + $0x2a0] ss:$12 sps:$4 sm:$0xff]   ;;  %v9015_v39 = vld [vmem:[%s10220_s16 + $0x2bc] ss:$12 sps:$4 sm:$0xff]   ;;  %v9013_v48 = vld [vmem:[%s10220_s16 + $0x2b8] ss:$12 sps:$4 sm:$0xff]  }
 0xcfa   : > { %6658 = vmatprep.mubr.bf16.mxu1 %v5966_v18  ;;  %6744 = vmatprep.mubr.bf16.mxu0 %v5966_v18  ;;  %v5968_v16 = vpack.c.bf16 %v5964_v30, %v5960_v5  ;;  %v9018_v22 = vld [vmem:[%s10220_s16 + $0x2d4] ss:$12 sps:$4 sm:$0xff]   ;;  %v9021_v32 = vld [vmem:[%s10220_s16 + $0x2ec] ss:$12 sps:$4 sm:$0xff]  }
 0xcfb   : > { %6659 = vmatmul.mubr.bf16.vlgmr.msra.gmra.mrb[64].mxu1 %v5965_v0  ;;  %6745 = vmatmul.mubr.bf16.vlgmr.msra.gmra.mrb[76].mxu0 %v5965_v0  ;;  %v9016_v0 = vld [vmem:[%s10220_s16 + $0x2d0] ss:$12 sps:$4 sm:$0xff]   ;;  %v9019_v49 = vld [vmem:[%s10220_s16 + $0x2e8] ss:$12 sps:$4 sm:$0xff]   ;;  %s11614_s16 = scalar_lea.vmem [#allocation21], %s10192_s15  ;;  %s11615_s15 = sld [smem:[#allocation32_spill]] }
 0xcfc   : > { %6670 = vmatpush1.bf16.msra.mxu1 %v8958_v36  ;;  %7907 = vmatpush3.bf16.msra.mxu0 %v8962_v9  ;;  %v6097_v9 = vld [vmem:[%s11612_s14] sm:$0x7] }
 0xcfd   : > { %6701 = vmatprep.mubr.bf16.mxu1 %v5968_v16  ;;  %6785 = vmatprep.mubr.bf16.mxu0 %v5968_v16  ;;  %v6110_v5 = vrot.slane %v6097_v9, %v10516_v51 }
 0xcfe   : > { %6671 = vmatprep.subr.bf16.mxu1 %v8965_v6  ;;  %7908 = vmatprep.subr.bf16.mxu0 %v8966_v7 }
 0xd00   : > { %6672 = vmatpush1.bf16.msra.mxu1 %v8963_v13  ;;  %7909 = vmatpush3.bf16.msra.mxu0 %v8967_v1 }
 0xd01   : > { %6673 = vmatprep.subr.bf16.mxu1 %v8970_v44  ;;  %7910 = vmatprep.subr.bf16.mxu0 %v8971_v12  ;;  %p7770_p3 = scmp.ne.s32.totalorder %s11615_s15, 1 }
 0xd04   : > { %6674 = vmatpush1.bf16.msra.mxu1 %v8968_v47  ;;  %7911 = vmatpush3.bf16.msra.mxu0 %v8972_v11  ;;  %v6102_v11 = vrot.slane %v6097_v9, %v10513_v50 }
 0xd05   : > { %6675 = vmatprep.subr.bf16.mxu1 %v8975_v15  ;;  %7912 = vmatprep.subr.bf16.mxu0 %v8976_v59  ;;  %v6106_v15 = vrot.slane %v6097_v9, %v10520_v14 }
 0xd08   : > { %6676 = vmatpush1.bf16.msra.mxu1 %v8973_v4  ;;  %7913 = vmatpush3.bf16.msra.mxu0 %v8977_v35 }
 0xd09   : > { %6677 = vmatprep.subr.bf16.mxu1 %v8980_v42  ;;  %7914 = vmatprep.subr.bf16.mxu0 %v8981_v10 }
 0xd0c   : > { %6678 = vmatpush1.bf16.msra.mxu1 %v8978_v23  ;;  %7915 = vmatpush3.bf16.msra.mxu0 %v8982_v21 }
 0xd0d   : > { %6679 = vmatprep.subr.bf16.mxu1 %v8985_v27  ;;  %7916 = vmatprep.subr.bf16.mxu0 %v8986_v61 }
 0xd10   : > { %6680 = vmatpush1.bf16.msra.mxu1 %v8983_v8  ;;  %7917 = vmatpush3.bf16.msra.mxu0 %v8987_v38 }
 0xd11   : > { %6681 = vmatprep.subr.bf16.mxu1 %v8990_v3  ;;  %7918 = vmatprep.subr.bf16.mxu0 %v8991_v41 }
 0xd14   : > { %6682 = vmatpush1.bf16.msra.mxu1 %v8988_v17  ;;  %7919 = vmatpush3.bf16.msra.mxu0 %v8992_v43 }
 0xd15   : > { %6683 = vmatprep.subr.bf16.mxu1 %v8995_v58  ;;  %7920 = vmatprep.subr.bf16.mxu0 %v8996_v62 }
 0xd18   : > { %6684 = vmatpush1.bf16.msra.mxu1 %v8993_v53  ;;  %7921 = vmatpush3.bf16.msra.mxu0 %v8997_v46 }
 0xd19   : > { %6685 = vmatprep.subr.bf16.mxu1 %v9000_v24 }
 0xd1b   : > { %6786 = vmatmul.mubr.bf16.vlgmr.msra.gmra.mrb[80].mxu0 %v11423_v54 }
 0xd1c   : > { %6686 = vmatpush1.bf16.msra.mxu1 %v8998_v29 }
 0xd1d   : > { %6687 = vmatprep.subr.bf16.mxu1 %v9003_v37 }
 0xd20   : > { %6688 = vmatpush1.bf16.msra.mxu1 %v9001_v56 }
 0xd21   : > { %6689 = vmatprep.subr.bf16.mxu1 %v9006_v57 }
 0xd24   : > { %6690 = vmatpush1.bf16.msra.mxu1 %v9004_v63 }
 0xd25   : > { %6691 = vmatprep.subr.bf16.mxu1 %v9009_v2 }
 0xd28   : > { %6692 = vmatpush1.bf16.msra.mxu1 %v9007_v60 }
 0xd29   : > { %6693 = vmatprep.subr.bf16.mxu1 %v9012_v28 }
 0xd2c   : > { %6694 = vmatpush1.bf16.msra.mxu1 %v9010_v33 }
 0xd2d   : > { %6695 = vmatprep.subr.bf16.mxu1 %v9015_v39 }
 0xd30   : > { %6696 = vmatpush1.bf16.msra.mxu1 %v9013_v48 }
 0xd31   : > { %6697 = vmatprep.subr.bf16.mxu1 %v9018_v22 }
 0xd34   : > { %6698 = vmatpush1.bf16.msra.mxu1 %v9016_v0 }
 0xd35   : > { %6699 = vmatprep.subr.bf16.mxu1 %v9021_v32 }
 0xd38   : > { %6700 = vmatpush1.bf16.msra.mxu1 %v9019_v49 }
 0xd3b   : > { %6702 = vmatmul.mubr.bf16.vlgmr.msra.gmra.mrb[64].mxu1 %v11423_v54 }
 0xdce   : > { %v7900_v25 = vpop.f32.mrb[76].mxu0 }
 0xdcf   : > { %v7901_v45 = vpop.f32.mrb[77].mxu0 }
 0xdd0   : > { %v7902_v40 = vadd.f32 %v7901_v45, %v7900_v25  ;;  %v7903_v26 = vpop.f32.mrb[78].mxu0 }
 0xdd1   : > { %v7904_v18 = vpop.f32.mrb[79].mxu0 }
 0xdd2   : > { %v7905_v36 = vadd.f32 %v7904_v18, %v7903_v26  ;;  %v6747_v6 = vadd.f32 %v7902_v40, %v6110_v5  ;;  %v6800_v26 = vld [vmem:[%s11613_s19] sm:$0x7]  ;;  %v6801_v18 = vld [vmem:[%s11614_s16] sm:$0x7] }
 0xdd3   : > { %v6852_v9 = vrot.slane %v6800_v26, %v10520_v14 }
 0xdd4   : > { %v6750_v44 = vadd.f32 %v7905_v36, %v6110_v5  ;;  %v6848_v36 = vrot.slane %v6800_v26, %v10513_v50  ;;  %v6856_v5 = vrot.slane %v6800_v26, %v10516_v51 }
 0xdee   : > { %v7922_v30 = vpop.f32.mrb[80].mxu0 }
 0xdef   : > { %v7923_v16 = vpop.f32.mrb[81].mxu0 }
 0xdf0   : > { %v7924_v7 = vadd.f32 %v7923_v16, %v7922_v30  ;;  %v7925_v13 = vpop.f32.mrb[82].mxu0  ;;  %v6870_v16 = vrot.slane %v6801_v18, %v10513_v50 }
 0xdf1   : > { %v7926_v1 = vpop.f32.mrb[83].mxu0 }
 0xdf2   : > { %v6788_v12 = vadd.f32 %v7924_v7, %v6747_v6  ;;  %v7927_v47 = vadd.f32 %v7926_v1, %v7925_v13  ;;  %v6874_v6 = vrot.slane %v6801_v18, %v10520_v14  ;;  %v6878_v13 = vrot.slane %v6801_v18, %v10516_v51 }
 0xdf4   : > { %v6791_v54 = vadd.f32 %v7927_v47, %v6750_v44  ;;  %v6796_v41 = vadd.f32 %v6788_v12, %v11322_v55 }
 0xdf6   : > { %v6799_v43 = vadd.f32 %v6791_v54, %v11319_v20 }
 0xe0e   : > { %v6703_v59 = vpop.f32.mrb[64].mxu1 }
 0xe0f   : > { %v8140_v4 = vadd.f32 %v6703_v59, %v6102_v11  ;;  %v6705_v35 = vpop.f32.mrb[65].mxu1 }
 0xe10   : > { %v8141_v42 = vadd.f32 %v6705_v35, %v6106_v15  ;;  %v6707_v10 = vpop.f32.mrb[66].mxu1 }
 0xe11   : > { %v6794_v23 = vadd.f32 %v8140_v4, %v11271_v34  ;;  %v8142_v21 = vadd.f32 %v6707_v10, %v6102_v11  ;;  %v6709_v27 = vpop.f32.mrb[67].mxu1 }
 0xe12   : > { %v6795_v61 = vadd.f32 %v8141_v42, %v11267_v52  ;;  %v8143_v8 = vadd.f32 %v6709_v27, %v6106_v15 }
 0xe13   : > { %v6797_v38 = vadd.f32 %v8142_v21, %v11273_v19 }
 0xe14   : > { %v6798_v3 = vadd.f32 %v8143_v8, %v11269_v31  ;;  %v6802_v17 = vadd.f32 %v6795_v61, %v6794_v23 }
 0xe16   : > { %v6806_v58 = vadd.f32 %v6798_v3, %v6797_v38  ;;  %v6803_v62 = vadd.f32 %v6802_v17, %v6796_v41 }
 0xe18   : > { %6804 = vadd.xlane.f32.xlu1 %v6803_v62  ;;  %v6807_v53 = vadd.f32 %v6806_v58, %v6799_v43 }
 0xe1a   : > { %6808 = vadd.xlane.f32.xlu0 %v6807_v53 }
 0xea5   : > { %v6805_v34 = vpop.xlane.xlu1 %6804 }
 0xea6   : > { %v6810_v46 = vmul.f32 0.0026041667, %v6805_v34 }
 0xea7   : > { %v6809_v24 = vpop.xlane.xlu0 %6808 }
 0xea8   : > { %v6812_v29 = vsub.f32 %v6794_v23, %v6810_v46  ;;  %v6813_v52 = vsub.f32 %v6795_v61, %v6810_v46  ;;  %v6811_v37 = vmul.f32 0.0026041667, %v6809_v24  ;;  %v6814_v56 = vsub.f32 %v6796_v41, %v6810_v46 }
 0xeaa   : > { %v6815_v19 = vsub.f32 %v6797_v38, %v6811_v37  ;;  %v6816_v57 = vsub.f32 %v6798_v3, %v6811_v37  ;;  %v6817_v31 = vsub.f32 %v6799_v43, %v6811_v37  ;;  %v6818_v63 = vmul.f32 %v6812_v29, %v6812_v29 }
 0xeab   : > { %v6819_v55 = vmul.f32 %v6813_v52, %v6813_v52  ;;  %v6820_v20 = vmul.f32 %v6814_v56, %v6814_v56 }
 0xeac   : > { %v6821_v2 = vmul.f32 %v6815_v19, %v6815_v19  ;;  %v6822_v60 = vmul.f32 %v6816_v57, %v6816_v57  ;;  %v6823_v33 = vmul.f32 %v6817_v31, %v6817_v31 }
 0xead   : > { %v6824_v28 = vadd.f32 %v6819_v55, %v6818_v63 }
 0xeae   : > { %v6828_v39 = vadd.f32 %v6822_v60, %v6821_v2 }
 0xeaf   : > { %v6825_v48 = vadd.f32 %v6824_v28, %v6820_v20 }
 0xeb0   : > { %v6829_v22 = vadd.f32 %v6828_v39, %v6823_v33 }
 0xeb1   : > { %6826 = vadd.xlane.f32.xlu1 %v6825_v48 }
 0xeb2   : > { %6830 = vadd.xlane.f32.xlu0 %v6829_v22 }
 0xf3e   : > { %v6827_v0 = vpop.xlane.xlu1 %6826 }
 0xf3f   : > { %v6832_v32 = vmul.f32 0.0026041667, %v6827_v0  ;;  %v6831_v49 = vpop.xlane.xlu0 %6830 }
 0xf40   : > { %v6833_v25 = vmul.f32 0.0026041667, %v6831_v49 }
 0xf41   : > { %v6834_v45 = vadd.f32 1e-05, %v6832_v32 }
 0xf42   : > { %v6835_v40 = vadd.f32 1e-05, %v6833_v25 }
 0xf43   : > { %9138 = vrsqrt.f32 %v6834_v45 }
 0xf44   : > { %9140 = vrsqrt.f32 %v6835_v40 }
 0xf4d   : > { %v9139_v30 = vpop.eup %9138 }
 0xf4e   : > { %v9141_v7 = vpop.eup %9140  ;;  %v6838_v1 = vmul.f32 %v9139_v30, %v6812_v29  ;;  %v6839_v44 = vmul.f32 %v9139_v30, %v6813_v52  ;;  %v6840_v12 = vmul.f32 %v9139_v30, %v6814_v56 }
 0xf4f   : > { %v6841_v47 = vmul.f32 %v9141_v7, %v6815_v19  ;;  %v6842_v54 = vmul.f32 %v9141_v7, %v6816_v57  ;;  %v6843_v11 = vmul.f32 %v9141_v7, %v6817_v31 }
 0xf50   : > { %v6860_v15 = vmul.f32 %v6848_v36, %v6838_v1  ;;  %v6861_v59 = vmul.f32 %v6852_v9, %v6839_v44  ;;  %v6862_v4 = vmul.f32 %v6856_v5, %v6840_v12  ;;  %6897 = sbr.rel (%p7770_p3) target bundleno = 3930 (0xf5a), region = 132 }
 0xf51   : > { %v6863_v35 = vmul.f32 %v6848_v36, %v6841_v47  ;;  %v6864_v42 = vmul.f32 %v6852_v9, %v6842_v54  ;;  %v6865_v10 = vmul.f32 %v6856_v5, %v6843_v11 }
 0xf52   : > { %v6882_v23 = vadd.f32 %v6870_v16, %v6860_v15  ;;  %v6883_v21 = vadd.f32 %v6874_v6, %v6861_v59  ;;  %v6884_v50 = vadd.f32 %v6878_v13, %v6862_v4 }
 0xf53   : > { %v6885_v27 = vadd.f32 %v6870_v16, %v6863_v35  ;;  %v6886_v14 = vadd.f32 %v6874_v6, %v6864_v42  ;;  %v6887_v61 = vadd.f32 %v6878_v13, %v6865_v10 }
 0xf54   : > { %6888 = vst [vmem:[#allocation2] sm:$0xff] %v6882_v23  ;;  %6889 = vst [vmem:[#allocation2 + $0x8] sm:$0xff] %v6883_v21 }
 0xf55   : > { %6890 = vst [vmem:[#allocation2 + $0x10] sm:$0xff] %v6884_v50  ;;  %6891 = vst [vmem:[#allocation2 + $0x18] sm:$0xff] %v6885_v27 }
 0xf56   : > { %6892 = vst [vmem:[#allocation2 + $0x20] sm:$0xff] %v6886_v14  ;;  %6893 = vst [vmem:[#allocation2 + $0x28] sm:$0xff] %v6887_v61 }
 0xf57   : > { %6898 = vst [vmem:[%s10250_s17] sm:$0xff] %v6882_v23  ;;  %6899 = vst [vmem:[%s10250_s17 + $0x8] sm:$0xff] %v6883_v21 }
 0xf58   : > { %6900 = vst [vmem:[%s10250_s17 + $0x10] sm:$0xff] %v6884_v50  ;;  %6901 = vst [vmem:[%s10250_s17 + $0x18] sm:$0xff] %v6885_v27 }
 0xf59   : > { %6902 = vst [vmem:[%s10250_s17 + $0x20] sm:$0xff] %v6886_v14  ;;  %6903 = vst [vmem:[%s10250_s17 + $0x28] sm:$0xff] %v6887_v61 }
 0xf5a PF: > { %s11616_s27 = sld [smem:[#allocation35_spill]]  ;;  %s11617_s29 = sld [smem:[#allocation30_spill]] }
 0xf5b   : > { %s11618_s30 = sld [smem:[#allocation31_spill]]  ;;  %s11619_s15 = sld [smem:[#allocation38_spill]] }
 0xf5c   : > { %s11620_s17 = sld [smem:[#allocation34_spill]]  ;;  %s11621_s3 = sld [smem:[#allocation36_spill]] }
 0xf5d   : > { %s11622_s19 = sld [smem:[#allocation37_spill]]  ;;  %s11623_s16 = smov %s9590_s18 }
 0xf60   : > { %s45_s20 = sadd.s32 1, %s11616_s27  }
 0xf61   : > { %p42_p2 = scmp.ge.s32.totalorder %s45_s20, 6  }
 0xf62   : > { %s11624_s18 = smov %s11621_s3 }
 0xf63   :  { %44 = sbr.rel (!%p42_p2) target bundleno = 25 (0x19), region = 263 }
 0xf6a   :  { %6925 = vsyncpa [#allocation5], 1 }
 0xf6b   :  { %6927 = vsyncpa [#allocation5 + $0x1], 1 }
 0xf6c   :  { %6928 = vsyncpa [#allocation7], 1 }
 0xf6d   :  { %6930 = vsyncpa [#allocation7 + $0x1], 1 }
 0xf6e   :  { %6931 = vsyncpa [#allocation10], 1 }
 0xf6f   :  { %6933 = vsyncpa [#allocation10 + $0x1], 1 }
 0xf70   :  { %6934 = vsyncpa [#allocation13], 1 }
 0xf71   :  { %6936 = vsyncpa [#allocation13 + $0x1], 1 }
 0xf72   :  { %6937 = vsyncpa [#allocation16], 1 }
 0xf73   :  { %6939 = vsyncpa [#allocation16 + $0x1], 1 }
 0xf74   :  { %6940 = vsyncpa [#allocation19], 1 }
 0xf75   :  { %6942 = vsyncpa [#allocation19 + $0x1], 1 }
 0xf76   :  { %6943 = vsyncpa [#allocation22], 1 }
 0xf77   :  { %6945 = vsyncpa [#allocation22 + $0x1], 1 }

</bundles_post_ra>
